<compile_context>
chip_gen: v6e
topology: v6e:2x2x1
jax: 0.10.0
libtpu: 0.0.40
codegen_flags: <defaults>
</compile_context>

<pallas_src>
import functools
import math

import jax
import jax.numpy as jnp
from jax.experimental import pallas as pl
from jax.experimental.pallas import tpu as pltpu


# ----------------------------------------------------------------------------
# One MAB on in-VMEM values (q_in, k_in) with whole-weight refs (ln=False).
# ----------------------------------------------------------------------------
def _mab_compute(q_in, k_in, wq, bq, wk, bk, wv, bv, wo, bo, scratch,
                 *, num_heads, dim_V):
    dot = functools.partial(jnp.dot,
                            preferred_element_type=jnp.float32,
                            precision=jax.lax.Precision.HIGHEST)

    # Full-width projections: 3 lane-dense matmuls instead of 3*num_heads
    # narrow ones (better MXU utilization).
    Q = dot(q_in, wq[...]) + bq[...]            # (Nq, dim_V)
    K = dot(k_in, wk[...]) + bk[...]            # (Nk, dim_V)
    V = dot(k_in, wv[...]) + bv[...]            # (Nk, dim_V)

    ds = dim_V // num_heads
    scale = 1.0 / math.sqrt(dim_V)              # torch divides by sqrt(dim_V)

    # Static unroll over heads; each head's output is stored directly into
    # its lane range of the VMEM scratch (no value-level concat needed).
    for h in range(num_heads):
        sl = slice(h * ds, (h + 1) * ds)
        Qh = Q[:, sl]                           # (Nq, ds)
        Kh = K[:, sl]                           # (Nk, ds)
        Vh = V[:, sl]                           # (Nk, ds)

        logits = dot(Qh, Kh.T) * scale          # (Nq, Nk)
        logits = logits - jnp.max(logits, axis=-1, keepdims=True)
        e = jnp.exp(logits)
        A = e / jnp.sum(e, axis=-1, keepdims=True)

        scratch[:, sl] = Qh + dot(A, Vh)        # residual inside head

    O = scratch[...]                            # (Nq, dim_V), lane-dense
    ff = dot(O, wo[...]) + bo[...]
    return O + jnp.maximum(ff, 0.0)             # O + relu(fc_o(O))


# ----------------------------------------------------------------------------
# Fused ISAB kernel: one batch element per grid step, both MABs in one body.
# ----------------------------------------------------------------------------
def _isab_kernel(x_ref, i_ref,
                 wq0, bq0, wk0, bk0, wv0, bv0, wo0, bo0,
                 wq1, bq1, wk1, bk1, wv1, bv1, wo1, bo1,
                 o_ref, h_scratch, o_scratch, *, num_heads, dim_V):
    x = x_ref[0]            # (N, dim_in)
    ind = i_ref[0]          # (num_inds, dim_V)  -- inducing points, batch-shared

    # H = mab0(I, X); stays in VMEM, never touches HBM.
    H = _mab_compute(ind, x, wq0, bq0, wk0, bk0, wv0, bv0, wo0, bo0,
                     h_scratch, num_heads=num_heads, dim_V=dim_V)
    # out = mab1(X, H)
    out = _mab_compute(x, H, wq1, bq1, wk1, bk1, wv1, bv1, wo1, bo1,
                       o_scratch, num_heads=num_heads, dim_V=dim_V)

    o_ref[0] = out.astype(o_ref.dtype)


@functools.partial(jax.jit, static_argnames=("num_heads",))
def isab_forward(X, params, *, num_heads):
    """ISAB.forward: H = mab0(I.repeat(B,1,1), X); return mab1(X, H)."""
    B, N, dim_in = X.shape
    I = params["I"]                              # (1, num_inds, dim_V)
    _, num_inds, dim_V = I.shape
    assert dim_V % num_heads == 0
    p0, p1 = params["mab0"], params["mab1"]

    whole = lambda b: (0, 0)                     # whole-array weight blocks

    kernel = functools.partial(_isab_kernel, num_heads=num_heads, dim_V=dim_V)

    return pl.pallas_call(
        kernel,
        out_shape=jax.ShapeDtypeStruct((B, N, dim_V), X.dtype),
        grid=(B,),
        in_specs=[
            pl.BlockSpec((1, N, dim_in), lambda b: (b, 0, 0)),
            # Inducing points: broadcast across batch via constant index_map
            # (no .repeat materialized in HBM).
            pl.BlockSpec((1, num_inds, dim_V), lambda b: (0, 0, 0)),
            # mab0 weights (dim_Q = dim_V, dim_K = dim_in)
            pl.BlockSpec((dim_V, dim_V), whole), pl.BlockSpec((1, dim_V), whole),
            pl.BlockSpec((dim_in, dim_V), whole), pl.BlockSpec((1, dim_V), whole),
            pl.BlockSpec((dim_in, dim_V), whole), pl.BlockSpec((1, dim_V), whole),
            pl.BlockSpec((dim_V, dim_V), whole), pl.BlockSpec((1, dim_V), whole),
            # mab1 weights (dim_Q = dim_in, dim_K = dim_V)
            pl.BlockSpec((dim_in, dim_V), whole), pl.BlockSpec((1, dim_V), whole),
            pl.BlockSpec((dim_V, dim_V), whole), pl.BlockSpec((1, dim_V), whole),
            pl.BlockSpec((dim_V, dim_V), whole), pl.BlockSpec((1, dim_V), whole),
            pl.BlockSpec((dim_V, dim_V), whole), pl.BlockSpec((1, dim_V), whole),
        ],
        out_specs=pl.BlockSpec((1, N, dim_V), lambda b: (b, 0, 0)),
        scratch_shapes=[pltpu.VMEM((num_inds, dim_V), jnp.float32),
                        pltpu.VMEM((N, dim_V), jnp.float32)],
        compiler_params=pltpu.CompilerParams(
            # Batch axis is independent -> shards across the 2 TCs on v7x.
            dimension_semantics=("parallel",)),
    )(X, I,
      p0["wq"], p0["bq"], p0["wk"], p0["bk"], p0["wv"], p0["bv"], p0["wo"], p0["bo"],
      p1["wq"], p1["bq"], p1["wk"], p1["bk"], p1["wv"], p1["bv"], p1["wo"], p1["bo"])


# ----------------------------------------------------------------------------
# Parameter init (weights stored as (in, out) == torch Linear weight transposed)
# ----------------------------------------------------------------------------
def init_isab_params(key, dim_in, dim_out, num_heads, num_inds):
    def linear(k, d_in, d_out):
        kw, kb = jax.random.split(k)
        bound = 1.0 / math.sqrt(d_in)
        w = jax.random.uniform(kw, (d_in, d_out), jnp.float32, -bound, bound)
        b = jax.random.uniform(kb, (1, d_out), jnp.float32, -bound, bound)
        return w, b

    def mab(k, dim_Q, dim_K, dim_V):
        ks = jax.random.split(k, 4)
        wq, bq = linear(ks[0], dim_Q, dim_V)
        wk, bk = linear(ks[1], dim_K, dim_V)
        wv, bv = linear(ks[2], dim_K, dim_V)
        wo, bo = linear(ks[3], dim_V, dim_V)
        return dict(wq=wq, bq=bq, wk=wk, bk=bk, wv=wv, bv=bv, wo=wo, bo=bo)

    k_i, k0, k1 = jax.random.split(key, 3)
    limit = math.sqrt(6.0 / (num_inds + dim_out))            # xavier_uniform
    I = jax.random.uniform(k_i, (1, num_inds, dim_out), jnp.float32, -limit, limit)
    return dict(I=I,
                mab0=mab(k0, dim_out, dim_in, dim_out),
                mab1=mab(k1, dim_in, dim_out, dim_out))


# ----------------------------------------------------------------------------
# Pure-JAX reference (mirrors the PyTorch code) for correctness checking.
# ----------------------------------------------------------------------------
def _mab_ref(Qin, Kin, p, num_heads):
    mm = functools.partial(jnp.matmul, precision=jax.lax.Precision.HIGHEST)
    Q = mm(Qin, p["wq"]) + p["bq"]
    K = mm(Kin, p["wk"]) + p["bk"]
    V = mm(Kin, p["wv"]) + p["bv"]
    dim_V = Q.shape[-1]
    B = K.shape[0]
    if Q.shape[0] == 1:
        Q = jnp.broadcast_to(Q, (B,) + Q.shape[1:])
    Q_ = jnp.concatenate(jnp.split(Q, num_heads, axis=2), axis=0)
    K_ = jnp.concatenate(jnp.split(K, num_heads, axis=2), axis=0)
    V_ = jnp.concatenate(jnp.split(V, num_heads, axis=2), axis=0)
    A = jax.nn.softmax(mm(Q_, jnp.swapaxes(K_, 1, 2)) / math.sqrt(dim_V), axis=2)
    O = jnp.concatenate(jnp.split(Q_ + mm(A, V_), num_heads, axis=0), axis=2)
    O = O + jax.nn.relu(mm(O, p["wo"]) + p["bo"])
    return O


def _isab_ref(X, params, num_heads):
    H = _mab_ref(params["I"], X, params["mab0"], num_heads)
    return _mab_ref(X, H, params["mab1"], num_heads)


if __name__ == "__main__":
    # Small but lane-dense shapes: dim_out (= dim_V) is a multiple of 128 so
    # every output block store is a full-width vst.
    B, N = 2, 16
    DIM_IN, DIM_OUT = 64, 128
    NUM_HEADS, NUM_INDS = 4, 8

    key = jax.random.PRNGKey(0)
    kx, kp = jax.random.split(key)
    X = jax.random.normal(kx, (B, N, DIM_IN), dtype=jnp.float32)
    params = init_isab_params(kp, DIM_IN, DIM_OUT, NUM_HEADS, NUM_INDS)

    out = isab_forward(X, params, num_heads=NUM_HEADS)
    out = jax.block_until_ready(out)
    assert out.shape == (B, N, DIM_OUT)

    ref = _isab_ref(X, params, NUM_HEADS)
    max_err = float(jnp.max(jnp.abs(out - ref)))
    assert jnp.allclose(out, ref, atol=1e-3, rtol=1e-3), f"mismatch vs reference: {max_err}"

    print("KERNEL_OK")
</pallas_src>

<mosaic_0001>
module attributes {stable_mosaic.version = 11 : i64} {
  func.func @_isab_kernel(%arg0: i32, %arg1: memref<1x16x64xf32, #tpu.memory_space<vmem>>, %arg2: memref<1x8x128xf32, #tpu.memory_space<vmem>>, %arg3: memref<128x128xf32, #tpu.memory_space<vmem>>, %arg4: memref<1x128xf32, #tpu.memory_space<vmem>>, %arg5: memref<64x128xf32, #tpu.memory_space<vmem>>, %arg6: memref<1x128xf32, #tpu.memory_space<vmem>>, %arg7: memref<64x128xf32, #tpu.memory_space<vmem>>, %arg8: memref<1x128xf32, #tpu.memory_space<vmem>>, %arg9: memref<128x128xf32, #tpu.memory_space<vmem>>, %arg10: memref<1x128xf32, #tpu.memory_space<vmem>>, %arg11: memref<64x128xf32, #tpu.memory_space<vmem>>, %arg12: memref<1x128xf32, #tpu.memory_space<vmem>>, %arg13: memref<128x128xf32, #tpu.memory_space<vmem>>, %arg14: memref<1x128xf32, #tpu.memory_space<vmem>>, %arg15: memref<128x128xf32, #tpu.memory_space<vmem>>, %arg16: memref<1x128xf32, #tpu.memory_space<vmem>>, %arg17: memref<128x128xf32, #tpu.memory_space<vmem>>, %arg18: memref<1x128xf32, #tpu.memory_space<vmem>>, %arg19: memref<1x16x128xf32, #tpu.memory_space<vmem>>, %arg20: memref<8x128xf32, #tpu.memory_space<vmem>>, %arg21: memref<16x128xf32, #tpu.memory_space<vmem>>) attributes {dimension_semantics = [#tpu.dimension_semantics<parallel>], iteration_bounds = array<i64: 2>, scalar_prefetch = 0 : i64, scratch_operands = 2 : i64, tpu.core_type = #tpu.core_type<tc>, window_params = [{transform_indices = @transform_0, window_bounds = array<i64: 1, 16, 64>}, {pipeline_mode = #tpu.pipeline_mode<synchronous>, transform_indices = @transform_1, window_bounds = array<i64: 1, 8, 128>}, {pipeline_mode = #tpu.pipeline_mode<synchronous>, transform_indices = @transform_2, window_bounds = array<i64: 128, 128>}, {pipeline_mode = #tpu.pipeline_mode<synchronous>, transform_indices = @transform_3, window_bounds = array<i64: 1, 128>}, {pipeline_mode = #tpu.pipeline_mode<synchronous>, transform_indices = @transform_4, window_bounds = array<i64: 64, 128>}, {pipeline_mode = #tpu.pipeline_mode<synchronous>, transform_indices = @transform_5, window_bounds = array<i64: 1, 128>}, {pipeline_mode = #tpu.pipeline_mode<synchronous>, transform_indices = @transform_6, window_bounds = array<i64: 64, 128>}, {pipeline_mode = #tpu.pipeline_mode<synchronous>, transform_indices = @transform_7, window_bounds = array<i64: 1, 128>}, {pipeline_mode = #tpu.pipeline_mode<synchronous>, transform_indices = @transform_8, window_bounds = array<i64: 128, 128>}, {pipeline_mode = #tpu.pipeline_mode<synchronous>, transform_indices = @transform_9, window_bounds = array<i64: 1, 128>}, {pipeline_mode = #tpu.pipeline_mode<synchronous>, transform_indices = @transform_10, window_bounds = array<i64: 64, 128>}, {pipeline_mode = #tpu.pipeline_mode<synchronous>, transform_indices = @transform_11, window_bounds = array<i64: 1, 128>}, {pipeline_mode = #tpu.pipeline_mode<synchronous>, transform_indices = @transform_12, window_bounds = array<i64: 128, 128>}, {pipeline_mode = #tpu.pipeline_mode<synchronous>, transform_indices = @transform_13, window_bounds = array<i64: 1, 128>}, {pipeline_mode = #tpu.pipeline_mode<synchronous>, transform_indices = @transform_14, window_bounds = array<i64: 128, 128>}, {pipeline_mode = #tpu.pipeline_mode<synchronous>, transform_indices = @transform_15, window_bounds = array<i64: 1, 128>}, {pipeline_mode = #tpu.pipeline_mode<synchronous>, transform_indices = @transform_16, window_bounds = array<i64: 128, 128>}, {pipeline_mode = #tpu.pipeline_mode<synchronous>, transform_indices = @transform_17, window_bounds = array<i64: 1, 128>}, {transform_indices = @transform_18, window_bounds = array<i64: 1, 16, 128>}]} {
    %c0 = arith.constant 0 : index
    %c0_0 = arith.constant 0 : index
    %c0_1 = arith.constant 0 : index
    %0 = vector.load %arg1[%c0, %c0_0, %c0_1] : memref<1x16x64xf32, #tpu.memory_space<vmem>>, vector<1x16x64xf32>
    %1 = vector.shape_cast %0 : vector<1x16x64xf32> to vector<16x64xf32>
    %c0_2 = arith.constant 0 : index
    %c0_3 = arith.constant 0 : index
    %c0_4 = arith.constant 0 : index
    %2 = vector.load %arg2[%c0_2, %c0_3, %c0_4] : memref<1x8x128xf32, #tpu.memory_space<vmem>>, vector<1x8x128xf32>
    %3 = vector.shape_cast %2 : vector<1x8x128xf32> to vector<8x128xf32>
    %c0_5 = arith.constant 0 : index
    %c0_6 = arith.constant 0 : index
    %4 = vector.load %arg3[%c0_5, %c0_6] : memref<128x128xf32, #tpu.memory_space<vmem>>, vector<128x128xf32>
    %cst = arith.constant dense<0.000000e+00> : vector<8x128xf32>
    %5 = tpu.matmul %3, %4, %cst {dimension_numbers = #tpu.dot_dimension_numbers<[1], [0], [0], [1], [0, 0, 1, 1], [], []>, precision = #tpu.contract_precision<fp32>} : vector<8x128xf32>, vector<128x128xf32>, vector<8x128xf32> -> vector<8x128xf32>
    %c0_7 = arith.constant 0 : index
    %c0_8 = arith.constant 0 : index
    %6 = vector.load %arg4[%c0_7, %c0_8] : memref<1x128xf32, #tpu.memory_space<vmem>>, vector<1x128xf32>
    %7 = vector.broadcast %6 : vector<1x128xf32> to vector<8x128xf32>
    %8 = arith.addf %5, %7 : vector<8x128xf32>
    %c0_9 = arith.constant 0 : index
    %c0_10 = arith.constant 0 : index
    %9 = vector.load %arg5[%c0_9, %c0_10] : memref<64x128xf32, #tpu.memory_space<vmem>>, vector<64x128xf32>
    %cst_11 = arith.constant dense<0.000000e+00> : vector<16x128xf32>
    %10 = tpu.matmul %1, %9, %cst_11 {dimension_numbers = #tpu.dot_dimension_numbers<[1], [0], [0], [1], [0, 0, 1, 1], [], []>, precision = #tpu.contract_precision<fp32>} : vector<16x64xf32>, vector<64x128xf32>, vector<16x128xf32> -> vector<16x128xf32>
    %c0_12 = arith.constant 0 : index
    %c0_13 = arith.constant 0 : index
    %11 = vector.load %arg6[%c0_12, %c0_13] : memref<1x128xf32, #tpu.memory_space<vmem>>, vector<1x128xf32>
    %12 = vector.broadcast %11 : vector<1x128xf32> to vector<16x128xf32>
    %13 = arith.addf %10, %12 : vector<16x128xf32>
    %c0_14 = arith.constant 0 : index
    %c0_15 = arith.constant 0 : index
    %14 = vector.load %arg7[%c0_14, %c0_15] : memref<64x128xf32, #tpu.memory_space<vmem>>, vector<64x128xf32>
    %cst_16 = arith.constant dense<0.000000e+00> : vector<16x128xf32>
    %15 = tpu.matmul %1, %14, %cst_16 {dimension_numbers = #tpu.dot_dimension_numbers<[1], [0], [0], [1], [0, 0, 1, 1], [], []>, precision = #tpu.contract_precision<fp32>} : vector<16x64xf32>, vector<64x128xf32>, vector<16x128xf32> -> vector<16x128xf32>
    %c0_17 = arith.constant 0 : index
    %c0_18 = arith.constant 0 : index
    %16 = vector.load %arg8[%c0_17, %c0_18] : memref<1x128xf32, #tpu.memory_space<vmem>>, vector<1x128xf32>
    %17 = vector.broadcast %16 : vector<1x128xf32> to vector<16x128xf32>
    %18 = arith.addf %15, %17 : vector<16x128xf32>
    %19 = vector.extract_strided_slice %8 {offsets = [0, 0], sizes = [8, 32], strides = [1, 1]} : vector<8x128xf32> to vector<8x32xf32>
    %20 = vector.extract_strided_slice %13 {offsets = [0, 0], sizes = [16, 32], strides = [1, 1]} : vector<16x128xf32> to vector<16x32xf32>
    %21 = vector.extract_strided_slice %18 {offsets = [0, 0], sizes = [16, 32], strides = [1, 1]} : vector<16x128xf32> to vector<16x32xf32>
    %22 = tpu.transpose %20, [1, 0] : vector<16x32xf32> -> vector<32x16xf32>
    %cst_19 = arith.constant dense<0.000000e+00> : vector<8x16xf32>
    %23 = tpu.matmul %19, %22, %cst_19 {dimension_numbers = #tpu.dot_dimension_numbers<[1], [0], [0], [1], [0, 0, 1, 1], [], []>, precision = #tpu.contract_precision<fp32>} : vector<8x32xf32>, vector<32x16xf32>, vector<8x16xf32> -> vector<8x16xf32>
    %cst_20 = arith.constant 0.0883883461 : f32
    %24 = vector.broadcast %cst_20 : f32 to vector<8x16xf32>
    %25 = arith.mulf %23, %24 : vector<8x16xf32>
    %cst_21 = arith.constant dense<0xFF800000> : vector<8xf32>
    %26 = vector.multi_reduction <maximumf>, %25, %cst_21 [1] : vector<8x16xf32> to vector<8xf32>
    %27 = vector.shape_cast %26 : vector<8xf32> to vector<8x1xf32>
    %28 = vector.broadcast %27 : vector<8x1xf32> to vector<8x16xf32>
    %29 = arith.subf %25, %28 : vector<8x16xf32>
    %30 = math.exp %29 : vector<8x16xf32>
    %cst_22 = arith.constant dense<0.000000e+00> : vector<8xf32>
    %31 = vector.multi_reduction <add>, %30, %cst_22 [1] : vector<8x16xf32> to vector<8xf32>
    %32 = vector.shape_cast %31 : vector<8xf32> to vector<8x1xf32>
    %33 = vector.broadcast %32 : vector<8x1xf32> to vector<8x16xf32>
    %34 = arith.divf %30, %33 : vector<8x16xf32>
    %cst_23 = arith.constant dense<0.000000e+00> : vector<8x32xf32>
    %35 = tpu.matmul %34, %21, %cst_23 {dimension_numbers = #tpu.dot_dimension_numbers<[1], [0], [0], [1], [0, 0, 1, 1], [], []>, precision = #tpu.contract_precision<fp32>} : vector<8x16xf32>, vector<16x32xf32>, vector<8x32xf32> -> vector<8x32xf32>
    %36 = arith.addf %19, %35 : vector<8x32xf32>
    %c0_24 = arith.constant 0 : index
    %c0_25 = arith.constant 0 : index
    %37 = vector.load %arg20[%c0_24, %c0_25] : memref<8x128xf32, #tpu.memory_space<vmem>>, vector<8x32xf32>
    tpu.vector_store %arg20[%c0_24, %c0_25], %36 {strides = array<i32>} : memref<8x128xf32, #tpu.memory_space<vmem>>, vector<8x32xf32>,
    %38 = vector.extract_strided_slice %8 {offsets = [0, 32], sizes = [8, 32], strides = [1, 1]} : vector<8x128xf32> to vector<8x32xf32>
    %39 = vector.extract_strided_slice %13 {offsets = [0, 32], sizes = [16, 32], strides = [1, 1]} : vector<16x128xf32> to vector<16x32xf32>
    %40 = vector.extract_strided_slice %18 {offsets = [0, 32], sizes = [16, 32], strides = [1, 1]} : vector<16x128xf32> to vector<16x32xf32>
    %41 = tpu.transpose %39, [1, 0] : vector<16x32xf32> -> vector<32x16xf32>
    %cst_26 = arith.constant dense<0.000000e+00> : vector<8x16xf32>
    %42 = tpu.matmul %38, %41, %cst_26 {dimension_numbers = #tpu.dot_dimension_numbers<[1], [0], [0], [1], [0, 0, 1, 1], [], []>, precision = #tpu.contract_precision<fp32>} : vector<8x32xf32>, vector<32x16xf32>, vector<8x16xf32> -> vector<8x16xf32>
    %cst_27 = arith.constant 0.0883883461 : f32
    %43 = vector.broadcast %cst_27 : f32 to vector<8x16xf32>
    %44 = arith.mulf %42, %43 : vector<8x16xf32>
    %cst_28 = arith.constant dense<0xFF800000> : vector<8xf32>
    %45 = vector.multi_reduction <maximumf>, %44, %cst_28 [1] : vector<8x16xf32> to vector<8xf32>
    %46 = vector.shape_cast %45 : vector<8xf32> to vector<8x1xf32>
    %47 = vector.broadcast %46 : vector<8x1xf32> to vector<8x16xf32>
    %48 = arith.subf %44, %47 : vector<8x16xf32>
    %49 = math.exp %48 : vector<8x16xf32>
    %cst_29 = arith.constant dense<0.000000e+00> : vector<8xf32>
    %50 = vector.multi_reduction <add>, %49, %cst_29 [1] : vector<8x16xf32> to vector<8xf32>
    %51 = vector.shape_cast %50 : vector<8xf32> to vector<8x1xf32>
    %52 = vector.broadcast %51 : vector<8x1xf32> to vector<8x16xf32>
    %53 = arith.divf %49, %52 : vector<8x16xf32>
    %cst_30 = arith.constant dense<0.000000e+00> : vector<8x32xf32>
    %54 = tpu.matmul %53, %40, %cst_30 {dimension_numbers = #tpu.dot_dimension_numbers<[1], [0], [0], [1], [0, 0, 1, 1], [], []>, precision = #tpu.contract_precision<fp32>} : vector<8x16xf32>, vector<16x32xf32>, vector<8x32xf32> -> vector<8x32xf32>
    %55 = arith.addf %38, %54 : vector<8x32xf32>
    %c0_31 = arith.constant 0 : index
    %c32 = arith.constant 32 : index
    %56 = vector.load %arg20[%c0_31, %c32] : memref<8x128xf32, #tpu.memory_space<vmem>>, vector<8x32xf32>
    tpu.vector_store %arg20[%c0_31, %c32], %55 {strides = array<i32>} : memref<8x128xf32, #tpu.memory_space<vmem>>, vector<8x32xf32>,
    %57 = vector.extract_strided_slice %8 {offsets = [0, 64], sizes = [8, 32], strides = [1, 1]} : vector<8x128xf32> to vector<8x32xf32>
    %58 = vector.extract_strided_slice %13 {offsets = [0, 64], sizes = [16, 32], strides = [1, 1]} : vector<16x128xf32> to vector<16x32xf32>
    %59 = vector.extract_strided_slice %18 {offsets = [0, 64], sizes = [16, 32], strides = [1, 1]} : vector<16x128xf32> to vector<16x32xf32>
    %60 = tpu.transpose %58, [1, 0] : vector<16x32xf32> -> vector<32x16xf32>
    %cst_32 = arith.constant dense<0.000000e+00> : vector<8x16xf32>
    %61 = tpu.matmul %57, %60, %cst_32 {dimension_numbers = #tpu.dot_dimension_numbers<[1], [0], [0], [1], [0, 0, 1, 1], [], []>, precision = #tpu.contract_precision<fp32>} : vector<8x32xf32>, vector<32x16xf32>, vector<8x16xf32> -> vector<8x16xf32>
    %cst_33 = arith.constant 0.0883883461 : f32
    %62 = vector.broadcast %cst_33 : f32 to vector<8x16xf32>
    %63 = arith.mulf %61, %62 : vector<8x16xf32>
    %cst_34 = arith.constant dense<0xFF800000> : vector<8xf32>
    %64 = vector.multi_reduction <maximumf>, %63, %cst_34 [1] : vector<8x16xf32> to vector<8xf32>
    %65 = vector.shape_cast %64 : vector<8xf32> to vector<8x1xf32>
    %66 = vector.broadcast %65 : vector<8x1xf32> to vector<8x16xf32>
    %67 = arith.subf %63, %66 : vector<8x16xf32>
    %68 = math.exp %67 : vector<8x16xf32>
    %cst_35 = arith.constant dense<0.000000e+00> : vector<8xf32>
    %69 = vector.multi_reduction <add>, %68, %cst_35 [1] : vector<8x16xf32> to vector<8xf32>
    %70 = vector.shape_cast %69 : vector<8xf32> to vector<8x1xf32>
    %71 = vector.broadcast %70 : vector<8x1xf32> to vector<8x16xf32>
    %72 = arith.divf %68, %71 : vector<8x16xf32>
    %cst_36 = arith.constant dense<0.000000e+00> : vector<8x32xf32>
    %73 = tpu.matmul %72, %59, %cst_36 {dimension_numbers = #tpu.dot_dimension_numbers<[1], [0], [0], [1], [0, 0, 1, 1], [], []>, precision = #tpu.contract_precision<fp32>} : vector<8x16xf32>, vector<16x32xf32>, vector<8x32xf32> -> vector<8x32xf32>
    %74 = arith.addf %57, %73 : vector<8x32xf32>
    %c0_37 = arith.constant 0 : index
    %c64 = arith.constant 64 : index
    %75 = vector.load %arg20[%c0_37, %c64] : memref<8x128xf32, #tpu.memory_space<vmem>>, vector<8x32xf32>
    tpu.vector_store %arg20[%c0_37, %c64], %74 {strides = array<i32>} : memref<8x128xf32, #tpu.memory_space<vmem>>, vector<8x32xf32>,
    %76 = vector.extract_strided_slice %8 {offsets = [0, 96], sizes = [8, 32], strides = [1, 1]} : vector<8x128xf32> to vector<8x32xf32>
    %77 = vector.extract_strided_slice %13 {offsets = [0, 96], sizes = [16, 32], strides = [1, 1]} : vector<16x128xf32> to vector<16x32xf32>
    %78 = vector.extract_strided_slice %18 {offsets = [0, 96], sizes = [16, 32], strides = [1, 1]} : vector<16x128xf32> to vector<16x32xf32>
    %79 = tpu.transpose %77, [1, 0] : vector<16x32xf32> -> vector<32x16xf32>
    %cst_38 = arith.constant dense<0.000000e+00> : vector<8x16xf32>
    %80 = tpu.matmul %76, %79, %cst_38 {dimension_numbers = #tpu.dot_dimension_numbers<[1], [0], [0], [1], [0, 0, 1, 1], [], []>, precision = #tpu.contract_precision<fp32>} : vector<8x32xf32>, vector<32x16xf32>, vector<8x16xf32> -> vector<8x16xf32>
    %cst_39 = arith.constant 0.0883883461 : f32
    %81 = vector.broadcast %cst_39 : f32 to vector<8x16xf32>
    %82 = arith.mulf %80, %81 : vector<8x16xf32>
    %cst_40 = arith.constant dense<0xFF800000> : vector<8xf32>
    %83 = vector.multi_reduction <maximumf>, %82, %cst_40 [1] : vector<8x16xf32> to vector<8xf32>
    %84 = vector.shape_cast %83 : vector<8xf32> to vector<8x1xf32>
    %85 = vector.broadcast %84 : vector<8x1xf32> to vector<8x16xf32>
    %86 = arith.subf %82, %85 : vector<8x16xf32>
    %87 = math.exp %86 : vector<8x16xf32>
    %cst_41 = arith.constant dense<0.000000e+00> : vector<8xf32>
    %88 = vector.multi_reduction <add>, %87, %cst_41 [1] : vector<8x16xf32> to vector<8xf32>
    %89 = vector.shape_cast %88 : vector<8xf32> to vector<8x1xf32>
    %90 = vector.broadcast %89 : vector<8x1xf32> to vector<8x16xf32>
    %91 = arith.divf %87, %90 : vector<8x16xf32>
    %cst_42 = arith.constant dense<0.000000e+00> : vector<8x32xf32>
    %92 = tpu.matmul %91, %78, %cst_42 {dimension_numbers = #tpu.dot_dimension_numbers<[1], [0], [0], [1], [0, 0, 1, 1], [], []>, precision = #tpu.contract_precision<fp32>} : vector<8x16xf32>, vector<16x32xf32>, vector<8x32xf32> -> vector<8x32xf32>
    %93 = arith.addf %76, %92 : vector<8x32xf32>
    %c0_43 = arith.constant 0 : index
    %c96 = arith.constant 96 : index
    %94 = vector.load %arg20[%c0_43, %c96] : memref<8x128xf32, #tpu.memory_space<vmem>>, vector<8x32xf32>
    tpu.vector_store %arg20[%c0_43, %c96], %93 {strides = array<i32>} : memref<8x128xf32, #tpu.memory_space<vmem>>, vector<8x32xf32>,
    %c0_44 = arith.constant 0 : index
    %c0_45 = arith.constant 0 : index
    %95 = vector.load %arg20[%c0_44, %c0_45] : memref<8x128xf32, #tpu.memory_space<vmem>>, vector<8x128xf32>
    %c0_46 = arith.constant 0 : index
    %c0_47 = arith.constant 0 : index
    %96 = vector.load %arg9[%c0_46, %c0_47] : memref<128x128xf32, #tpu.memory_space<vmem>>, vector<128x128xf32>
    %cst_48 = arith.constant dense<0.000000e+00> : vector<8x128xf32>
    %97 = tpu.matmul %95, %96, %cst_48 {dimension_numbers = #tpu.dot_dimension_numbers<[1], [0], [0], [1], [0, 0, 1, 1], [], []>, precision = #tpu.contract_precision<fp32>} : vector<8x128xf32>, vector<128x128xf32>, vector<8x128xf32> -> vector<8x128xf32>
    %c0_49 = arith.constant 0 : index
    %c0_50 = arith.constant 0 : index
    %98 = vector.load %arg10[%c0_49, %c0_50] : memref<1x128xf32, #tpu.memory_space<vmem>>, vector<1x128xf32>
    %99 = vector.broadcast %98 : vector<1x128xf32> to vector<8x128xf32>
    %100 = arith.addf %97, %99 : vector<8x128xf32>
    %cst_51 = arith.constant 0.000000e+00 : f32
    %101 = vector.broadcast %cst_51 : f32 to vector<8x128xf32>
    %102 = arith.maximumf %100, %101 : vector<8x128xf32>
    %103 = arith.addf %95, %102 : vector<8x128xf32>
    %c0_52 = arith.constant 0 : index
    %c0_53 = arith.constant 0 : index
    %104 = vector.load %arg11[%c0_52, %c0_53] : memref<64x128xf32, #tpu.memory_space<vmem>>, vector<64x128xf32>
    %cst_54 = arith.constant dense<0.000000e+00> : vector<16x128xf32>
    %105 = tpu.matmul %1, %104, %cst_54 {dimension_numbers = #tpu.dot_dimension_numbers<[1], [0], [0], [1], [0, 0, 1, 1], [], []>, precision = #tpu.contract_precision<fp32>} : vector<16x64xf32>, vector<64x128xf32>, vector<16x128xf32> -> vector<16x128xf32>
    %c0_55 = arith.constant 0 : index
    %c0_56 = arith.constant 0 : index
    %106 = vector.load %arg12[%c0_55, %c0_56] : memref<1x128xf32, #tpu.memory_space<vmem>>, vector<1x128xf32>
    %107 = vector.broadcast %106 : vector<1x128xf32> to vector<16x128xf32>
    %108 = arith.addf %105, %107 : vector<16x128xf32>
    %c0_57 = arith.constant 0 : index
    %c0_58 = arith.constant 0 : index
    %109 = vector.load %arg13[%c0_57, %c0_58] : memref<128x128xf32, #tpu.memory_space<vmem>>, vector<128x128xf32>
    %cst_59 = arith.constant dense<0.000000e+00> : vector<8x128xf32>
    %110 = tpu.matmul %103, %109, %cst_59 {dimension_numbers = #tpu.dot_dimension_numbers<[1], [0], [0], [1], [0, 0, 1, 1], [], []>, precision = #tpu.contract_precision<fp32>} : vector<8x128xf32>, vector<128x128xf32>, vector<8x128xf32> -> vector<8x128xf32>
    %c0_60 = arith.constant 0 : index
    %c0_61 = arith.constant 0 : index
    %111 = vector.load %arg14[%c0_60, %c0_61] : memref<1x128xf32, #tpu.memory_space<vmem>>, vector<1x128xf32>
    %112 = vector.broadcast %111 : vector<1x128xf32> to vector<8x128xf32>
    %113 = arith.addf %110, %112 : vector<8x128xf32>
    %c0_62 = arith.constant 0 : index
    %c0_63 = arith.constant 0 : index
    %114 = vector.load %arg15[%c0_62, %c0_63] : memref<128x128xf32, #tpu.memory_space<vmem>>, vector<128x128xf32>
    %cst_64 = arith.constant dense<0.000000e+00> : vector<8x128xf32>
    %115 = tpu.matmul %103, %114, %cst_64 {dimension_numbers = #tpu.dot_dimension_numbers<[1], [0], [0], [1], [0, 0, 1, 1], [], []>, precision = #tpu.contract_precision<fp32>} : vector<8x128xf32>, vector<128x128xf32>, vector<8x128xf32> -> vector<8x128xf32>
    %c0_65 = arith.constant 0 : index
    %c0_66 = arith.constant 0 : index
    %116 = vector.load %arg16[%c0_65, %c0_66] : memref<1x128xf32, #tpu.memory_space<vmem>>, vector<1x128xf32>
    %117 = vector.broadcast %116 : vector<1x128xf32> to vector<8x128xf32>
    %118 = arith.addf %115, %117 : vector<8x128xf32>
    %119 = vector.extract_strided_slice %108 {offsets = [0, 0], sizes = [16, 32], strides = [1, 1]} : vector<16x128xf32> to vector<16x32xf32>
    %120 = vector.extract_strided_slice %113 {offsets = [0, 0], sizes = [8, 32], strides = [1, 1]} : vector<8x128xf32> to vector<8x32xf32>
    %121 = vector.extract_strided_slice %118 {offsets = [0, 0], sizes = [8, 32], strides = [1, 1]} : vector<8x128xf32> to vector<8x32xf32>
    %122 = tpu.transpose %120, [1, 0] : vector<8x32xf32> -> vector<32x8xf32>
    %cst_67 = arith.constant dense<0.000000e+00> : vector<16x8xf32>
    %123 = tpu.matmul %119, %122, %cst_67 {dimension_numbers = #tpu.dot_dimension_numbers<[1], [0], [0], [1], [0, 0, 1, 1], [], []>, precision = #tpu.contract_precision<fp32>} : vector<16x32xf32>, vector<32x8xf32>, vector<16x8xf32> -> vector<16x8xf32>
    %cst_68 = arith.constant 0.0883883461 : f32
    %124 = vector.broadcast %cst_68 : f32 to vector<16x8xf32>
    %125 = arith.mulf %123, %124 : vector<16x8xf32>
    %cst_69 = arith.constant dense<0xFF800000> : vector<16xf32>
    %126 = vector.multi_reduction <maximumf>, %125, %cst_69 [1] : vector<16x8xf32> to vector<16xf32>
    %127 = vector.shape_cast %126 : vector<16xf32> to vector<16x1xf32>
    %128 = vector.broadcast %127 : vector<16x1xf32> to vector<16x8xf32>
    %129 = arith.subf %125, %128 : vector<16x8xf32>
    %130 = math.exp %129 : vector<16x8xf32>
    %cst_70 = arith.constant dense<0.000000e+00> : vector<16xf32>
    %131 = vector.multi_reduction <add>, %130, %cst_70 [1] : vector<16x8xf32> to vector<16xf32>
    %132 = vector.shape_cast %131 : vector<16xf32> to vector<16x1xf32>
    %133 = vector.broadcast %132 : vector<16x1xf32> to vector<16x8xf32>
    %134 = arith.divf %130, %133 : vector<16x8xf32>
    %cst_71 = arith.constant dense<0.000000e+00> : vector<16x32xf32>
    %135 = tpu.matmul %134, %121, %cst_71 {dimension_numbers = #tpu.dot_dimension_numbers<[1], [0], [0], [1], [0, 0, 1, 1], [], []>, precision = #tpu.contract_precision<fp32>} : vector<16x8xf32>, vector<8x32xf32>, vector<16x32xf32> -> vector<16x32xf32>
    %136 = arith.addf %119, %135 : vector<16x32xf32>
    %c0_72 = arith.constant 0 : index
    %c0_73 = arith.constant 0 : index
    %137 = vector.load %arg21[%c0_72, %c0_73] : memref<16x128xf32, #tpu.memory_space<vmem>>, vector<16x32xf32>
    tpu.vector_store %arg21[%c0_72, %c0_73], %136 {strides = array<i32>} : memref<16x128xf32, #tpu.memory_space<vmem>>, vector<16x32xf32>,
    %138 = vector.extract_strided_slice %108 {offsets = [0, 32], sizes = [16, 32], strides = [1, 1]} : vector<16x128xf32> to vector<16x32xf32>
    %139 = vector.extract_strided_slice %113 {offsets = [0, 32], sizes = [8, 32], strides = [1, 1]} : vector<8x128xf32> to vector<8x32xf32>
    %140 = vector.extract_strided_slice %118 {offsets = [0, 32], sizes = [8, 32], strides = [1, 1]} : vector<8x128xf32> to vector<8x32xf32>
    %141 = tpu.transpose %139, [1, 0] : vector<8x32xf32> -> vector<32x8xf32>
    %cst_74 = arith.constant dense<0.000000e+00> : vector<16x8xf32>
    %142 = tpu.matmul %138, %141, %cst_74 {dimension_numbers = #tpu.dot_dimension_numbers<[1], [0], [0], [1], [0, 0, 1, 1], [], []>, precision = #tpu.contract_precision<fp32>} : vector<16x32xf32>, vector<32x8xf32>, vector<16x8xf32> -> vector<16x8xf32>
    %cst_75 = arith.constant 0.0883883461 : f32
    %143 = vector.broadcast %cst_75 : f32 to vector<16x8xf32>
    %144 = arith.mulf %142, %143 : vector<16x8xf32>
    %cst_76 = arith.constant dense<0xFF800000> : vector<16xf32>
    %145 = vector.multi_reduction <maximumf>, %144, %cst_76 [1] : vector<16x8xf32> to vector<16xf32>
    %146 = vector.shape_cast %145 : vector<16xf32> to vector<16x1xf32>
    %147 = vector.broadcast %146 : vector<16x1xf32> to vector<16x8xf32>
    %148 = arith.subf %144, %147 : vector<16x8xf32>
    %149 = math.exp %148 : vector<16x8xf32>
    %cst_77 = arith.constant dense<0.000000e+00> : vector<16xf32>
    %150 = vector.multi_reduction <add>, %149, %cst_77 [1] : vector<16x8xf32> to vector<16xf32>
    %151 = vector.shape_cast %150 : vector<16xf32> to vector<16x1xf32>
    %152 = vector.broadcast %151 : vector<16x1xf32> to vector<16x8xf32>
    %153 = arith.divf %149, %152 : vector<16x8xf32>
    %cst_78 = arith.constant dense<0.000000e+00> : vector<16x32xf32>
    %154 = tpu.matmul %153, %140, %cst_78 {dimension_numbers = #tpu.dot_dimension_numbers<[1], [0], [0], [1], [0, 0, 1, 1], [], []>, precision = #tpu.contract_precision<fp32>} : vector<16x8xf32>, vector<8x32xf32>, vector<16x32xf32> -> vector<16x32xf32>
    %155 = arith.addf %138, %154 : vector<16x32xf32>
    %c0_79 = arith.constant 0 : index
    %c32_80 = arith.constant 32 : index
    %156 = vector.load %arg21[%c0_79, %c32_80] : memref<16x128xf32, #tpu.memory_space<vmem>>, vector<16x32xf32>
    tpu.vector_store %arg21[%c0_79, %c32_80], %155 {strides = array<i32>} : memref<16x128xf32, #tpu.memory_space<vmem>>, vector<16x32xf32>,
    %157 = vector.extract_strided_slice %108 {offsets = [0, 64], sizes = [16, 32], strides = [1, 1]} : vector<16x128xf32> to vector<16x32xf32>
    %158 = vector.extract_strided_slice %113 {offsets = [0, 64], sizes = [8, 32], strides = [1, 1]} : vector<8x128xf32> to vector<8x32xf32>
    %159 = vector.extract_strided_slice %118 {offsets = [0, 64], sizes = [8, 32], strides = [1, 1]} : vector<8x128xf32> to vector<8x32xf32>
    %160 = tpu.transpose %158, [1, 0] : vector<8x32xf32> -> vector<32x8xf32>
    %cst_81 = arith.constant dense<0.000000e+00> : vector<16x8xf32>
    %161 = tpu.matmul %157, %160, %cst_81 {dimension_numbers = #tpu.dot_dimension_numbers<[1], [0], [0], [1], [0, 0, 1, 1], [], []>, precision = #tpu.contract_precision<fp32>} : vector<16x32xf32>, vector<32x8xf32>, vector<16x8xf32> -> vector<16x8xf32>
    %cst_82 = arith.constant 0.0883883461 : f32
    %162 = vector.broadcast %cst_82 : f32 to vector<16x8xf32>
    %163 = arith.mulf %161, %162 : vector<16x8xf32>
    %cst_83 = arith.constant dense<0xFF800000> : vector<16xf32>
    %164 = vector.multi_reduction <maximumf>, %163, %cst_83 [1] : vector<16x8xf32> to vector<16xf32>
    %165 = vector.shape_cast %164 : vector<16xf32> to vector<16x1xf32>
    %166 = vector.broadcast %165 : vector<16x1xf32> to vector<16x8xf32>
    %167 = arith.subf %163, %166 : vector<16x8xf32>
    %168 = math.exp %167 : vector<16x8xf32>
    %cst_84 = arith.constant dense<0.000000e+00> : vector<16xf32>
    %169 = vector.multi_reduction <add>, %168, %cst_84 [1] : vector<16x8xf32> to vector<16xf32>
    %170 = vector.shape_cast %169 : vector<16xf32> to vector<16x1xf32>
    %171 = vector.broadcast %170 : vector<16x1xf32> to vector<16x8xf32>
    %172 = arith.divf %168, %171 : vector<16x8xf32>
    %cst_85 = arith.constant dense<0.000000e+00> : vector<16x32xf32>
    %173 = tpu.matmul %172, %159, %cst_85 {dimension_numbers = #tpu.dot_dimension_numbers<[1], [0], [0], [1], [0, 0, 1, 1], [], []>, precision = #tpu.contract_precision<fp32>} : vector<16x8xf32>, vector<8x32xf32>, vector<16x32xf32> -> vector<16x32xf32>
    %174 = arith.addf %157, %173 : vector<16x32xf32>
    %c0_86 = arith.constant 0 : index
    %c64_87 = arith.constant 64 : index
    %175 = vector.load %arg21[%c0_86, %c64_87] : memref<16x128xf32, #tpu.memory_space<vmem>>, vector<16x32xf32>
    tpu.vector_store %arg21[%c0_86, %c64_87], %174 {strides = array<i32>} : memref<16x128xf32, #tpu.memory_space<vmem>>, vector<16x32xf32>,
    %176 = vector.extract_strided_slice %108 {offsets = [0, 96], sizes = [16, 32], strides = [1, 1]} : vector<16x128xf32> to vector<16x32xf32>
    %177 = vector.extract_strided_slice %113 {offsets = [0, 96], sizes = [8, 32], strides = [1, 1]} : vector<8x128xf32> to vector<8x32xf32>
    %178 = vector.extract_strided_slice %118 {offsets = [0, 96], sizes = [8, 32], strides = [1, 1]} : vector<8x128xf32> to vector<8x32xf32>
    %179 = tpu.transpose %177, [1, 0] : vector<8x32xf32> -> vector<32x8xf32>
    %cst_88 = arith.constant dense<0.000000e+00> : vector<16x8xf32>
    %180 = tpu.matmul %176, %179, %cst_88 {dimension_numbers = #tpu.dot_dimension_numbers<[1], [0], [0], [1], [0, 0, 1, 1], [], []>, precision = #tpu.contract_precision<fp32>} : vector<16x32xf32>, vector<32x8xf32>, vector<16x8xf32> -> vector<16x8xf32>
    %cst_89 = arith.constant 0.0883883461 : f32
    %181 = vector.broadcast %cst_89 : f32 to vector<16x8xf32>
    %182 = arith.mulf %180, %181 : vector<16x8xf32>
    %cst_90 = arith.constant dense<0xFF800000> : vector<16xf32>
    %183 = vector.multi_reduction <maximumf>, %182, %cst_90 [1] : vector<16x8xf32> to vector<16xf32>
    %184 = vector.shape_cast %183 : vector<16xf32> to vector<16x1xf32>
    %185 = vector.broadcast %184 : vector<16x1xf32> to vector<16x8xf32>
    %186 = arith.subf %182, %185 : vector<16x8xf32>
    %187 = math.exp %186 : vector<16x8xf32>
    %cst_91 = arith.constant dense<0.000000e+00> : vector<16xf32>
    %188 = vector.multi_reduction <add>, %187, %cst_91 [1] : vector<16x8xf32> to vector<16xf32>
    %189 = vector.shape_cast %188 : vector<16xf32> to vector<16x1xf32>
    %190 = vector.broadcast %189 : vector<16x1xf32> to vector<16x8xf32>
    %191 = arith.divf %187, %190 : vector<16x8xf32>
    %cst_92 = arith.constant dense<0.000000e+00> : vector<16x32xf32>
    %192 = tpu.matmul %191, %178, %cst_92 {dimension_numbers = #tpu.dot_dimension_numbers<[1], [0], [0], [1], [0, 0, 1, 1], [], []>, precision = #tpu.contract_precision<fp32>} : vector<16x8xf32>, vector<8x32xf32>, vector<16x32xf32> -> vector<16x32xf32>
    %193 = arith.addf %176, %192 : vector<16x32xf32>
    %c0_93 = arith.constant 0 : index
    %c96_94 = arith.constant 96 : index
    %194 = vector.load %arg21[%c0_93, %c96_94] : memref<16x128xf32, #tpu.memory_space<vmem>>, vector<16x32xf32>
    tpu.vector_store %arg21[%c0_93, %c96_94], %193 {strides = array<i32>} : memref<16x128xf32, #tpu.memory_space<vmem>>, vector<16x32xf32>,
    %c0_95 = arith.constant 0 : index
    %c0_96 = arith.constant 0 : index
    %195 = vector.load %arg21[%c0_95, %c0_96] : memref<16x128xf32, #tpu.memory_space<vmem>>, vector<16x128xf32>
    %c0_97 = arith.constant 0 : index
    %c0_98 = arith.constant 0 : index
    %196 = vector.load %arg17[%c0_97, %c0_98] : memref<128x128xf32, #tpu.memory_space<vmem>>, vector<128x128xf32>
    %cst_99 = arith.constant dense<0.000000e+00> : vector<16x128xf32>
    %197 = tpu.matmul %195, %196, %cst_99 {dimension_numbers = #tpu.dot_dimension_numbers<[1], [0], [0], [1], [0, 0, 1, 1], [], []>, precision = #tpu.contract_precision<fp32>} : vector<16x128xf32>, vector<128x128xf32>, vector<16x128xf32> -> vector<16x128xf32>
    %c0_100 = arith.constant 0 : index
    %c0_101 = arith.constant 0 : index
    %198 = vector.load %arg18[%c0_100, %c0_101] : memref<1x128xf32, #tpu.memory_space<vmem>>, vector<1x128xf32>
    %199 = vector.broadcast %198 : vector<1x128xf32> to vector<16x128xf32>
    %200 = arith.addf %197, %199 : vector<16x128xf32>
    %cst_102 = arith.constant 0.000000e+00 : f32
    %201 = vector.broadcast %cst_102 : f32 to vector<16x128xf32>
    %202 = arith.maximumf %200, %201 : vector<16x128xf32>
    %203 = arith.addf %195, %202 : vector<16x128xf32>
    %c0_103 = arith.constant 0 : index
    %c0_104 = arith.constant 0 : index
    %c0_105 = arith.constant 0 : index
    %204 = vector.load %arg19[%c0_103, %c0_104, %c0_105] : memref<1x16x128xf32, #tpu.memory_space<vmem>>, vector<1x16x128xf32>
    %205 = vector.shape_cast %204 : vector<1x16x128xf32> to vector<16x128xf32>
    %206 = vector.shape_cast %203 : vector<16x128xf32> to vector<1x16x128xf32>
    tpu.vector_store %arg19[%c0_103, %c0_104, %c0_105], %206 {strides = array<i32>} : memref<1x16x128xf32, #tpu.memory_space<vmem>>, vector<1x16x128xf32>,
    return
  }
  func.func @transform_0(%arg0: i32) -> (i32, i32, i32) {
    %c0_i32 = arith.constant 0 : i32
    %c0_i32_0 = arith.constant 0 : i32
    %c0_i32_1 = arith.constant 0 : i32
    return %arg0, %c0_i32, %c0_i32_0 : i32, i32, i32
  }
  func.func @transform_1(%arg0: i32) -> (i32, i32, i32) {
    %c0_i32 = arith.constant 0 : i32
    %c0_i32_0 = arith.constant 0 : i32
    %c0_i32_1 = arith.constant 0 : i32
    %c0_i32_2 = arith.constant 0 : i32
    return %c0_i32, %c0_i32_0, %c0_i32_1 : i32, i32, i32
  }
  func.func @transform_2(%arg0: i32) -> (i32, i32) {
    %c0_i32 = arith.constant 0 : i32
    %c0_i32_0 = arith.constant 0 : i32
    %c0_i32_1 = arith.constant 0 : i32
    return %c0_i32, %c0_i32_0 : i32, i32
  }
  func.func @transform_3(%arg0: i32) -> (i32, i32) {
    %c0_i32 = arith.constant 0 : i32
    %c0_i32_0 = arith.constant 0 : i32
    %c0_i32_1 = arith.constant 0 : i32
    return %c0_i32, %c0_i32_0 : i32, i32
  }
  func.func @transform_4(%arg0: i32) -> (i32, i32) {
    %c0_i32 = arith.constant 0 : i32
    %c0_i32_0 = arith.constant 0 : i32
    %c0_i32_1 = arith.constant 0 : i32
    return %c0_i32, %c0_i32_0 : i32, i32
  }
  func.func @transform_5(%arg0: i32) -> (i32, i32) {
    %c0_i32 = arith.constant 0 : i32
    %c0_i32_0 = arith.constant 0 : i32
    %c0_i32_1 = arith.constant 0 : i32
    return %c0_i32, %c0_i32_0 : i32, i32
  }
  func.func @transform_6(%arg0: i32) -> (i32, i32) {
    %c0_i32 = arith.constant 0 : i32
    %c0_i32_0 = arith.constant 0 : i32
    %c0_i32_1 = arith.constant 0 : i32
    return %c0_i32, %c0_i32_0 : i32, i32
  }
  func.func @transform_7(%arg0: i32) -> (i32, i32) {
    %c0_i32 = arith.constant 0 : i32
    %c0_i32_0 = arith.constant 0 : i32
    %c0_i32_1 = arith.constant 0 : i32
    return %c0_i32, %c0_i32_0 : i32, i32
  }
  func.func @transform_8(%arg0: i32) -> (i32, i32) {
    %c0_i32 = arith.constant 0 : i32
    %c0_i32_0 = arith.constant 0 : i32
    %c0_i32_1 = arith.constant 0 : i32
    return %c0_i32, %c0_i32_0 : i32, i32
  }
  func.func @transform_9(%arg0: i32) -> (i32, i32) {
    %c0_i32 = arith.constant 0 : i32
    %c0_i32_0 = arith.constant 0 : i32
    %c0_i32_1 = arith.constant 0 : i32
    return %c0_i32, %c0_i32_0 : i32, i32
  }
  func.func @transform_10(%arg0: i32) -> (i32, i32) {
    %c0_i32 = arith.constant 0 : i32
    %c0_i32_0 = arith.constant 0 : i32
    %c0_i32_1 = arith.constant 0 : i32
    return %c0_i32, %c0_i32_0 : i32, i32
  }
  func.func @transform_11(%arg0: i32) -> (i32, i32) {
    %c0_i32 = arith.constant 0 : i32
    %c0_i32_0 = arith.constant 0 : i32
    %c0_i32_1 = arith.constant 0 : i32
    return %c0_i32, %c0_i32_0 : i32, i32
  }
  func.func @transform_12(%arg0: i32) -> (i32, i32) {
    %c0_i32 = arith.constant 0 : i32
    %c0_i32_0 = arith.constant 0 : i32
    %c0_i32_1 = arith.constant 0 : i32
    return %c0_i32, %c0_i32_0 : i32, i32
  }
  func.func @transform_13(%arg0: i32) -> (i32, i32) {
    %c0_i32 = arith.constant 0 : i32
    %c0_i32_0 = arith.constant 0 : i32
    %c0_i32_1 = arith.constant 0 : i32
    return %c0_i32, %c0_i32_0 : i32, i32
  }
  func.func @transform_14(%arg0: i32) -> (i32, i32) {
    %c0_i32 = arith.constant 0 : i32
    %c0_i32_0 = arith.constant 0 : i32
    %c0_i32_1 = arith.constant 0 : i32
    return %c0_i32, %c0_i32_0 : i32, i32
  }
  func.func @transform_15(%arg0: i32) -> (i32, i32) {
    %c0_i32 = arith.constant 0 : i32
    %c0_i32_0 = arith.constant 0 : i32
    %c0_i32_1 = arith.constant 0 : i32
    return %c0_i32, %c0_i32_0 : i32, i32
  }
  func.func @transform_16(%arg0: i32) -> (i32, i32) {
    %c0_i32 = arith.constant 0 : i32
    %c0_i32_0 = arith.constant 0 : i32
    %c0_i32_1 = arith.constant 0 : i32
    return %c0_i32, %c0_i32_0 : i32, i32
  }
  func.func @transform_17(%arg0: i32) -> (i32, i32) {
    %c0_i32 = arith.constant 0 : i32
    %c0_i32_0 = arith.constant 0 : i32
    %c0_i32_1 = arith.constant 0 : i32
    return %c0_i32, %c0_i32_0 : i32, i32
  }
  func.func @transform_18(%arg0: i32) -> (i32, i32, i32) {
    %c0_i32 = arith.constant 0 : i32
    %c0_i32_0 = arith.constant 0 : i32
    %c0_i32_1 = arith.constant 0 : i32
    return %arg0, %c0_i32, %c0_i32_0 : i32, i32, i32
  }
}

</mosaic_0001>

<bundles_post_ra>
// kernel: isab_forward.1
= control target key start
LH: loop header
LB: loop body
LE: loop exit
PB: predicated region body
PF: predicated region fallthrough
CT: control target
= control target key end

     0   :  { %s20926_s0 = inlined_call_operand.hbm [shape: f32[2,16,64], index: 0, kind: input, shape index: {}]   ;;  %s20927_s1 = inlined_call_operand.hbm [shape: f32[1,8,128], index: 1, kind: input, shape index: {}]   ;;  %s20928_s2 = inlined_call_operand.hbm [shape: f32[128,128], index: 2, kind: input, shape index: {}]   ;;  %s20929_s3 = inlined_call_operand.vmem [shape: f32[1,128], index: 3, kind: input, shape index: {}]   ;;  %s20930_s4 = inlined_call_operand.hbm [shape: f32[64,128], index: 4, kind: input, shape index: {}]   ;;  %s20931_s5 = inlined_call_operand.vmem [shape: f32[1,128], index: 5, kind: input, shape index: {}]   ;;  %s20932_s6 = inlined_call_operand.hbm [shape: f32[64,128], index: 6, kind: input, shape index: {}]   ;;  %s20933_s7 = inlined_call_operand.vmem [shape: f32[1,128], index: 7, kind: input, shape index: {}]   ;;  %s20934_s8 = inlined_call_operand.hbm [shape: f32[128,128], index: 8, kind: input, shape index: {}]   ;;  %s20935_s9 = inlined_call_operand.vmem [shape: f32[1,128], index: 9, kind: input, shape index: {}]   ;;  %s20936_s10 = inlined_call_operand.hbm [shape: f32[64,128], index: 10, kind: input, shape index: {}]   ;;  %s20937_s11 = inlined_call_operand.vmem [shape: f32[1,128], index: 11, kind: input, shape index: {}]   ;;  %s20938_s12 = inlined_call_operand.hbm [shape: f32[128,128], index: 12, kind: input, shape index: {}]   ;;  %s20939_s13 = inlined_call_operand.vmem [shape: f32[1,128], index: 13, kind: input, shape index: {}]   ;;  %s20940_s14 = inlined_call_operand.hbm [shape: f32[128,128], index: 14, kind: input, shape index: {}]   ;;  %s20941_s15 = inlined_call_operand.vmem [shape: f32[1,128], index: 15, kind: input, shape index: {}]   ;;  %s20942_s16 = inlined_call_operand.hbm [shape: f32[128,128], index: 16, kind: input, shape index: {}]   ;;  %s20943_s17 = inlined_call_operand.vmem [shape: f32[1,128], index: 17, kind: input, shape index: {}]   ;;  %s20944_s18 = inlined_call_operand.hbm [shape: f32[2,16,128], index: 18, kind: output, shape index: {}]  }
   0x1   :  { %20968 = sst [smem:[#allocation30_spill]] %s20926_s0 }
   0x2   :  { %20969 = sst [smem:[#allocation31_spill]] %s20927_s1 }
   0x3   :  { %20970 = sst [smem:[#allocation32_spill]] %s20928_s2 }
   0x4   :  { %20971 = sst [smem:[#allocation33_spill]] %s20930_s4 }
   0x5   :  { %20972 = sst [smem:[#allocation34_spill]] %s20932_s6 }
   0x6   :  { %20973 = sst [smem:[#allocation35_spill]] %s20934_s8 }
   0x7   :  { %20974 = sst [smem:[#allocation36_spill]] %s20936_s10 }
   0x8   :  { %20975 = sst [smem:[#allocation37_spill]] %s20938_s12 }
   0x9   :  { %20976 = sst [smem:[#allocation38_spill]] %s20940_s14 }
   0xa   :  { %20977 = sst [smem:[#allocation39_spill]] %s20942_s16 }
   0xb   :  { %20978 = sst [smem:[#allocation40_spill]] %s20943_s17 }
   0xc   :  { %20979 = sst [smem:[#allocation41_spill]] %s20944_s18 }
   0xd   :  { %23 = vsyncpa [#allocation5], 0 }
   0xe   :  { %25 = vsyncpa [#allocation5 + $0x1], 0 }
   0xf   :  { %26 = vsyncpa [#allocation8], 0 }
  0x10   :  { %27 = vsyncpa [#allocation11], 0 }
  0x11   :  { %28 = vsyncpa [#allocation14], 0 }
  0x12   :  { %29 = vsyncpa [#allocation17], 0 }
  0x13   :  { %30 = vsyncpa [#allocation20], 0 }
  0x14   :  { %31 = vsyncpa [#allocation6], 0 }
  0x15   :  { %33 = vsyncpa [#allocation6 + $0x1], 0  ;;  %s17666_s27 = smov 0   ;;  %s17668_s28 = smov 0  }
  0x16   :  { %s17670_s29 = smov 0   ;;  %s17672_s30 = smov 0  }
  0x17 LB: > { %s17551_s0 = smov [#allocation7]   ;;  %s17687_s1 = sadd.s32 4294967295, %s17549_s30   ;;  %s17549_s30 = sphi %s17672_s30, %s21036_s30   ;;  %s17545_s29 = sphi %s17670_s29, %s21035_s29   ;;  %s17541_s28 = sphi %s17668_s28, %s21034_s28   ;;  %s17537_s27 = sphi %s17666_s27, %s21033_s27  }
  0x18   : > { %s466_s19 = sshll.u32 %s17551_s0, 4  ;;  %p14016_p0 = scmp.ge.s32.totalorder %s17549_s30, 1  ;;  %s467_s19 = int_to_ptr.vmem [resolvable:$true] %s466_s19 }
  0x19   : > { %p20949_p1 = scmp.eq.s32.totalorder %s17687_s1, 0  ;;  %p453_p2 = scmp.lt.s32.totalorder %s17549_s30, 3 }
  0x1a   : > { %s17552_s21 = smov [#allocation10]   ;;  %s17553_s23 = smov [#allocation13]  }
  0x1b   : > { %p17692_p3 = pnand %p14016_p0, %p453_p2  ;;  %s492_s22 = sshll.u32 %s17552_s21, 4  ;;  %s17705_s22 = int_to_ptr.vmem [resolvable:$true] %s492_s22 }
  0x1c   : > { %s524_s24 = sshll.u32 %s17553_s23, 4  ;;  %s17214_s26 = scalar_lea.vmem %s467_s19, 128  ;;  %s17707_s24 = int_to_ptr.vmem [resolvable:$true] %s524_s24 }
  0x1d   : > { %s20980_s20 = scalar_select %p17692_p3, 1, 0 }
  0x1e   : > { %p17049_p5 = pneg %p17692_p3  ;;  %p17215_p8 = scmp.ne.s32.totalorder %s467_s19, %s17214_s26 }
  0x1f   : > { %p17222_p11 = scmp.lt.s32.totalorder %s467_s19, %s467_s19  ;;  %p17223_p12 = scmp.lt.s32.totalorder %s17214_s26, %s17214_s26 }
  0x20   : > { %p17701_p6 = pnand %p17049_p5, %p20949_p1 }
  0x21   : > { %p17224_p13 = por %p17223_p12, %p17222_p11 }
  0x22   : > { %p17711_p7 = pneg %p17701_p6 }
  0x24   : > { %p17217_p9 = pnand %p17215_p8, %p17711_p7 }
  0x26   : > { %p17218_p10 = pneg %p17217_p9 }
  0x28   : > { %p17225_p0 = pnand %p17224_p13, %p17218_p10 }
  0x2a   : > { %17228 = shalt.err (!%p17225_p0)
}
  0x2b   : > { %s20983_s23 = sld [smem:[#allocation31_spill]]  ;;  %s17240_s18 = scalar_lea.vmem %s17705_s22, 1024 }
  0x2c   : > { %p17241_p2 = scmp.ne.s32.totalorder %s17705_s22, %s17240_s18  ;;  %p17248_p9 = scmp.lt.s32.totalorder %s17705_s22, %s17705_s22 }
  0x2d   : > { %p17249_p11 = scmp.lt.s32.totalorder %s17240_s18, %s17240_s18 }
  0x2e   : > { %p17243_p5 = pnand %p17241_p2, %p17711_p7 }
  0x2f   : > { %p17250_p10 = por %p17249_p11, %p17248_p9 }
  0x30   : > { %p17244_p8 = pneg %p17243_p5 }
  0x31   : > { %17052 = dma.hbm_to_vmem [thread:$0]  (!%p17701_p6), %s20983_s23, 128, %s467_s19, [#allocation8]  }
  0x32   : > { %p17251_p12 = pnand %p17250_p10, %p17244_p8 }
  0x34   : > { %17254 = shalt.err (!%p17251_p12)
}
  0x35   : > { %s20947_s26 = smov 128   ;;  %s20948_s0 = smov 8  }
  0x36   : > { %s20984_s4 = sld [smem:[#allocation33_spill]]  ;;  %s17266_s18 = scalar_lea.vmem %s17707_s24, 2048 }
  0x37   : > { %p17267_p13 = scmp.ne.s32.totalorder %s17707_s24, %s17266_s18  ;;  %p17274_p5 = scmp.lt.s32.totalorder %s17707_s24, %s17707_s24 }
  0x38   : > { %p17275_p8 = scmp.lt.s32.totalorder %s17266_s18, %s17266_s18 }
  0x39   : > { %p17269_p0 = pnand %p17267_p13, %p17711_p7 }
  0x3a   : > { %p17276_p9 = por %p17275_p8, %p17274_p5 }
  0x3b   : > { %p17270_p2 = pneg %p17269_p0 }
  0x3c   : > { %17058 = dma.hbm_to_vmem [thread:$0]  (!%p17701_p6), %s20984_s4, 1024, %s17705_s22, [#allocation11], %s20947_s26, %s20947_s26, %s20948_s0  }
  0x3d   : > { %p17277_p11 = pnand %p17276_p9, %p17270_p2 }
  0x3f   : > { %17280 = shalt.err (!%p17277_p11)
}
  0x40   : > { %s20985_s8 = sld [smem:[#allocation35_spill]]  ;;  %s17556_s22 = smov [#allocation16]  }
  0x41   : > { %s556_s21 = sshll.u32 %s17556_s22, 4  ;;  %s17557_s4 = smov [#allocation9]   ;;  %s557_s21 = int_to_ptr.vmem [resolvable:$true] %s556_s21 }
  0x42   : > { %s476_s17 = sshll.u32 %s17557_s4, 4  ;;  %s17292_s18 = scalar_lea.vmem %s557_s21, 2048  ;;  %s477_s17 = int_to_ptr.vmem [resolvable:$true] %s476_s17 }
  0x43   : > { %p17293_p10 = scmp.ne.s32.totalorder %s557_s21, %s17292_s18  ;;  %p17300_p0 = scmp.lt.s32.totalorder %s557_s21, %s557_s21 }
  0x44   : > { %p17301_p2 = scmp.lt.s32.totalorder %s17292_s18, %s17292_s18 }
  0x45   : > { %p17295_p12 = pnand %p17293_p10, %p17711_p7 }
  0x46   : > { %17064 = dma.hbm_to_vmem [thread:$0]  (!%p17701_p6), %s20985_s8, 2048, %s17707_s24, [#allocation14], %s20947_s26, %s20947_s26, %s20948_s0  }
  0x47   : > { %p17296_p13 = pneg %p17295_p12  ;;  %p17302_p5 = por %p17301_p2, %p17300_p0 }
  0x49   : > { %p17303_p8 = pnand %p17302_p5, %p17296_p13 }
  0x4b   : > { %17306 = shalt.err (!%p17303_p8)
}
  0x4c   : > { %s20986_s12 = sld [smem:[#allocation37_spill]]  ;;  %s17318_s4 = scalar_lea.vmem %s477_s17, 2048 }
  0x4d   : > { %p17319_p9 = scmp.ne.s32.totalorder %s477_s17, %s17318_s4  ;;  %p17326_p12 = scmp.lt.s32.totalorder %s477_s17, %s477_s17 }
  0x4e   : > { %p17327_p0 = scmp.lt.s32.totalorder %s17318_s4, %s17318_s4 }
  0x4f   : > { %p17321_p11 = pnand %p17319_p9, %p17711_p7 }
  0x50   : > { %p17328_p13 = por %p17327_p0, %p17326_p12 }
  0x51   : > { %p17322_p10 = pneg %p17321_p11 }
  0x52   : > { %17070 = dma.hbm_to_vmem [thread:$0]  (!%p17701_p6), %s20986_s12, 2048, %s557_s21, [#allocation17], %s20947_s26, %s20947_s26, %s20948_s0  }
  0x53   : > { %p17329_p2 = pnand %p17328_p13, %p17322_p10 }
  0x55   : > { %17332 = shalt.err (!%p17329_p2)
}
  0x56   : > { %s20987_s18 = sld [smem:[#allocation32_spill]]  ;;  %s17558_s21 = smov [#allocation12]  }
  0x57   : > { %s508_s24 = sshll.u32 %s17558_s21, 4  ;;  %s17559_s23 = smov [#allocation15]   ;;  %s509_s24 = int_to_ptr.vmem [resolvable:$true] %s508_s24 }
  0x58   : > { %s540_s8 = sshll.u32 %s17559_s23, 4  ;;  %s17344_s12 = scalar_lea.vmem %s509_s24, 1024  ;;  %s541_s8 = int_to_ptr.vmem [resolvable:$true] %s540_s8 }
  0x59   : > { %p17345_p5 = scmp.ne.s32.totalorder %s509_s24, %s17344_s12  ;;  %p17352_p11 = scmp.lt.s32.totalorder %s509_s24, %s509_s24 }
  0x5a   : > { %p17353_p10 = scmp.lt.s32.totalorder %s17344_s12, %s17344_s12 }
  0x5b   : > { %p17347_p8 = pnand %p17345_p5, %p17711_p7 }
  0x5c   : > { %17055 = dma.hbm_to_vmem [thread:$0]  (!%p17701_p6), %s20987_s18, 2048, %s477_s17, [#allocation8], %s20947_s26, %s20947_s26, %s20948_s0  }
  0x5d   : > { %p17348_p9 = pneg %p17347_p8  ;;  %p17354_p12 = por %p17353_p10, %p17352_p11 }
  0x5f   : > { %p17355_p0 = pnand %p17354_p12, %p17348_p9 }
  0x61   : > { %17358 = shalt.err (!%p17355_p0)
}
  0x62   : > { %s20988_s6 = sld [smem:[#allocation34_spill]]  ;;  %s17370_s19 = scalar_lea.vmem %s541_s8, 1024 }
  0x63   : > { %p17371_p13 = scmp.ne.s32.totalorder %s541_s8, %s17370_s19  ;;  %p17378_p8 = scmp.lt.s32.totalorder %s541_s8, %s541_s8 }
  0x64   : > { %p17379_p11 = scmp.lt.s32.totalorder %s17370_s19, %s17370_s19 }
  0x65   : > { %p17373_p2 = pnand %p17371_p13, %p17711_p7 }
  0x66   : > { %p17380_p9 = por %p17379_p11, %p17378_p8 }
  0x67   : > { %p17374_p5 = pneg %p17373_p2 }
  0x68   : > { %17061 = dma.hbm_to_vmem [thread:$0]  (!%p17701_p6), %s20988_s6, 1024, %s509_s24, [#allocation11], %s20947_s26, %s20947_s26, %s20948_s0  }
  0x69   : > { %p17381_p10 = pnand %p17380_p9, %p17374_p5 }
  0x6b   : > { %17384 = shalt.err (!%p17381_p10)
}
  0x6c   : > { %s20989_s10 = sld [smem:[#allocation36_spill]]  ;;  %s17560_s18 = smov [#allocation18]  }
  0x6d   : > { %s572_s21 = sshll.u32 %s17560_s18, 4  ;;  %s17561_s24 = smov [#allocation19]   ;;  %s573_s21 = int_to_ptr.vmem [resolvable:$true] %s572_s21 }
  0x6e   : > { %s588_s23 = sshll.u32 %s17561_s24, 4  ;;  %s17396_s17 = scalar_lea.vmem %s573_s21, 2048  ;;  %s589_s23 = int_to_ptr.vmem [resolvable:$true] %s588_s23 }
  0x6f   : > { %p17397_p12 = scmp.ne.s32.totalorder %s573_s21, %s17396_s17  ;;  %p17404_p2 = scmp.lt.s32.totalorder %s573_s21, %s573_s21 }
  0x70   : > { %p17405_p5 = scmp.lt.s32.totalorder %s17396_s17, %s17396_s17 }
  0x71   : > { %p17399_p0 = pnand %p17397_p12, %p17711_p7 }
  0x72   : > { %17067 = dma.hbm_to_vmem [thread:$0]  (!%p17701_p6), %s20989_s10, 1024, %s541_s8, [#allocation14], %s20947_s26, %s20947_s26, %s20948_s0  }
  0x73   : > { %p17400_p13 = pneg %p17399_p0  ;;  %p17406_p8 = por %p17405_p5, %p17404_p2 }
  0x75   : > { %p17407_p11 = pnand %p17406_p8, %p17400_p13 }
  0x77   : > { %17410 = shalt.err (!%p17407_p11)
}
  0x78   : > { %s20990_s14 = sld [smem:[#allocation38_spill]]  ;;  %s17422_s19 = scalar_lea.vmem %s589_s23, 2048 }
  0x79   : > { %p17423_p9 = scmp.ne.s32.totalorder %s589_s23, %s17422_s19  ;;  %p17430_p0 = scmp.lt.s32.totalorder %s589_s23, %s589_s23 }
  0x7a   : > { %p17431_p2 = scmp.lt.s32.totalorder %s17422_s19, %s17422_s19 }
  0x7b   : > { %p17425_p10 = pnand %p17423_p9, %p17711_p7 }
  0x7c   : > { %p17432_p13 = por %p17431_p2, %p17430_p0 }
  0x7d   : > { %p17426_p12 = pneg %p17425_p10 }
  0x7e   : > { %17073 = dma.hbm_to_vmem [thread:$0]  (!%p17701_p6), %s20990_s14, 2048, %s573_s21, [#allocation17], %s20947_s26, %s20947_s26, %s20948_s0  }
  0x7f   : > { %p17433_p5 = pnand %p17432_p13, %p17426_p12 }
  0x81   : > { %17436 = shalt.err (!%p17433_p5)
}
  0x82   : > { %s20991_s16 = sld [smem:[#allocation39_spill]]  ;;  %s14015_s2 = sadd.s32 4294967294, %s17549_s30  }
  0x83   : > { %s17814_s25 = sadd.s32 1, %s17549_s30   ;;  %s46_s18 = sadd.s32 1, %s17545_s29 }
  0x84   : > { %s43_s21 = ssub.s32 %s17549_s30, %s17814_s25  ;;  %p53_p7 = scmp.ne.s32.totalorder %s17545_s29, %s17541_s28 }
  0x85   : > { %p44_p8 = scmp.eq.s32.totalorder %s43_s21, 0  ;;  %p54_p11 = scmp.eq.s32.totalorder %s17549_s30, 0 }
  0x86   : > { %p59_p9 = scmp.ne.s32.totalorder %s17541_s28, %s17537_s27  ;;  %p440_p10 = scmp.eq.s32.totalorder %s17687_s1, 1 }
  0x87   : > { %s17826_s24 = scalar_select %p44_p8, %s17545_s29, %s46_s18  }
  0x88   : > { %17076 = dma.hbm_to_vmem [thread:$0]  (!%p17701_p6), %s20991_s16, 2048, %s589_s23, [#allocation20], %s20947_s26, %s20947_s26, %s20948_s0  }
  0x89   : > { %20992 = sst [smem:[#allocation29_spill]] %s17826_s24  ;;  %p55_p12 = por %p54_p11, %p53_p7 }
  0x8a   : > { %p17830_p0 = por %p20949_p1, %p59_p9  ;;  %p17834_p6 = por %p440_p10, %p53_p7 }
  0x8b   : > { %p446_p2 = scmp.eq.s32.totalorder %s14015_s2, 1  ;;  %p17094_p13 = scmp.lt.s32.totalorder %s17549_s30, 2 }
  0x8c   : > { %s20993_s17 = scalar_select %p17830_p0, 1, 0 }
  0x8d   : > { %s20994_s23 = scalar_select %p17834_p6, 1, 0 }
  0x8e   : > { %s605_s8 = sand.u32 1, %s17545_s29   ;;  %p17840_p5 = por %p446_p2, %p59_p9 }
  0x8f   : > { %s14027_s19 = sshll.u32 %s605_s8, 4  ;;  %s14055_s12 = sshll.u32 %s17549_s30, 8 }
  0x90   : > { %s20995_s4 = scalar_select %p17840_p5, 1, 0 }
  0x91   : > { %s20996_s21 = sld [smem:[#allocation30_spill]]  ;;  %s609_s0 = scalar_lea.vmem [#allocation4], %s14027_s19 }
  0x92   : > { %s616_s6 = sshll.u32 %s609_s0, 4  ;;  %p17850_p7 = pnand %p17094_p13, %p55_p12  ;;  %s17854_s6 = int_to_ptr.vmem [resolvable:$true] %s616_s6 }
  0x93   : > { %s17856_s10 = scalar_lea.sflag [#allocation5], %s605_s8 }
  0x94   : > { %p17439_p11 = pneg %p17850_p7 }
  0x97   : > { %s17848_s26 = scalar_lea.hbm %s20996_s21, %s14055_s12  ;;  %s17442_s19 = scalar_lea.hbm %s20996_s21, 512 }
  0x98   : > { %s17437_s14 = scalar_lea.hbm %s17848_s26, 256  ;;  %p17443_p12 = scmp.lt.s32.totalorder %s17848_s26, %s20996_s21 }
  0x99   : > { %p17438_p8 = scmp.ne.s32.totalorder %s17848_s26, %s17437_s14  ;;  %p17444_p2 = scmp.lt.s32.totalorder %s17442_s19, %s17437_s14 }
  0x9b   : > { %p17440_p9 = pnand %p17439_p11, %p17438_p8  ;;  %p17445_p13 = por %p17444_p2, %p17443_p12 }
  0x9d   : > { %p17441_p10 = pneg %p17440_p9 }
  0x9f   : > { %p17446_p4 = pnand %p17445_p13, %p17441_p10 }
  0xa1   : > { %17449 = shalt.err (!%p17446_p4)
}
  0xa2   : > { %s17450_s8 = scalar_lea.vmem %s17854_s6, 256  ;;  %s17562_s16 = smov [#allocation4]  }
  0xa3   : > { %p17451_p1 = scmp.ne.s32.totalorder %s17854_s6, %s17450_s8  ;;  %s17455_s24 = sshll.u32 %s17562_s16, 4  ;;  %s17456_s24 = int_to_ptr.vmem [resolvable:$false] %s17455_s24 }
  0xa4   : > { %s17457_s12 = scalar_lea.vmem %s17456_s24, 512  ;;  %p17458_p9 = scmp.lt.s32.totalorder %s17854_s6, %s17456_s24 }
  0xa5   : > { %p17453_p5 = pnand %p17451_p1, %p17439_p11  ;;  %p17459_p6 = scmp.lt.s32.totalorder %s17457_s12, %s17450_s8 }
  0xa7   : > { %p17454_p8 = pneg %p17453_p5  ;;  %p17460_p0 = por %p17459_p6, %p17458_p9 }
  0xa9   : > { %p17461_p3 = pnand %p17460_p0, %p17454_p8 }
  0xab   : > { %17464 = shalt.err (!%p17461_p3)
}
  0xac   : > { %s20998_s14 = smov 8   ;;  %s20999_s22 = smov 128  }
  0xad   : > { %17080 = dma.hbm_to_vmem [thread:$0]  (!%p17850_p7), %s17848_s26, 256, %s17854_s6, %s17856_s10, %s20999_s22, %s20999_s22, %s20998_s14  }
  0xae   : > { %p21000_p1 = scmp.ne.s32.totalorder %s20980_s20, 0 }
  0xaf   : > { %s17883_s16 = sand.u32 (!%p21000_p1), 1, %s17541_s28   ;;  %p21001_p3 = scmp.ne.s32.totalorder (!%p21000_p1), %s20993_s17, 0 }
  0xb0   : > { %628 = sbr.rel (%p21000_p1) target bundleno = 6476 (0x194c), region = 92  ;;  %s14031_s24 = sshll.u32 (!%p21000_p1), %s17883_s16, 4 }
  0xb1   : > { %s631_s19 = scalar_lea.sflag (!%p21000_p1), [#allocation5], %s17883_s16  ;;  %s17889_s2 = scalar_lea.vmem (!%p21000_p1), [#allocation4], %s14031_s24 }
  0xb5   : > { %17508 = dma.done.wait (%p21001_p3), %s631_s19, 256  }
  0xb6   : > { %17510 = vsyncadd (%p21001_p3), %s631_s19, 4294967040  ;;  %p21002_p4 = scmp.eq.s32.totalorder %s17687_s1, 0 }
  0xb8   : > { %17512 = dma.done.wait (%p21002_p4), [#allocation8], 2176   ;;  %p21003_p0 = pmov %p21002_p4 }
  0xba   : > { %17514 = vsyncadd (%p21003_p0), [#allocation8], 4294965120  ;;  %p21004_p6 = pmov %p21003_p0 }
  0xbb   : > { %p21005_p5 = pmov %p21003_p0 }
  0xbc   : > { %17516 = dma.done.wait (%p21004_p6), [#allocation11], 2048  }
  0xbd   : > { %17518 = vsyncadd (%p21005_p5), [#allocation11], 4294965248  ;;  %p21006_p7 = pmov %p21003_p0 }
  0xbe   : > { %p21007_p11 = pmov %p21003_p0 }
  0xbf   : > { %17520 = dma.done.wait (%p21006_p7), [#allocation14], 3072  }
  0xc0   : > { %17522 = vsyncadd (%p21007_p11), [#allocation14], 4294964224  ;;  %p21008_p10 = pmov %p21003_p0 }
  0xc1   : > { %p21009_p12 = pmov %p21003_p0 }
  0xc2   : > { %17524 = dma.done.wait (%p21008_p10), [#allocation17], 4096  }
  0xc3   : > { %17526 = vsyncadd (%p21009_p12), [#allocation17], 4294963200  ;;  %p21010_p2 = pmov %p21003_p0 }
  0xc4   : > { %p21011_p13 = pmov %p21003_p0 }
  0xc5   : > { %17528 = dma.done.wait (%p21010_p2), [#allocation20], 2048  }
  0xc6   : > { %17530 = vsyncadd (%p21011_p13), [#allocation20], 4294965248  ;;  %v17563_v0 = vmov 0.0   ;;  %vm17564_vm0 = vmmov 0   ;;  %v741_v1 = vld [vmem:[#allocation9 + $0x78] sm:$0xff]  ;;  %v740_v2 = vld [vmem:[#allocation9 + $0x70] sm:$0xff] }
  0xc7   : > { %15041 = vmatprep.subr.mxu0 %v17563_v0  ;;  %15076 = vmatprep.subr.mxu1 %v17563_v0  ;;  %v739_v3 = vld [vmem:[#allocation9 + $0x68] sm:$0xff]  ;;  %v17921_v4 = vand.u32 4294901760, %v741_v1  ;;  %v17923_v5 = vand.u32 4294901760, %v740_v2  ;;  %v738_v7 = vld [vmem:[#allocation9 + $0x60] sm:$0xff]  ;;  %v737_v8 = vld [vmem:[#allocation9 + $0x58] sm:$0xff]  ;;  %vm1405_vm1 = vcmask 523264  }
  0xc8   : > { %15073 = vmatprep.mubr.msk.f32.mxu0 %vm17564_vm0, %v17563_v0  ;;  %15108 = vmatprep.mubr.msk.f32.mxu1 %vm17564_vm0, %v17563_v0  ;;  %v17925_v6 = vand.u32 4294901760, %v739_v3  ;;  %v736_v9 = vld [vmem:[#allocation9 + $0x50] sm:$0xff]  ;;  %v17927_v10 = vand.u32 4294901760, %v738_v7  ;;  %v17929_v11 = vand.u32 4294901760, %v737_v8  ;;  %v735_v13 = vld [vmem:[#allocation9 + $0x48] sm:$0xff]  ;;  %v734_v14 = vld [vmem:[#allocation9 + $0x40] sm:$0xff] }
  0xc9   : > { %v17931_v12 = vand.u32 4294901760, %v736_v9  ;;  %15042 = vmatpush3.msra.mxu0 %v17921_v4  ;;  %v17935_v15 = vsub.f32 %v741_v1, %v17921_v4  ;;  %v17938_v16 = vsub.f32 %v740_v2, %v17923_v5  ;;  %v17940_v17 = vand.u32 4294901760, %v735_v13  ;;  %v733_v19 = vld [vmem:[#allocation9 + $0x38] sm:$0xff]  ;;  %v732_v26 = vld [vmem:[#allocation9 + $0x30] sm:$0xff]  ;;  %v731_v36 = vld [vmem:[#allocation9 + $0x28] sm:$0xff]  ;;  %s17565_s17 = smov 96  }
  0xca   : > { %v17943_v18 = vsub.f32 %v739_v3, %v17925_v6  ;;  %15043 = vmatprep.subr.mxu0 %v17563_v0  ;;  %v17947_v20 = vsub.f32 %v738_v7, %v17927_v10  ;;  %v17950_v21 = vsub.f32 %v737_v8, %v17929_v11  ;;  %v17956_v25 = vand.u32 4294901760, %v734_v14  ;;  %v730_v41 = vld [vmem:[#allocation9 + $0x20] sm:$0xff]  ;;  %v729_v49 = vld [vmem:[#allocation9 + $0x18] sm:$0xff]  ;;  %v728_v54 = vld [vmem:[#allocation9 + $0x10] sm:$0xff]  ;;  %s17566_s8 = smov 64   ;;  %s17567_s12 = smov 32  }
  0xcb   : > { %15044 = vmatpush3.msra.mxu0 %v17923_v5  ;;  %v843_v22 = vand.u32 4294901760, %v17935_v15  ;;  %v850_v23 = vand.u32 4294901760, %v17938_v16  ;;  %v17960_v28 = vand.u32 4294901760, %v733_v19  ;;  %v17964_v30 = vsub.f32 %v736_v9, %v17931_v12  ;;  %v725_v50 = vld [vmem:[#allocation7] sm:$0xff]  ;;  %v727_v60 = vld [vmem:[#allocation9 + $0x8] sm:$0xff]  ;;  %v726_v7 = vld [vmem:[#allocation9] sm:$0xff] }
  0xcc   : > { %v857_v24 = vand.u32 4294901760, %v17943_v18  ;;  %15045 = vmatprep.subr.mxu0 %v17563_v0  ;;  %v864_v27 = vand.u32 4294901760, %v17947_v20  ;;  %v871_v29 = vand.u32 4294901760, %v17950_v21  ;;  %v17977_v34 = vsub.f32 %v735_v13, %v17940_v17  ;;  %s21027_s18 = sld [smem:[#allocation40_spill]]  ;;  %s14056_s14 = sshll.u32 %s17687_s1, 8 }
  0xcd   : > { %15046 = vmatpush3.msra.mxu0 %v17925_v6  ;;  %v844_v31 = vsub.f32 %v17935_v15, %v843_v22  ;;  %v851_v32 = vsub.f32 %v17938_v16, %v850_v23  ;;  %v17980_v35 = vand.u32 4294901760, %v732_v26  ;;  %v878_v40 = vand.u32 4294901760, %v17964_v30  ;;  %p21029_p9 = scmp.ne.s32.totalorder %s20994_s23, 0  ;;  %s17568_s1 = smov [#allocation21]  }
  0xce   : > { %v858_v33 = vsub.f32 %v17943_v18, %v857_v24  ;;  %15047 = vmatprep.subr.mxu0 %v17563_v0  ;;  %v865_v39 = vsub.f32 %v17947_v20, %v864_v27  ;;  %v872_v42 = vsub.f32 %v17950_v21, %v871_v29  ;;  %v17992_v43 = vsub.f32 %v734_v14, %v17956_v25  ;;  %s17469_s20 = sshll.u32 %s17568_s1, 4  ;;  %s17470_s20 = int_to_ptr.vmem [resolvable:$false] %s17469_s20 }
  0xcf   : > { %15048 = vmatpush3.msra.mxu0 %v17927_v10  ;;  %v845_v37 = vand.u32 4294901760, %v844_v31  ;;  %v852_v38 = vand.u32 4294901760, %v851_v32  ;;  %v17995_v45 = vand.u32 4294901760, %v731_v36  ;;  %v885_v46 = vand.u32 4294901760, %v17977_v34  ;;  %s17471_s26 = scalar_lea.vmem %s17470_s20, 512 }
  0xd0   : > { %15049 = vmatprep.subr.mxu0 %v17563_v0  ;;  %v859_v44 = vand.u32 4294901760, %v858_v33  ;;  %v17999_v47 = vsub.f32 %v733_v19, %v17960_v28  ;;  %v18003_v48 = vand.u32 4294901760, %v730_v41  ;;  %v866_v51 = vand.u32 4294901760, %v865_v39 }
  0xd1   : > { %15050 = vmatpush3.msra.mxu0 %v17929_v11  ;;  %15077 = vmatpush3.msra.mxu1 %v845_v37  ;;  %v879_v52 = vsub.f32 %v17964_v30, %v878_v40  ;;  %v892_v53 = vand.u32 4294901760, %v17992_v43  ;;  %v18011_v55 = vsub.f32 %v732_v26, %v17980_v35  ;;  %v873_v56 = vand.u32 4294901760, %v872_v42 }
  0xd2   : > { %15051 = vmatprep.subr.mxu0 %v17563_v0  ;;  %15078 = vmatprep.subr.mxu1 %v17563_v0  ;;  %v899_v57 = vand.u32 4294901760, %v17999_v47  ;;  %v886_v58 = vsub.f32 %v17977_v34, %v885_v46  ;;  %v18020_v59 = vand.u32 4294901760, %v729_v49  ;;  %v18023_v61 = vsub.f32 %v731_v36, %v17995_v45 }
  0xd3   : > { %15052 = vmatpush3.msra.mxu0 %v17931_v12  ;;  %15079 = vmatpush3.msra.mxu1 %v852_v38  ;;  %v18025_v62 = vand.u32 4294901760, %v725_v50  ;;  %v18029_v63 = vand.u32 4294901760, %v728_v54  ;;  %v880_v1 = vand.u32 4294901760, %v879_v52  ;;  %v893_v2 = vsub.f32 %v17992_v43, %v892_v53 }
  0xd4   : > { %15053 = vmatprep.subr.mxu0 %v17563_v0  ;;  %15080 = vmatprep.subr.mxu1 %v17563_v0  ;;  %v906_v3 = vand.u32 4294901760, %v18011_v55  ;;  %v18037_v8 = vsub.f32 %v730_v41, %v18003_v48  ;;  %v900_v9 = vsub.f32 %v17999_v47, %v899_v57  ;;  %v18044_v13 = vand.u32 4294901760, %v727_v60 }
  0xd5   : > { %15054 = vmatpush3.msra.mxu0 %v17940_v17  ;;  %15081 = vmatpush3.msra.mxu1 %v859_v44  ;;  %v887_v14 = vand.u32 4294901760, %v886_v58  ;;  %v913_v19 = vand.u32 4294901760, %v18023_v61  ;;  %v18049_v26 = vsub.f32 %v725_v50, %v18025_v62  ;;  %v18052_v31 = vsub.f32 %v729_v49, %v18020_v59 }
  0xd6   : > { %15055 = vmatprep.subr.mxu0 %v17563_v0  ;;  %15082 = vmatprep.subr.mxu1 %v17563_v0  ;;  %v18056_v32 = vand.u32 4294901760, %v726_v7  ;;  %v894_v33 = vand.u32 4294901760, %v893_v2  ;;  %v907_v36 = vsub.f32 %v18011_v55, %v906_v3  ;;  %v920_v37 = vand.u32 4294901760, %v18037_v8 }
  0xd7   : > { %15056 = vmatpush3.msra.mxu0 %v17956_v25  ;;  %15083 = vmatpush3.msra.mxu1 %v866_v51  ;;  %v18064_v38 = vsub.f32 %v728_v54, %v18029_v63  ;;  %v901_v39 = vand.u32 4294901760, %v900_v9  ;;  %v914_v41 = vsub.f32 %v18023_v61, %v913_v19  ;;  %v832_v42 = vand.u32 4294901760, %v18049_v26 }
  0xd8   : > { %15057 = vmatprep.subr.mxu0 %v17563_v0  ;;  %15084 = vmatprep.subr.mxu1 %v17563_v0  ;;  %v927_v44 = vand.u32 4294901760, %v18052_v31  ;;  %v18075_v49 = vsub.f32 %v727_v60, %v18044_v13  ;;  %v908_v50 = vand.u32 4294901760, %v907_v36  ;;  %v921_v51 = vsub.f32 %v18037_v8, %v920_v37 }
  0xd9   : > { %15058 = vmatpush3.msra.mxu0 %v17960_v28  ;;  %15085 = vmatpush3.msra.mxu1 %v873_v56  ;;  %v934_v52 = vand.u32 4294901760, %v18064_v38  ;;  %v18085_v54 = vsub.f32 %v726_v7, %v18056_v32  ;;  %v915_v56 = vand.u32 4294901760, %v914_v41  ;;  %v833_v58 = vsub.f32 %v18049_v26, %v832_v42 }
  0xda   : > { %15059 = vmatprep.subr.mxu0 %v17563_v0  ;;  %15086 = vmatprep.subr.mxu1 %v17563_v0  ;;  %v928_v60 = vsub.f32 %v18052_v31, %v927_v44  ;;  %v922_v2 = vand.u32 4294901760, %v921_v51  ;;  %vm2587_vm2 = vcmask 261120   ;;  %vm3057_vm3 = vcmask 130048  }
  0xdb   : > { %15060 = vmatpush3.msra.mxu0 %v17980_v35  ;;  %15087 = vmatpush3.msra.mxu1 %v880_v1  ;;  %v941_v1 = vand.u32 4294901760, %v18075_v49  ;;  %v935_v7 = vsub.f32 %v18064_v38, %v934_v52  ;;  %v948_v9 = vand.u32 4294901760, %v18085_v54  ;;  %vm4491_vm4 = vcmask 523520  }
  0xdc   : > { %15061 = vmatprep.subr.mxu0 %v17563_v0  ;;  %15088 = vmatprep.subr.mxu1 %v17563_v0  ;;  %vm5449_vm5 = vcmask 785920   ;;  %vm6407_vm6 = vcmask 1048320   ;;  %vm9499_vm7 = vcmask 64512  }
  0xdd   : > { %15062 = vmatpush3.msra.mxu0 %v17995_v45  ;;  %15089 = vmatpush3.msra.mxu1 %v887_v14  ;;  %v834_v14 = vand.u32 4294901760, %v833_v58  ;;  %v942_v36 = vsub.f32 %v18075_v49, %v941_v1  ;;  %v949_v41 = vsub.f32 %v18085_v54, %v948_v9 }
  0xde   : > { %15063 = vmatprep.subr.mxu0 %v17563_v0  ;;  %15090 = vmatprep.subr.mxu1 %v17563_v0 }
  0xdf   : > { %15064 = vmatpush3.msra.mxu0 %v18003_v48  ;;  %15091 = vmatpush3.msra.mxu1 %v894_v33  ;;  %v929_v33 = vand.u32 4294901760, %v928_v60  ;;  %v950_v51 = vand.u32 4294901760, %v949_v41 }
  0xe0   : > { %15065 = vmatprep.subr.mxu0 %v17563_v0  ;;  %15092 = vmatprep.subr.mxu1 %v17563_v0 }
  0xe1   : > { %15066 = vmatpush3.msra.mxu0 %v18020_v59  ;;  %15093 = vmatpush3.msra.mxu1 %v901_v39  ;;  %v936_v39 = vand.u32 4294901760, %v935_v7 }
  0xe2   : > { %15067 = vmatprep.subr.mxu0 %v17563_v0  ;;  %15094 = vmatprep.subr.mxu1 %v17563_v0 }
  0xe3   : > { %15068 = vmatpush3.msra.mxu0 %v18029_v63  ;;  %15095 = vmatpush3.msra.mxu1 %v908_v50  ;;  %v943_v50 = vand.u32 4294901760, %v942_v36 }
  0xe4   : > { %15069 = vmatprep.subr.mxu0 %v17563_v0  ;;  %15096 = vmatprep.subr.mxu1 %v17563_v0 }
  0xe5   : > { %15070 = vmatpush3.msra.mxu0 %v18044_v13  ;;  %15097 = vmatpush3.msra.mxu1 %v915_v56 }
  0xe6   : > { %15071 = vmatprep.subr.mxu0 %v17563_v0  ;;  %15098 = vmatprep.subr.mxu1 %v17563_v0 }
  0xe7   : > { %15072 = vmatpush3.msra.mxu0 %v18056_v32  ;;  %15099 = vmatpush3.msra.mxu1 %v922_v2 }
  0xe8   : > { %15100 = vmatprep.subr.mxu1 %v17563_v0  ;;  %15111 = vmatprep.subr.mxu0 %v17563_v0 }
  0xe9   : > { %15074 = vmatmul.mubr.f32.vlgmr.msra.gmra.mxu0 %v834_v14  ;;  %15101 = vmatpush3.msra.mxu1 %v929_v33 }
  0xea   : > { %15112 = vmatpush3.msra.mxu0 %v17935_v15  ;;  %15102 = vmatprep.subr.mxu1 %v17563_v0  ;;  %v1394_v15 = vld [vmem:[#allocation10 + $0x20] sm:$0xff] }
  0xeb   : > { %15113 = vmatprep.subr.mxu0 %v17563_v0  ;;  %15103 = vmatpush3.msra.mxu1 %v936_v39 }
  0xec   : > { %15114 = vmatpush3.msra.mxu0 %v17938_v16  ;;  %15104 = vmatprep.subr.mxu1 %v17563_v0  ;;  %v724_v16 = vld [vmem:[%s17889_s2 + $0x8] sm:$0xff] }
  0xed   : > { %15115 = vmatprep.subr.mxu0 %v17563_v0  ;;  %15105 = vmatpush3.msra.mxu1 %v943_v50 }
  0xee   : > { %15116 = vmatpush3.msra.mxu0 %v17943_v18  ;;  %15106 = vmatprep.subr.mxu1 %v17563_v0 }
  0xef   : > { %15117 = vmatprep.subr.mxu0 %v17563_v0  ;;  %15107 = vmatpush3.msra.mxu1 %v950_v51  ;;  %v1999_v51 = vld [vmem:[#allocation12 + $0x38] sm:$0xff] }
  0xf0   : > { %15118 = vmatpush3.msra.mxu0 %v17947_v20  ;;  %15109 = vmatmul.mubr.f32.vlgmr.msra.gmra.mxu1 %v18025_v62  ;;  %v1393_v20 = vld [vmem:[#allocation10 + $0x18] sm:$0xff] }
  0xf1   : > { %15119 = vmatprep.subr.mxu0 %v17563_v0  ;;  %15146 = vmatprep.subr.mxu1 %v17563_v0 }
  0xf2   : > { %15120 = vmatpush3.msra.mxu0 %v17950_v21  ;;  %15147 = vmatpush3.msra.mxu1 %v17921_v4 }
  0xf3   : > { %15121 = vmatprep.subr.mxu0 %v17563_v0  ;;  %15148 = vmatprep.subr.mxu1 %v17563_v0 }
  0xf4   : > { %15122 = vmatpush3.msra.mxu0 %v17964_v30  ;;  %15149 = vmatpush3.msra.mxu1 %v17923_v5 }
  0xf5   : > { %15123 = vmatprep.subr.mxu0 %v17563_v0  ;;  %15150 = vmatprep.subr.mxu1 %v17563_v0 }
  0xf6   : > { %15124 = vmatpush3.msra.mxu0 %v17977_v34  ;;  %15151 = vmatpush3.msra.mxu1 %v17925_v6 }
  0xf7   : > { %15125 = vmatprep.subr.mxu0 %v17563_v0  ;;  %15152 = vmatprep.subr.mxu1 %v17563_v0 }
  0xf8   : > { %15126 = vmatpush3.msra.mxu0 %v17992_v43  ;;  %15153 = vmatpush3.msra.mxu1 %v17927_v10 }
  0xf9   : > { %15127 = vmatprep.subr.mxu0 %v17563_v0  ;;  %15154 = vmatprep.subr.mxu1 %v17563_v0 }
  0xfa   : > { %15128 = vmatpush3.msra.mxu0 %v17999_v47  ;;  %15155 = vmatpush3.msra.mxu1 %v17929_v11 }
  0xfb   : > { %15129 = vmatprep.subr.mxu0 %v17563_v0  ;;  %15156 = vmatprep.subr.mxu1 %v17563_v0 }
  0xfc   : > { %15130 = vmatpush3.msra.mxu0 %v18011_v55  ;;  %15157 = vmatpush3.msra.mxu1 %v17931_v12 }
  0xfd   : > { %15131 = vmatprep.subr.mxu0 %v17563_v0  ;;  %15158 = vmatprep.subr.mxu1 %v17563_v0 }
  0xfe   : > { %15132 = vmatpush3.msra.mxu0 %v18023_v61  ;;  %15159 = vmatpush3.msra.mxu1 %v17940_v17 }
  0xff   : > { %15133 = vmatprep.subr.mxu0 %v17563_v0  ;;  %15160 = vmatprep.subr.mxu1 %v17563_v0 }
 0x100   : > { %15134 = vmatpush3.msra.mxu0 %v18037_v8  ;;  %15161 = vmatpush3.msra.mxu1 %v17956_v25 }
 0x101   : > { %15135 = vmatprep.subr.mxu0 %v17563_v0  ;;  %15162 = vmatprep.subr.mxu1 %v17563_v0 }
 0x102   : > { %15136 = vmatpush3.msra.mxu0 %v18052_v31  ;;  %15163 = vmatpush3.msra.mxu1 %v17960_v28 }
 0x103   : > { %15137 = vmatprep.subr.mxu0 %v17563_v0  ;;  %15164 = vmatprep.subr.mxu1 %v17563_v0 }
 0x104   : > { %15138 = vmatpush3.msra.mxu0 %v18064_v38  ;;  %15165 = vmatpush3.msra.mxu1 %v17980_v35 }
 0x105   : > { %15139 = vmatprep.subr.mxu0 %v17563_v0  ;;  %15166 = vmatprep.subr.mxu1 %v17563_v0 }
 0x106   : > { %15140 = vmatpush3.msra.mxu0 %v18075_v49  ;;  %15167 = vmatpush3.msra.mxu1 %v17995_v45 }
 0x107   : > { %15141 = vmatprep.subr.mxu0 %v17563_v0  ;;  %15168 = vmatprep.subr.mxu1 %v17563_v0 }
 0x108   : > { %15142 = vmatpush3.msra.mxu0 %v18085_v54  ;;  %15143 = vmatprep.mubr.msk.f32.mxu0 %vm17564_vm0, %v17563_v0 }
 0x109   : > { %15169 = vmatpush3.msra.mxu1 %v18003_v48  ;;  %15144 = vmatmul.mubr.f32.vlgmr.msra.gmra.mxu0 %v18049_v26 }
 0x10a   : > { %15170 = vmatprep.subr.mxu1 %v17563_v0  ;;  %15181 = vmatprep.subr.mxu0 %v17563_v0 }
 0x10b   : > { %15171 = vmatpush3.msra.mxu1 %v18020_v59  ;;  %15182 = vmatpush3.msra.mxu0 %v843_v22  ;;  %v18268_v22 = vand.u32 4294901760, %v1394_v15 }
 0x10c   : > { %15172 = vmatprep.subr.mxu1 %v17563_v0  ;;  %15183 = vmatprep.subr.mxu0 %v17563_v0 }
 0x10d   : > { %15173 = vmatpush3.msra.mxu1 %v18029_v63  ;;  %15184 = vmatpush3.msra.mxu0 %v850_v23  ;;  %v18301_v43 = vsub.f32 %v1394_v15, %v18268_v22  ;;  %v1996_v15 = vld [vmem:[#allocation12 + $0x20] sm:$0xff] }
 0x10e   : > { %15174 = vmatprep.subr.mxu1 %v17563_v0  ;;  %15185 = vmatprep.subr.mxu0 %v17563_v0 }
 0x10f   : > { %15175 = vmatpush3.msra.mxu1 %v18044_v13  ;;  %15186 = vmatpush3.msra.mxu0 %v857_v24  ;;  %v1410_v24 = vsel %vm1405_vm1, %v724_v16, 0 }
 0x110   : > { %15176 = vmatprep.subr.mxu1 %v17563_v0  ;;  %15187 = vmatprep.subr.mxu0 %v17563_v0  ;;  %v18293_v34 = vand.u32 4294901760, %v1410_v24 }
 0x111   : > { %15177 = vmatpush3.msra.mxu1 %v18056_v32  ;;  %15178 = vmatprep.mubr.msk.f32.mxu1 %vm17564_vm0, %v17563_v0 }
 0x112   : > { %15188 = vmatpush3.msra.mxu0 %v864_v27  ;;  %15179 = vmatmul.mubr.f32.vlgmr.msra.gmra.mxu1 %v832_v42 }
 0x113   : > { %15189 = vmatprep.subr.mxu0 %v17563_v0  ;;  %15216 = vmatprep.subr.mxu1 %v17563_v0 }
 0x114   : > { %15190 = vmatpush3.msra.mxu0 %v871_v29  ;;  %15217 = vmatpush3.msra.mxu1 %v17921_v4  ;;  %v1397_v4 = vld [vmem:[#allocation10 + $0x38] sm:$0xff] }
 0x115   : > { %15191 = vmatprep.subr.mxu0 %v17563_v0  ;;  %15218 = vmatprep.subr.mxu1 %v17563_v0 }
 0x116   : > { %15192 = vmatpush3.msra.mxu0 %v878_v40  ;;  %15219 = vmatpush3.msra.mxu1 %v17923_v5  ;;  %v1396_v5 = vld [vmem:[#allocation10 + $0x30] sm:$0xff]  ;;  %v1391_v40 = vld [vmem:[#allocation10 + $0x8] sm:$0xff] }
 0x117   : > { %15193 = vmatprep.subr.mxu0 %v17563_v0  ;;  %15220 = vmatprep.subr.mxu1 %v17563_v0 }
 0x118   : > { %15194 = vmatpush3.msra.mxu0 %v885_v46  ;;  %15221 = vmatpush3.msra.mxu1 %v17925_v6  ;;  %v18241_v6 = vand.u32 4294901760, %v1397_v4 }
 0x119   : > { %15195 = vmatprep.subr.mxu0 %v17563_v0  ;;  %15222 = vmatprep.subr.mxu1 %v17563_v0 }
 0x11a   : > { %15196 = vmatpush3.msra.mxu0 %v892_v53  ;;  %15223 = vmatpush3.msra.mxu1 %v17927_v10  ;;  %v1395_v10 = vld [vmem:[#allocation10 + $0x28] sm:$0xff]  ;;  %v18260_v18 = vsub.f32 %v1397_v4, %v18241_v6  ;;  %v1998_v4 = vld [vmem:[#allocation12 + $0x30] sm:$0xff] }
 0x11b   : > { %15197 = vmatprep.subr.mxu0 %v17563_v0  ;;  %15224 = vmatprep.subr.mxu1 %v17563_v0 }
 0x11c   : > { %15198 = vmatpush3.msra.mxu0 %v899_v57  ;;  %15225 = vmatpush3.msra.mxu1 %v17929_v11  ;;  %v18248_v11 = vand.u32 4294901760, %v1396_v5  ;;  %v18282_v27 = vand.u32 4294901760, %v18260_v18  ;;  %v18322_v57 = vand.u32 4294901760, %v1391_v40 }
 0x11d   : > { %15199 = vmatprep.subr.mxu0 %v17563_v0  ;;  %15226 = vmatprep.subr.mxu1 %v17563_v0 }
 0x11e   : > { %15200 = vmatpush3.msra.mxu0 %v906_v3  ;;  %15227 = vmatpush3.msra.mxu1 %v17931_v12  ;;  %v723_v12 = vld [vmem:[%s17889_s2] sm:$0xff]  ;;  %v18271_v23 = vsub.f32 %v1396_v5, %v18248_v11  ;;  %v1525_v46 = vsub.f32 %v18260_v18, %v18282_v27  ;;  %v18332_v3 = vand.u32 4294901760, %v18301_v43  ;;  %v18446_v5 = vand.u32 4294901760, %v1999_v51  ;;  %s21028_s2 = sld [smem:[#allocation41_spill]] }
 0x11f   : > { %15201 = vmatprep.subr.mxu0 %v17563_v0  ;;  %15228 = vmatprep.subr.mxu1 %v17563_v0  ;;  %v1407_v21 = vsel %vm1405_vm1, %v723_v12, 0  ;;  %v18452_v12 = vand.u32 4294901760, %v1998_v4 }
 0x120   : > { %15202 = vmatpush3.msra.mxu0 %v913_v19  ;;  %15229 = vmatpush3.msra.mxu1 %v17940_v17  ;;  %v18257_v17 = vand.u32 4294901760, %v1395_v10  ;;  %v18287_v30 = vand.u32 4294901760, %v1407_v21  ;;  %v18459_v16 = vsub.f32 %v1999_v51, %v18446_v5 }
 0x121   : > { %15203 = vmatprep.subr.mxu0 %v17563_v0  ;;  %15230 = vmatprep.subr.mxu1 %v17563_v0 }
 0x122   : > { %15204 = vmatpush3.msra.mxu0 %v920_v37  ;;  %15231 = vmatpush3.msra.mxu1 %v17956_v25  ;;  %v18279_v25 = vand.u32 4294901760, %v1393_v20  ;;  %v18285_v29 = vsub.f32 %v1395_v10, %v18257_v17  ;;  %v18315_v53 = vsub.f32 %v1407_v21, %v18287_v30  ;;  %v1997_v10 = vld [vmem:[#allocation12 + $0x28] sm:$0xff]  ;;  %v18470_v21 = vand.u32 4294901760, %v1996_v15 }
 0x123   : > { %15205 = vmatprep.subr.mxu0 %v17563_v0  ;;  %15232 = vmatprep.subr.mxu1 %v17563_v0 }
 0x124   : > { %15206 = vmatpush3.msra.mxu0 %v927_v44  ;;  %15233 = vmatpush3.msra.mxu1 %v17960_v28  ;;  %v1392_v28 = vld [vmem:[#allocation10 + $0x10] sm:$0xff]  ;;  %v18312_v47 = vand.u32 4294901760, %v18285_v29  ;;  %v18318_v55 = vsub.f32 %v1393_v20, %v18279_v25  ;;  %v18346_v31 = vand.u32 4294901760, %v18315_v53  ;;  %v1546_v44 = vsub.f32 %v18301_v43, %v18332_v3  ;;  %s20882_s6 = scalar_lea.hbm %s21028_s2, %s14056_s14 }
 0x125   : > { %15207 = vmatprep.subr.mxu0 %v17563_v0  ;;  %15234 = vmatprep.subr.mxu1 %v17563_v0  ;;  %v18468_v20 = vsub.f32 %v1998_v4, %v18452_v12 }
 0x126   : > { %15208 = vmatpush3.msra.mxu0 %v934_v52  ;;  %15235 = vmatpush3.msra.mxu1 %v17980_v35  ;;  %v18298_v35 = vand.u32 4294901760, %v18271_v23  ;;  %v1539_v26 = vsub.f32 %v18285_v29, %v18312_v47  ;;  %v18349_v37 = vand.u32 4294901760, %v18318_v55  ;;  %v1488_v54 = vsub.f32 %v18315_v53, %v18346_v31 }
 0x127   : > { %15209 = vmatprep.subr.mxu0 %v17563_v0  ;;  %15236 = vmatprep.subr.mxu1 %v17563_v0  ;;  %v1547_v60 = vand.u32 4294901760, %v1546_v44 }
 0x128   : > { %15210 = vmatpush3.msra.mxu0 %v941_v1  ;;  %15237 = vmatpush3.msra.mxu1 %v17995_v45  ;;  %v18305_v45 = vand.u32 4294901760, %v1392_v28  ;;  %v1532_v61 = vsub.f32 %v18271_v23, %v18298_v35  ;;  %v1553_v56 = vsub.f32 %v18318_v55, %v18349_v37  ;;  %v18391_v7 = vand.u32 4294901760, %v1488_v54 }
 0x129   : > { %15211 = vmatprep.subr.mxu0 %v17563_v0  ;;  %15238 = vmatprep.subr.mxu1 %v17563_v0 }
 0x12a   : > { %15212 = vmatpush3.msra.mxu0 %v948_v9  ;;  %15213 = vmatprep.mubr.msk.f32.mxu0 %vm17564_vm0, %v17563_v0  ;;  %v18339_v19 = vsub.f32 %v1392_v28, %v18305_v45  ;;  %v1533_v42 = vand.u32 4294901760, %v1532_v61  ;;  %v1554_v9 = vand.u32 4294901760, %v1553_v56  ;;  %v1995_v28 = vld [vmem:[#allocation12 + $0x18] sm:$0xff] }
 0x12b   : > { %15239 = vmatpush3.msra.mxu1 %v18003_v48  ;;  %15214 = vmatmul.mubr.f32.vlgmr.msra.gmra.mxu0 %v18025_v62  ;;  %v1390_v48 = vld [vmem:[#allocation10] sm:$0xff] }
 0x12c   : > { %15240 = vmatprep.subr.mxu1 %v17563_v0  ;;  %15251 = vmatprep.subr.mxu0 %v18241_v6  ;;  %v18336_v8 = vand.u32 4294901760, %v1390_v48  ;;  %v18367_v49 = vand.u32 4294901760, %v18339_v19 }
 0x12d   : > { %15241 = vmatpush3.msra.mxu1 %v18020_v59  ;;  %15252 = vmatpush3.msra.mxu0 %v18241_v6  ;;  %v18325_v59 = vsub.f32 %v1410_v24, %v18293_v34  ;;  %v18490_v24 = vsub.f32 %v1996_v15, %v18470_v21 }
 0x12e   : > { %15242 = vmatprep.subr.mxu1 %v17563_v0  ;;  %15253 = vmatprep.subr.mxu0 %v18248_v11  ;;  %v18370_v52 = vsub.f32 %v1390_v48, %v18336_v8  ;;  %v1560_v1 = vsub.f32 %v18339_v19, %v18367_v49 }
 0x12f   : > { %15243 = vmatpush3.msra.mxu1 %v18029_v63  ;;  %15254 = vmatpush3.msra.mxu0 %v18248_v11  ;;  %v1526_v63 = vand.u32 4294901760, %v1525_v46  ;;  %v18354_v38 = vand.u32 4294901760, %v18325_v59  ;;  %v1994_v46 = vld [vmem:[#allocation12 + $0x10] sm:$0xff] }
 0x130   : > { %15244 = vmatprep.subr.mxu1 %v17563_v0  ;;  %15255 = vmatprep.subr.mxu0 %v18257_v17  ;;  %v18388_v2 = vand.u32 4294901760, %v18370_v52  ;;  %v1561_v36 = vand.u32 4294901760, %v1560_v1  ;;  %v18527_v48 = vand.u32 4294901760, %v1994_v46 }
 0x131   : > { %15245 = vmatpush3.msra.mxu1 %v18044_v13  ;;  %15256 = vmatpush3.msra.mxu0 %v18257_v17  ;;  %v18357_v13 = vsub.f32 %v1391_v40, %v18322_v57  ;;  %v18516_v40 = vand.u32 4294901760, %v1995_v28 }
 0x132   : > { %15246 = vmatprep.subr.mxu1 %v17563_v0  ;;  %15257 = vmatprep.subr.mxu0 %v18268_v22  ;;  %v1574_v39 = vsub.f32 %v18370_v52, %v18388_v2 }
 0x133   : > { %15247 = vmatpush3.msra.mxu1 %v18056_v32  ;;  %15248 = vmatprep.mubr.msk.f32.mxu1 %vm17564_vm0, %v17563_v0  ;;  %v1540_v32 = vand.u32 4294901760, %v1539_v26  ;;  %v18381_v58 = vand.u32 4294901760, %v18357_v13 }
 0x134   : > { %15258 = vmatpush3.msra.mxu0 %v18268_v22  ;;  %15249 = vmatmul.mubr.f32.vlgmr.msra.gmra.mxu1 %v18025_v62  ;;  %v1498_v62 = vsub.f32 %v18325_v59, %v18354_v38  ;;  %v1575_v50 = vand.u32 4294901760, %v1574_v39 }
 0x135   : > { %15259 = vmatprep.subr.mxu0 %v18279_v25  ;;  %15270 = vmatprep.subr.mxu1 %v1526_v63  ;;  %v1567_v33 = vsub.f32 %v18357_v13, %v18381_v58 }
 0x136   : > { %15260 = vmatpush3.msra.mxu0 %v18279_v25  ;;  %15271 = vmatpush3.msra.mxu1 %v1526_v63  ;;  %v18394_v14 = vand.u32 4294901760, %v1498_v62  ;;  %v1992_v63 = vld [vmem:[#allocation12] sm:$0xff] }
 0x137   : > { %15261 = vmatprep.subr.mxu0 %v18305_v45  ;;  %15272 = vmatprep.subr.mxu1 %v1533_v42  ;;  %v1568_v41 = vand.u32 4294901760, %v1567_v33  ;;  %v18541_v26 = vand.u32 4294901760, %v1992_v63 }
 0x138   : > { %15262 = vmatpush3.msra.mxu0 %v18305_v45  ;;  %15273 = vmatpush3.msra.mxu1 %v1533_v42 }
 0x139   : > { %15263 = vmatprep.subr.mxu0 %v18322_v57  ;;  %15274 = vmatprep.subr.mxu1 %v1540_v32  ;;  %v2167_v44 = vsub.f32 %v1992_v63, %v18541_v26 }
 0x13a   : > { %15264 = vmatpush3.msra.mxu0 %v18322_v57  ;;  %15275 = vmatpush3.msra.mxu1 %v1540_v32 }
 0x13b   : > { %15265 = vmatprep.subr.mxu0 %v18336_v8  ;;  %15276 = vmatprep.subr.mxu1 %v1547_v60  ;;  %v18556_v54 = vand.u32 4294901760, %v2167_v44 }
 0x13c   : > { %15266 = vmatpush3.msra.mxu0 %v18336_v8  ;;  %15277 = vmatpush3.msra.mxu1 %v1547_v60 }
 0x13d   : > { %15267 = vmatprep.mubr.f32.mxu0 %v18391_v7  ;;  %15278 = vmatprep.subr.mxu1 %v1554_v9 }
 0x13e   : > { %15289 = vmatprep.subr.mxu0 %v18260_v18  ;;  %15268 = vmatmul.mubr.f32.vlgmr.msra.gmra.mxu0 %v18394_v14 }
 0x13f   : > { %15279 = vmatpush3.msra.mxu1 %v1554_v9  ;;  %15290 = vmatpush3.msra.mxu0 %v18260_v18  ;;  %v18461_v18 = vand.u32 4294901760, %v1997_v10  ;;  %v14042_v9 = vld [vmem:[%s20929_s3] ss:$0 sm:$0xff] }
 0x140   : > { %15280 = vmatprep.subr.mxu1 %v1561_v36  ;;  %15291 = vmatprep.subr.mxu0 %v18271_v23 }
 0x141   : > { %15281 = vmatpush3.msra.mxu1 %v1561_v36  ;;  %15292 = vmatpush3.msra.mxu0 %v18271_v23  ;;  %v18480_v23 = vsub.f32 %v1997_v10, %v18461_v18 }
 0x142   : > { %15282 = vmatprep.subr.mxu1 %v1568_v41  ;;  %15293 = vmatprep.subr.mxu0 %v18285_v29 }
 0x143   : > { %15283 = vmatpush3.msra.mxu1 %v1568_v41  ;;  %15294 = vmatpush3.msra.mxu0 %v18285_v29  ;;  %v18508_v29 = vand.u32 4294901760, %v18490_v24 }
 0x144   : > { %15284 = vmatprep.subr.mxu1 %v1575_v50  ;;  %15295 = vmatprep.subr.mxu0 %v18301_v43 }
 0x145   : > { %15285 = vmatpush3.msra.mxu1 %v1575_v50  ;;  %15286 = vmatprep.mubr.f32.mxu1 %v18287_v30 }
 0x146   : > { %15296 = vmatpush3.msra.mxu0 %v18301_v43  ;;  %15287 = vmatmul.mubr.f32.vlgmr.msra.gmra.mxu1 %v18293_v34 }
 0x147   : > { %15297 = vmatprep.subr.mxu0 %v18318_v55  ;;  %15308 = vmatprep.subr.mxu1 %v18241_v6 }
 0x148   : > { %15298 = vmatpush3.msra.mxu0 %v18318_v55  ;;  %15309 = vmatpush3.msra.mxu1 %v18241_v6  ;;  %v18530_v55 = vsub.f32 %v1995_v28, %v18516_v40 }
 0x149   : > { %15299 = vmatprep.subr.mxu0 %v18339_v19  ;;  %15310 = vmatprep.subr.mxu1 %v18248_v11 }
 0x14a   : > { %15300 = vmatpush3.msra.mxu0 %v18339_v19  ;;  %15311 = vmatpush3.msra.mxu1 %v18248_v11  ;;  %v2153_v19 = vsub.f32 %v1994_v46, %v18527_v48 }
 0x14b   : > { %15301 = vmatprep.subr.mxu0 %v18357_v13  ;;  %15312 = vmatprep.subr.mxu1 %v18257_v17 }
 0x14c   : > { %15302 = vmatpush3.msra.mxu0 %v18357_v13  ;;  %15313 = vmatpush3.msra.mxu1 %v18257_v17  ;;  %v18546_v13 = vand.u32 4294901760, %v2153_v19 }
 0x14d   : > { %15303 = vmatprep.subr.mxu0 %v18370_v52  ;;  %15314 = vmatprep.subr.mxu1 %v18268_v22 }
 0x14e   : > { %15304 = vmatpush3.msra.mxu0 %v18370_v52  ;;  %15305 = vmatprep.mubr.f32.mxu0 %v18315_v53  ;;  %v2155_v52 = vsub.f32 %v2153_v19, %v18546_v13 }
 0x14f   : > { %15315 = vmatpush3.msra.mxu1 %v18268_v22  ;;  %15306 = vmatmul.mubr.f32.vlgmr.msra.gmra.mxu0 %v18325_v59 }
 0x150   : > { %15316 = vmatprep.subr.mxu1 %v18279_v25  ;;  %15327 = vmatprep.subr.mxu0 %v18282_v27  ;;  %v2156_v56 = vand.u32 4294901760, %v2155_v52 }
 0x151   : > { %15317 = vmatpush3.msra.mxu1 %v18279_v25  ;;  %15328 = vmatpush3.msra.mxu0 %v18282_v27  ;;  %v18499_v27 = vand.u32 4294901760, %v18480_v23 }
 0x152   : > { %15318 = vmatprep.subr.mxu1 %v18305_v45  ;;  %15329 = vmatprep.subr.mxu0 %v18298_v35 }
 0x153   : > { %15319 = vmatpush3.msra.mxu1 %v18305_v45  ;;  %15330 = vmatpush3.msra.mxu0 %v18298_v35  ;;  %v2134_v35 = vsub.f32 %v18480_v23, %v18499_v27 }
 0x154   : > { %15320 = vmatprep.subr.mxu1 %v18322_v57  ;;  %15331 = vmatprep.subr.mxu0 %v18312_v47 }
 0x155   : > { %15321 = vmatpush3.msra.mxu1 %v18322_v57  ;;  %15332 = vmatpush3.msra.mxu0 %v18312_v47  ;;  %v2135_v47 = vand.u32 4294901760, %v2134_v35 }
 0x156   : > { %15322 = vmatprep.subr.mxu1 %v18336_v8  ;;  %15333 = vmatprep.subr.mxu0 %v18332_v3 }
 0x157   : > { %15323 = vmatpush3.msra.mxu1 %v18336_v8  ;;  %15324 = vmatprep.mubr.f32.mxu1 %v18346_v31 }
 0x158   : > { %15334 = vmatpush3.msra.mxu0 %v18332_v3  ;;  %15325 = vmatmul.mubr.f32.vlgmr.msra.gmra.mxu1 %v18354_v38  ;;  %v18535_v3 = vand.u32 4294901760, %v18530_v55 }
 0x159   : > { %15335 = vmatprep.subr.mxu0 %v18349_v37  ;;  %15346 = vmatprep.subr.mxu1 %v18241_v6 }
 0x15a   : > { %15336 = vmatpush3.msra.mxu0 %v18349_v37  ;;  %15347 = vmatpush3.msra.mxu1 %v18241_v6  ;;  %v18477_v6 = vand.u32 4294901760, %v18459_v16  ;;  %v2148_v37 = vsub.f32 %v18530_v55, %v18535_v3 }
 0x15b   : > { %15337 = vmatprep.subr.mxu0 %v18367_v49  ;;  %15348 = vmatprep.subr.mxu1 %v18248_v11 }
 0x15c   : > { %15338 = vmatpush3.msra.mxu0 %v18367_v49  ;;  %15349 = vmatpush3.msra.mxu1 %v18248_v11  ;;  %v18487_v11 = vand.u32 4294901760, %v18468_v20  ;;  %v2149_v49 = vand.u32 4294901760, %v2148_v37 }
 0x15d   : > { %15339 = vmatprep.subr.mxu0 %v18381_v58  ;;  %15350 = vmatprep.subr.mxu1 %v18257_v17 }
 0x15e   : > { %15340 = vmatpush3.msra.mxu0 %v18381_v58  ;;  %15351 = vmatpush3.msra.mxu1 %v18257_v17  ;;  %v2120_v17 = vsub.f32 %v18459_v16, %v18477_v6  ;;  %v2169_v58 = vsub.f32 %v2167_v44, %v18556_v54 }
 0x15f   : > { %15341 = vmatprep.subr.mxu0 %v18388_v2  ;;  %15352 = vmatprep.subr.mxu1 %v18268_v22 }
 0x160   : > { %15342 = vmatpush3.msra.mxu0 %v18388_v2  ;;  %15343 = vmatprep.mubr.f32.mxu0 %v18287_v30  ;;  %v2170_v1 = vand.u32 4294901760, %v2169_v58 }
 0x161   : > { %15353 = vmatpush3.msra.mxu1 %v18268_v22  ;;  %15344 = vmatmul.mubr.f32.vlgmr.msra.gmra.mxu0 %v18293_v34  ;;  %v2127_v22 = vsub.f32 %v18468_v20, %v18487_v11 }
 0x162   : > { %15354 = vmatprep.subr.mxu1 %v18279_v25  ;;  %15362 = vmatprep.mubr.f32.mxu1 %v18287_v30 }
 0x163   : > { %15355 = vmatpush3.msra.mxu1 %v18279_v25  ;;  %15365 = vmatprep.subr.mxu0 %v18446_v5  ;;  %v2121_v25 = vand.u32 4294901760, %v2120_v17  ;;  %v2128_v43 = vand.u32 4294901760, %v2127_v22 }
 0x164   : > { %15356 = vmatprep.subr.mxu1 %v18305_v45  ;;  %15366 = vmatpush3.msra.mxu0 %v18446_v5 }
 0x165   : > { %15357 = vmatpush3.msra.mxu1 %v18305_v45  ;;  %15367 = vmatprep.subr.mxu0 %v18452_v12  ;;  %v2141_v45 = vsub.f32 %v18490_v24, %v18508_v29 }
 0x166   : > { %15358 = vmatprep.subr.mxu1 %v18322_v57  ;;  %15368 = vmatpush3.msra.mxu0 %v18452_v12 }
 0x167   : > { %15359 = vmatpush3.msra.mxu1 %v18322_v57  ;;  %15369 = vmatprep.subr.mxu0 %v18461_v18  ;;  %v1993_v57 = vld [vmem:[#allocation12 + $0x8] sm:$0xff]  ;;  %v2142_v61 = vand.u32 4294901760, %v2141_v45 }
 0x168   : > { %15360 = vmatprep.subr.mxu1 %v18336_v8  ;;  %15370 = vmatpush3.msra.mxu0 %v18461_v18 }
 0x169   : > { %15361 = vmatpush3.msra.mxu1 %v18336_v8  ;;  %15371 = vmatprep.subr.mxu0 %v18470_v21  ;;  %v18537_v8 = vand.u32 4294901760, %v1993_v57 }
 0x16a   : > { %15363 = vmatmul.mubr.f32.vlgmr.msra.gmra.mxu1 %v18293_v34  ;;  %15384 = vmatprep.subr.mxu1 %v2121_v25 }
 0x16b   : > { %15385 = vmatpush3.msra.mxu1 %v2121_v25  ;;  %15372 = vmatpush3.msra.mxu0 %v18470_v21  ;;  %v2160_v42 = vsub.f32 %v1993_v57, %v18537_v8 }
 0x16c   : > { %15386 = vmatprep.subr.mxu1 %v2128_v43  ;;  %15373 = vmatprep.subr.mxu0 %v18516_v40 }
 0x16d   : > { %15387 = vmatpush3.msra.mxu1 %v2128_v43  ;;  %15374 = vmatpush3.msra.mxu0 %v18516_v40  ;;  %v18553_v32 = vand.u32 4294901760, %v2160_v42 }
 0x16e   : > { %15388 = vmatprep.subr.mxu1 %v2135_v47  ;;  %15375 = vmatprep.subr.mxu0 %v18527_v48 }
 0x16f   : > { %15389 = vmatpush3.msra.mxu1 %v2135_v47  ;;  %15376 = vmatpush3.msra.mxu0 %v18527_v48  ;;  %v2162_v62 = vsub.f32 %v2160_v42, %v18553_v32 }
 0x170   : > { %15390 = vmatprep.subr.mxu1 %v2142_v61  ;;  %15377 = vmatprep.subr.mxu0 %v18537_v8 }
 0x171   : > { %15391 = vmatpush3.msra.mxu1 %v2142_v61  ;;  %15378 = vmatpush3.msra.mxu0 %v18537_v8  ;;  %v2163_v60 = vand.u32 4294901760, %v2162_v62 }
 0x172   : > { %15392 = vmatprep.subr.mxu1 %v2149_v49  ;;  %15379 = vmatprep.subr.mxu0 %v18541_v26 }
 0x173   : > { %15393 = vmatpush3.msra.mxu1 %v2149_v49  ;;  %15380 = vmatpush3.msra.mxu0 %v18541_v26 }
 0x174   : > { %15394 = vmatprep.subr.mxu1 %v2156_v56  ;;  %15381 = vmatprep.mubr.f32.mxu0 %v18391_v7 }
 0x175   : > { %15395 = vmatpush3.msra.mxu1 %v2156_v56  ;;  %15403 = vmatprep.subr.mxu0 %v18459_v16 }
 0x176   : > { %15396 = vmatprep.subr.mxu1 %v2163_v60  ;;  %15382 = vmatmul.mubr.f32.vlgmr.msra.gmra.mxu0 %v18394_v14 }
 0x177   : > { %15397 = vmatpush3.msra.mxu1 %v2163_v60  ;;  %15404 = vmatpush3.msra.mxu0 %v18459_v16 }
 0x178   : > { %15398 = vmatprep.subr.mxu1 %v2170_v1  ;;  %15400 = vmatprep.mubr.f32.mxu1 %v18287_v30 }
 0x179   : > { %15399 = vmatpush3.msra.mxu1 %v2170_v1  ;;  %15405 = vmatprep.subr.mxu0 %v18468_v20 }
 0x17a   : > { %15422 = vmatprep.subr.mxu1 %v18446_v5  ;;  %15401 = vmatmul.mubr.f32.vlgmr.msra.gmra.mxu1 %v18293_v34 }
 0x17b   : > { %15406 = vmatpush3.msra.mxu0 %v18468_v20  ;;  %15423 = vmatpush3.msra.mxu1 %v18446_v5 }
 0x17c   : > { %15407 = vmatprep.subr.mxu0 %v18480_v23  ;;  %15424 = vmatprep.subr.mxu1 %v18452_v12 }
 0x17d   : > { %15408 = vmatpush3.msra.mxu0 %v18480_v23  ;;  %15425 = vmatpush3.msra.mxu1 %v18452_v12 }
 0x17e   : > { %15409 = vmatprep.subr.mxu0 %v18490_v24  ;;  %15426 = vmatprep.subr.mxu1 %v18461_v18 }
 0x17f   : > { %15410 = vmatpush3.msra.mxu0 %v18490_v24  ;;  %15427 = vmatpush3.msra.mxu1 %v18461_v18 }
 0x180   : > { %15411 = vmatprep.subr.mxu0 %v18530_v55  ;;  %15428 = vmatprep.subr.mxu1 %v18470_v21 }
 0x181   : > { %15412 = vmatpush3.msra.mxu0 %v18530_v55  ;;  %15429 = vmatpush3.msra.mxu1 %v18470_v21 }
 0x182   : > { %15413 = vmatprep.subr.mxu0 %v2153_v19  ;;  %15430 = vmatprep.subr.mxu1 %v18516_v40 }
 0x183   : > { %15414 = vmatpush3.msra.mxu0 %v2153_v19  ;;  %15431 = vmatpush3.msra.mxu1 %v18516_v40 }
 0x184   : > { %15415 = vmatprep.subr.mxu0 %v2160_v42  ;;  %15432 = vmatprep.subr.mxu1 %v18527_v48 }
 0x185   : > { %15416 = vmatpush3.msra.mxu0 %v2160_v42  ;;  %15433 = vmatpush3.msra.mxu1 %v18527_v48 }
 0x186   : > { %15417 = vmatprep.subr.mxu0 %v2167_v44  ;;  %15434 = vmatprep.subr.mxu1 %v18537_v8 }
 0x187   : > { %15418 = vmatpush3.msra.mxu0 %v2167_v44  ;;  %15435 = vmatpush3.msra.mxu1 %v18537_v8 }
 0x188   : > { %15419 = vmatprep.mubr.f32.mxu0 %v18315_v53  ;;  %15436 = vmatprep.subr.mxu1 %v18541_v26 }
 0x189   : > { %15441 = vmatprep.subr.mxu0 %v18477_v6  ;;  %15420 = vmatmul.mubr.f32.vlgmr.msra.gmra.mxu0 %v18325_v59 }
 0x18a   : > { %15437 = vmatpush3.msra.mxu1 %v18541_v26  ;;  %15442 = vmatpush3.msra.mxu0 %v18477_v6 }
 0x18b   : > { %15438 = vmatprep.mubr.f32.mxu1 %v18346_v31  ;;  %15443 = vmatprep.subr.mxu0 %v18487_v11 }
 0x18c   : > { %15460 = vmatprep.subr.mxu1 %v18446_v5  ;;  %15439 = vmatmul.mubr.f32.vlgmr.msra.gmra.mxu1 %v18354_v38 }
 0x18d   : > { %15444 = vmatpush3.msra.mxu0 %v18487_v11  ;;  %15461 = vmatpush3.msra.mxu1 %v18446_v5  ;;  %v14043_v11 = vld [vmem:[%s20931_s5] ss:$0 sm:$0xff] }
 0x18e   : > { %15445 = vmatprep.subr.mxu0 %v18499_v27  ;;  %15462 = vmatprep.subr.mxu1 %v18452_v12 }
 0x18f   : > { %15446 = vmatpush3.msra.mxu0 %v18499_v27  ;;  %15463 = vmatpush3.msra.mxu1 %v18452_v12 }
 0x190   : > { %15447 = vmatprep.subr.mxu0 %v18508_v29  ;;  %15464 = vmatprep.subr.mxu1 %v18461_v18 }
 0x191   : > { %15448 = vmatpush3.msra.mxu0 %v18508_v29  ;;  %15465 = vmatpush3.msra.mxu1 %v18461_v18 }
 0x192   : > { %15449 = vmatprep.subr.mxu0 %v18535_v3  ;;  %15466 = vmatprep.subr.mxu1 %v18470_v21 }
 0x193   : > { %15450 = vmatpush3.msra.mxu0 %v18535_v3  ;;  %15467 = vmatpush3.msra.mxu1 %v18470_v21 }
 0x194   : > { %15451 = vmatprep.subr.mxu0 %v18546_v13  ;;  %15468 = vmatprep.subr.mxu1 %v18516_v40 }
 0x195   : > { %15452 = vmatpush3.msra.mxu0 %v18546_v13  ;;  %15469 = vmatpush3.msra.mxu1 %v18516_v40 }
 0x196   : > { %15453 = vmatprep.subr.mxu0 %v18553_v32  ;;  %15470 = vmatprep.subr.mxu1 %v18527_v48 }
 0x197   : > { %15454 = vmatpush3.msra.mxu0 %v18553_v32  ;;  %15471 = vmatpush3.msra.mxu1 %v18527_v48 }
 0x198   : > { %15455 = vmatprep.subr.mxu0 %v18556_v54  ;;  %15472 = vmatprep.subr.mxu1 %v18537_v8 }
 0x199   : > { %15456 = vmatpush3.msra.mxu0 %v18556_v54  ;;  %15457 = vmatprep.mubr.f32.mxu0 %v18287_v30 }
 0x19a   : > { %15473 = vmatpush3.msra.mxu1 %v18537_v8  ;;  %15458 = vmatmul.mubr.f32.vlgmr.msra.gmra.mxu0 %v18293_v34 }
 0x19b   : > { %15474 = vmatprep.subr.mxu1 %v18541_v26  ;;  %15476 = vmatprep.mubr.f32.mxu1 %v18287_v30 }
 0x19c   : > { %15475 = vmatpush3.msra.mxu1 %v18541_v26  ;;  %15479 = vmatprep.subr.mxu0 %v17563_v0 }
 0x19d   : > { %15477 = vmatmul.mubr.f32.vlgmr.msra.gmra.mxu1 %v18293_v34  ;;  %15483 = vmatprep.mubr.msk.f32.mxu0 %vm17564_vm0, %v17563_v0 }
 0x19e   : > { %15486 = vmatprep.subr.mxu1 %v17563_v0  ;;  %15490 = vmatprep.mubr.msk.f32.mxu1 %vm17564_vm0, %v17563_v0 }
 0x1a9   : > { %v836_v2 = vpop.f32.mrf.mxu0 }
 0x1aa   : > { %v837_v36 = vadd.f32 %v14042_v9, %v836_v2 }
 0x1ab   : > { %v15075_v33 = vpop.f32.mrf.mxu0 }
 0x1b0   : > { %v987_v39 = vpop.f32.mrf.mxu1 }
 0x1b1   : > { %v988_v41 = vadd.f32 %v987_v39, %v837_v36 }
 0x1b2   : > { %v15110_v50 = vpop.f32.mrf.mxu1 }
 0x1c9   : > { %v1091_v51 = vpop.f32.mrf.mxu0 }
 0x1ca   : > { %v1092_v4 = vadd.f32 %v1091_v51, %v988_v41 }
 0x1cb   : > { %v15145_v5 = vpop.f32.mrf.mxu0 }
 0x1d2   : > { %v1180_v10 = vpop.f32.mrf.mxu1 }
 0x1d3   : > { %v1181_v12 = vadd.f32 %v1180_v10, %v1092_v4  ;;  %v14044_v4 = vld [vmem:[%s20933_s7] ss:$0 sm:$0xff] }
 0x1d4   : > { %v15180_v15 = vpop.f32.mrf.mxu1 }
 0x1eb   : > { %v1299_v16 = vpop.f32.mrf.mxu0 }
 0x1ec   : > { %v1300_v23 = vadd.f32 %v1299_v16, %v1181_v12 }
 0x1ed   : > { %v15215_v18 = vpop.f32.mrf.mxu0 }
 0x1f4   : > { %v1386_v20 = vpop.f32.mrf.mxu1 }
 0x1f5   : > { %v18644_v27 = vadd.f32 %v1386_v20, %v1300_v23 }
 0x1f6   : > { %v15250_v21 = vpop.f32.mrf.mxu1 }
 0x1f7   : > { %v2589_v43 = vsel %vm2587_vm2, %v18644_v27, 0 }
 0x1f8   : > { %v18648_v55 = vand.u32 4294901760, %v2589_v43 }
 0x1fa   : > { %v2665_v26 = vsub.f32 %v2589_v43, %v18648_v55 }
 0x1fc   : > { %v2666_v32 = vand.u32 4294901760, %v2665_v26 }
 0x1fe   : > { %v15269_v6 = vpop.f32.mrf.mxu0  ;;  %v2667_v60 = vsub.f32 %v2665_v26, %v2666_v32 }
 0x1ff   : > { %v1502_v22 = vadd.f32 %v15269_v6, %v14043_v11 }
 0x200   : > { %v1491_v24 = vpop.f32.mrf.mxu0  ;;  %v2668_v36 = vand.u32 4294901760, %v2667_v60 }
 0x201   : > { %v1492_v25 = vadd.f32 %v14043_v11, %v1491_v24 }
 0x206   : > { %v15288_v17 = vpop.f32.mrf.mxu1 }
 0x207   : > { %v1619_v45 = vadd.f32 %v15288_v17, %v1502_v22 }
 0x208   : > { %v1612_v29 = vpop.f32.mrf.mxu1 }
 0x209   : > { %v1613_v47 = vadd.f32 %v1612_v29, %v1492_v25 }
 0x20f   : > { %v15307_v28 = vpop.f32.mrf.mxu0 }
 0x210   : > { %v1714_v48 = vadd.f32 %v15307_v28, %v1619_v45 }
 0x211   : > { %v1706_v35 = vpop.f32.mrf.mxu0 }
 0x212   : > { %v1707_v61 = vadd.f32 %v1706_v35, %v1613_v47 }
 0x218   : > { %v15326_v40 = vpop.f32.mrf.mxu1 }
 0x219   : > { %v1803_v3 = vadd.f32 %v15326_v40, %v1714_v48 }
 0x21a   : > { %v1794_v57 = vpop.f32.mrf.mxu1 }
 0x21b   : > { %v1795_v19 = vadd.f32 %v1794_v57, %v1707_v61 }
 0x221   : > { %v15345_v46 = vpop.f32.mrf.mxu0 }
 0x222   : > { %v1904_v63 = vadd.f32 %v15345_v46, %v1803_v3 }
 0x223   : > { %v1897_v8 = vpop.f32.mrf.mxu0 }
 0x224   : > { %v1898_v13 = vadd.f32 %v1897_v8, %v1795_v19 }
 0x22a   : > { %v15364_v37 = vpop.f32.mrf.mxu1 }
 0x22b   : > { %v18651_v42 = vadd.f32 %v15364_v37, %v1904_v63 }
 0x22c   : > { %v1982_v44 = vpop.f32.mrf.mxu1 }
 0x22d   : > { %v18653_v49 = vadd.f32 %v1982_v44, %v1898_v13  ;;  %3537 = vrot.lane.b32.xlu1 %v18651_v42, %s17565_s17  ;;  %v2595_v52 = vsel %vm2587_vm2, %v18651_v42, 0 }
 0x22e   : > { %v2626_v54 = vand.u32 4294901760, %v2595_v52 }
 0x22f   : > { %v2592_v56 = vsel %vm2587_vm2, %v18653_v49, 0 }
 0x230   : > { %15480 = vmatpush3.xpose.msra.mxu0 %v2626_v54  ;;  %v2704_v62 = vsub.f32 %v2595_v52, %v2626_v54  ;;  %v2629_v58 = vand.u32 4294901760, %v2592_v56 }
 0x231   : > { %3535 = vrot.lane.b32.xlu1 %v18653_v49, %s17565_s17  ;;  %15481 = vmatprep.subr.mxu0 %v17563_v0 }
 0x232   : > { %v2711_v1 = vsub.f32 %v2592_v56, %v2629_v58  ;;  %v2705_v2 = vand.u32 4294901760, %v2704_v62 }
 0x234   : > { %15482 = vmatpush3.xpose.msra.mxu0 %v2629_v58  ;;  %v2706_v9 = vsub.f32 %v2704_v62, %v2705_v2  ;;  %v2712_v33 = vand.u32 4294901760, %v2711_v1 }
 0x235   : > { %15493 = vmatprep.subr.mxu0 %v17563_v0 }
 0x236   : > { %v2707_v39 = vand.u32 4294901760, %v2706_v9  ;;  %v2713_v41 = vsub.f32 %v2711_v1, %v2712_v33  ;;  %v15383_v51 = vpop.f32.mrf.mxu0 }
 0x237   : > { %15484 = vmatmul.mubr.f32.vlgmr.msra.gmra.mxu0 %v2668_v36  ;;  %v2097_v12 = vadd.f32 %v15383_v51, %v14044_v4 }
 0x238   : > { %15487 = vmatpush3.xpose.msra.mxu1 %v2707_v39  ;;  %15494 = vmatpush3.xpose.msra.mxu0 %v2704_v62  ;;  %v2714_v50 = vand.u32 4294901760, %v2713_v41  ;;  %v2086_v5 = vpop.f32.mrf.mxu0 }
 0x239   : > { %15488 = vmatprep.subr.mxu1 %v17563_v0  ;;  %15495 = vmatprep.subr.mxu0 %v17563_v0  ;;  %v2087_v15 = vadd.f32 %v14044_v4, %v2086_v5 }
 0x23a   : > { %15497 = vmatprep.mubr.msk.f32.mxu0 %vm17564_vm0, %v17563_v0  ;;  %v15402_v10 = vpop.f32.mrf.mxu1 }
 0x23b   : > { %v2214_v20 = vadd.f32 %v15402_v10, %v2097_v12 }
 0x23c   : > { %15489 = vmatpush3.xpose.msra.mxu1 %v2714_v50  ;;  %15496 = vmatpush3.xpose.msra.mxu0 %v2711_v1  ;;  %v2207_v16 = vpop.f32.mrf.mxu1 }
 0x23d   : > { %15500 = vmatprep.subr.mxu1 %v17563_v0  ;;  %15507 = vmatprep.subr.mxu0 %v17563_v0  ;;  %v2208_v21 = vadd.f32 %v2207_v16, %v2087_v15 }
 0x23f   : > { %15491 = vmatmul.mubr.f32.vlgmr.msra.gmra.mxu1 %v18648_v55  ;;  %15498 = vmatmul.mubr.f32.vlgmr.msra.gmra.mxu0 %v2665_v26 }
 0x240   : > { %15501 = vmatpush3.xpose.msra.mxu1 %v2626_v54  ;;  %15508 = vmatpush3.xpose.msra.mxu0 %v2705_v2 }
 0x241   : > { %15502 = vmatprep.subr.mxu1 %v17563_v0  ;;  %15509 = vmatprep.subr.mxu0 %v17563_v0 }
 0x242   : > { %15504 = vmatprep.mubr.msk.f32.mxu1 %vm17564_vm0, %v17563_v0  ;;  %15511 = vmatprep.mubr.msk.f32.mxu0 %vm17564_vm0, %v17563_v0 }
 0x244   : > { %15503 = vmatpush3.xpose.msra.mxu1 %v2629_v58  ;;  %15510 = vmatpush3.xpose.msra.mxu0 %v2712_v33 }
 0x245   : > { %15514 = vmatprep.subr.mxu1 %v17563_v0  ;;  %15521 = vmatprep.subr.mxu0 %v17563_v0 }
 0x247   : > { %15505 = vmatmul.mubr.f32.vlgmr.msra.gmra.mxu1 %v2666_v32  ;;  %15512 = vmatmul.mubr.f32.vlgmr.msra.gmra.mxu0 %v18648_v55 }
 0x248   : > { %15515 = vmatpush3.xpose.msra.mxu1 %v2626_v54  ;;  %15518 = vmatprep.mubr.msk.f32.mxu1 %vm17564_vm0, %v17563_v0 }
 0x249   : > { %15516 = vmatprep.subr.mxu1 %v17563_v0  ;;  %15525 = vmatprep.mubr.msk.f32.mxu0 %vm17564_vm0, %v17563_v0  ;;  %v15421_v18 = vpop.f32.mrf.mxu0 }
 0x24a   : > { %v2309_v11 = vadd.f32 %v15421_v18, %v2214_v20 }
 0x24b   : > { %v2301_v6 = vpop.f32.mrf.mxu0 }
 0x24c   : > { %15517 = vmatpush3.xpose.msra.mxu1 %v2629_v58  ;;  %v15440_v23 = vpop.f32.mrf.mxu1  ;;  %v2302_v24 = vadd.f32 %v2301_v6, %v2208_v21 }
 0x24d   : > { %15528 = vmatprep.subr.mxu1 %v17563_v0  ;;  %v2398_v28 = vadd.f32 %v15440_v23, %v2309_v11 }
 0x24e   : > { %v2389_v17 = vpop.f32.mrf.mxu1 }
 0x24f   : > { %15519 = vmatmul.mubr.f32.vlgmr.msra.gmra.mxu1 %v18648_v55  ;;  %v2390_v22 = vadd.f32 %v2389_v17, %v2302_v24 }
 0x250   : > { %15532 = vmatprep.mubr.msk.f32.mxu1 %vm17564_vm0, %v17563_v0 }
 0x25a   : > { %v15459_v29 = vpop.f32.mrf.mxu0 }
 0x25b   : > { %v2499_v25 = vadd.f32 %v15459_v29, %v2398_v28 }
 0x25c   : > { %v2492_v35 = vpop.f32.mrf.mxu0 }
 0x25d   : > { %v2493_v40 = vadd.f32 %v2492_v35, %v2390_v22  ;;  %v15478_v43 = vpop.f32.mrf.mxu1 }
 0x25e   : > { %v18693_v45 = vadd.f32 %v15478_v43, %v2499_v25 }
 0x25f   : > { %v2577_v46 = vpop.f32.mrf.mxu1 }
 0x260   : > { %v18695_v47 = vadd.f32 %v2577_v46, %v2493_v40  ;;  %v18698_v48 = vand.u32 4294901760, %v18693_v45 }
 0x262   : > { %15522 = vmatpush3.msra.mxu0 %v18698_v48  ;;  %v18702_v55 = vand.u32 4294901760, %v18695_v47  ;;  %v18706_v57 = vsub.f32 %v18693_v45, %v18698_v48 }
 0x263   : > { %15523 = vmatprep.subr.mxu0 %v17563_v0 }
 0x264   : > { %15524 = vmatpush3.msra.mxu0 %v18702_v55  ;;  %v3180_v61 = vand.u32 4294901760, %v18706_v57  ;;  %v18713_v3 = vsub.f32 %v18695_v47, %v18702_v55 }
 0x265   : > { %15535 = vmatprep.subr.mxu0 %v17563_v0 }
 0x266   : > { %v3181_v8 = vsub.f32 %v18706_v57, %v3180_v61  ;;  %v3187_v19 = vand.u32 4294901760, %v18713_v3 }
 0x268   : > { %v3182_v63 = vand.u32 4294901760, %v3181_v8  ;;  %v3188_v26 = vsub.f32 %v18713_v3, %v3187_v19 }
 0x26a   : > { %15529 = vmatpush3.msra.mxu1 %v3182_v63  ;;  %v3189_v37 = vand.u32 4294901760, %v3188_v26 }
 0x26b   : > { %15530 = vmatprep.subr.mxu1 %v17563_v0 }
 0x26c   : > { %15531 = vmatpush3.msra.mxu1 %v3189_v37 }
 0x26d   : > { %15542 = vmatprep.subr.mxu1 %v17563_v0 }
 0x29f   : > { %v3538_v20 = vpop.permute.xlu1 %3537 }
 0x2a0   : > { %v3543_v21 = vsel %vm2587_vm2, %v3538_v20, 0 }
 0x2a1   : > { %v18730_v23 = vand.u32 4294901760, %v3543_v21 }
 0x2a3   : > { %v3536_v6 = vpop.permute.xlu1 %3535  ;;  %v18734_v28 = vsub.f32 %v3543_v21, %v18730_v23 }
 0x2a4   : > { %v3541_v11 = vsel %vm2587_vm2, %v3536_v6, 0 }
 0x2a5   : > { %v18736_v22 = vand.u32 4294901760, %v3541_v11  ;;  %v3653_v35 = vand.u32 4294901760, %v18734_v28 }
 0x2a7   : > { %v18741_v40 = vsub.f32 %v3541_v11, %v18736_v22  ;;  %v3654_v63 = vsub.f32 %v18734_v28, %v3653_v35 }
 0x2a9   : > { %v3660_v26 = vand.u32 4294901760, %v18741_v40 }
 0x2f7   : > { %v2670_v13 = vpop.f32.mrf.mxu0 }
 0x2f9   : > { %v15485_v44 = vpop.f32.mrf.mxu0 }
 0x2ff   : > { %v2751_v52 = vpop.f32.mrf.mxu1  ;;  %v2827_v32 = vpop.f32.mrf.mxu0 }
 0x300   : > { %v2752_v62 = vadd.f32 %v2751_v52, %v2670_v13  ;;  %v3655_v52 = vand.u32 4294901760, %v3654_v63 }
 0x301   : > { %v15492_v54 = vpop.f32.mrf.mxu1  ;;  %v15499_v56 = vpop.f32.mrf.mxu0 }
 0x302   : > { %v2828_v1 = vadd.f32 %v2827_v32, %v2752_v62  ;;  %v3661_v32 = vsub.f32 %v18741_v40, %v3660_v26 }
 0x307   : > { %v2902_v58 = vpop.f32.mrf.mxu1  ;;  %v2979_v60 = vpop.f32.mrf.mxu0 }
 0x308   : > { %v2903_v33 = vadd.f32 %v2902_v58, %v2828_v1 }
 0x309   : > { %v15506_v2 = vpop.f32.mrf.mxu1  ;;  %v15513_v9 = vpop.f32.mrf.mxu0 }
 0x30a   : > { %v2980_v36 = vadd.f32 %v2979_v60, %v2903_v33 }
 0x30f   : > { %v3052_v39 = vpop.f32.mrf.mxu1 }
 0x310   : > { %v3053_v41 = vadd.f32 %v3052_v39, %v2980_v36 }
 0x311   : > { %v15520_v50 = vpop.f32.mrf.mxu1 }
 0x312   : > { %v3056_v51 = vmul.f32 0.088388346, %v3053_v41 }
 0x314   : > { %v3058_v4 = vsel %vm3057_vm3, %v3056_v51, -inf }
 0x315   : > { %3059 = vmax.xlane.f32.xlu0 %v3058_v4 }
 0x39e   : > { %v3060_v5 = vpop.xlane.xlu0 %3059 }
 0x39f   : > { %v3061_v10 = vsub.f32 %v3056_v51, %v3060_v5 }
 0x3a1   : > { %v3062_v12 = vmul.f32 1.442695, %v3061_v10 }
 0x3a3   : > { %17155 = vpow2.f32 %v3062_v12 }
 0x3b0   : > { %v17156_v15 = vpop.eup %17155 }
 0x3b1   : > { %v3064_v16 = vsel %vm3057_vm3, %v17156_v15, 0.0 }
 0x3b2   : > { %3065 = vadd.xlane.f32.xlu0 %v3064_v16 }
 0x3c8   : > { %3533 = vrot.lane.b32.xlu0 %v18644_v27, %s17565_s17 }
 0x43b   : > { %v3066_v18 = vpop.xlane.xlu0 %3065 }
 0x43c   : > { %17157 = vrcp.f32 %v3066_v18 }
 0x43f   : > { %v3534_v46 = vpop.permute.xlu0 %3533 }
 0x440   : > { %v3539_v13 = vsel %vm2587_vm2, %v3534_v46, 0 }
 0x441   : > { %v3612_v54 = vand.u32 4294901760, %v3539_v13 }
 0x449   : > { %v17158_v24 = vpop.eup %17157 }
 0x44a   : > { %v3068_v17 = vmul.f32 %v17158_v24, %v17156_v15 }
 0x44c   : > { %v3070_v29 = vsel %vm3057_vm3, %v3068_v17, 0 }
 0x44d   : > { %v3139_v25 = vand.u32 4294901760, %v3070_v29 }
 0x44f   : > { %v3140_v43 = vsub.f32 %v3070_v29, %v3139_v25  ;;  %15533 = vmatmul.mubr.f32.vlgmr.msra.gmra.mxu1 %v3139_v25 }
 0x450   : > { %15543 = vmatpush3.msra.mxu1 %v18698_v48  ;;  %15546 = vmatprep.mubr.msk.f32.mxu1 %vm17564_vm0, %v17563_v0 }
 0x451   : > { %15544 = vmatprep.subr.mxu1 %v17563_v0  ;;  %v3141_v8 = vand.u32 4294901760, %v3140_v43 }
 0x452   : > { %15545 = vmatpush3.msra.mxu1 %v18702_v55 }
 0x453   : > { %15556 = vmatprep.subr.mxu1 %v17563_v0  ;;  %15547 = vmatmul.mubr.f32.vlgmr.msra.gmra.mxu1 %v3141_v8  ;;  %v3142_v37 = vsub.f32 %v3140_v43, %v3141_v8 }
 0x454   : > { %15557 = vmatpush3.msra.mxu1 %v18698_v48  ;;  %15560 = vmatprep.mubr.msk.f32.mxu1 %vm17564_vm0, %v17563_v0  ;;  %v3662_v48 = vand.u32 4294901760, %v3661_v32 }
 0x455   : > { %15558 = vmatprep.subr.mxu1 %v17563_v0  ;;  %v3143_v44 = vand.u32 4294901760, %v3142_v37 }
 0x456   : > { %15559 = vmatpush3.msra.mxu1 %v18702_v55  ;;  %v3613_v55 = vsub.f32 %v3539_v13, %v3612_v54 }
 0x457   : > { %15570 = vmatprep.subr.mxu1 %v17563_v0  ;;  %15526 = vmatmul.mubr.f32.vlgmr.msra.gmra.mxu0 %v3143_v44 }
 0x458   : > { %15536 = vmatpush3.msra.mxu0 %v18706_v57  ;;  %15561 = vmatmul.mubr.f32.vlgmr.msra.gmra.mxu1 %v3139_v25  ;;  %v3614_v56 = vand.u32 4294901760, %v3613_v55 }
 0x459   : > { %15571 = vmatpush3.xpose.msra.mxu1 %v3655_v52  ;;  %15537 = vmatprep.subr.mxu0 %v17563_v0 }
 0x45a   : > { %15538 = vmatpush3.msra.mxu0 %v18713_v3  ;;  %15539 = vmatprep.mubr.msk.f32.mxu0 %vm17564_vm0, %v17563_v0  ;;  %v3615_v57 = vsub.f32 %v3613_v55, %v3614_v56 }
 0x45b   : > { %15549 = vmatprep.subr.mxu0 %v17563_v0  ;;  %15572 = vmatprep.subr.mxu1 %v17563_v0 }
 0x45c   : > { %15540 = vmatmul.mubr.f32.vlgmr.msra.gmra.mxu0 %v3140_v43  ;;  %15574 = vmatprep.mubr.msk.f32.mxu1 %vm17564_vm0, %v17563_v0 }
 0x45d   : > { %15550 = vmatpush3.msra.mxu0 %v3180_v61  ;;  %15573 = vmatpush3.xpose.msra.mxu1 %v3662_v48  ;;  %v3616_v61 = vand.u32 4294901760, %v3615_v57 }
 0x45e   : > { %15551 = vmatprep.subr.mxu0 %v17563_v0  ;;  %15553 = vmatprep.mubr.msk.f32.mxu0 %vm17564_vm0, %v17563_v0 }
 0x45f   : > { %15552 = vmatpush3.msra.mxu0 %v3187_v19  ;;  %15584 = vmatprep.subr.mxu1 %v17563_v0 }
 0x460   : > { %15563 = vmatprep.subr.mxu0 %v17563_v0  ;;  %15575 = vmatmul.mubr.f32.vlgmr.msra.gmra.mxu1 %v3612_v54 }
 0x461   : > { %15554 = vmatmul.mubr.f32.vlgmr.msra.gmra.mxu0 %v3139_v25  ;;  %15585 = vmatpush3.xpose.msra.mxu1 %v18730_v23 }
 0x462   : > { %15564 = vmatpush3.xpose.msra.mxu0 %v18730_v23  ;;  %15586 = vmatprep.subr.mxu1 %v17563_v0 }
 0x463   : > { %15565 = vmatprep.subr.mxu0 %v17563_v0  ;;  %15567 = vmatprep.mubr.msk.f32.mxu0 %vm17564_vm0, %v17563_v0 }
 0x464   : > { %15588 = vmatprep.mubr.msk.f32.mxu1 %vm17564_vm0, %v17563_v0 }
 0x465   : > { %15587 = vmatpush3.xpose.msra.mxu1 %v18736_v22 }
 0x466   : > { %15566 = vmatpush3.xpose.msra.mxu0 %v18736_v22  ;;  %15598 = vmatprep.subr.mxu1 %v17563_v0 }
 0x467   : > { %15577 = vmatprep.subr.mxu0 %v17563_v0 }
 0x468   : > { %15589 = vmatmul.mubr.f32.vlgmr.msra.gmra.mxu1 %v3614_v56 }
 0x469   : > { %15568 = vmatmul.mubr.f32.vlgmr.msra.gmra.mxu0 %v3616_v61  ;;  %15599 = vmatpush3.xpose.msra.mxu1 %v18730_v23 }
 0x46a   : > { %15578 = vmatpush3.xpose.msra.mxu0 %v18734_v28  ;;  %15600 = vmatprep.subr.mxu1 %v17563_v0 }
 0x46b   : > { %15579 = vmatprep.subr.mxu0 %v17563_v0  ;;  %15581 = vmatprep.mubr.msk.f32.mxu0 %vm17564_vm0, %v17563_v0 }
 0x46c   : > { %15602 = vmatprep.mubr.msk.f32.mxu1 %vm17564_vm0, %v17563_v0 }
 0x46d   : > { %15601 = vmatpush3.xpose.msra.mxu1 %v18736_v22 }
 0x46e   : > { %15580 = vmatpush3.xpose.msra.mxu0 %v18741_v40  ;;  %15612 = vmatprep.subr.mxu1 %v17563_v0 }
 0x46f   : > { %15591 = vmatprep.subr.mxu0 %v17563_v0 }
 0x470   : > { %15603 = vmatmul.mubr.f32.vlgmr.msra.gmra.mxu1 %v3612_v54 }
 0x471   : > { %15582 = vmatmul.mubr.f32.vlgmr.msra.gmra.mxu0 %v3613_v55  ;;  %15616 = vmatprep.mubr.msk.f32.mxu1 %vm17564_vm0, %v17563_v0 }
 0x472   : > { %15592 = vmatpush3.xpose.msra.mxu0 %v3653_v35  ;;  %15595 = vmatprep.mubr.msk.f32.mxu0 %vm17564_vm0, %v17563_v0 }
 0x473   : > { %15593 = vmatprep.subr.mxu0 %v17563_v0 }
 0x476   : > { %15594 = vmatpush3.xpose.msra.mxu0 %v3660_v26 }
 0x477   : > { %15605 = vmatprep.subr.mxu0 %v17563_v0 }
 0x479   : > { %15596 = vmatmul.mubr.f32.vlgmr.msra.gmra.mxu0 %v3612_v54 }
 0x47a   : > { %15609 = vmatprep.mubr.msk.f32.mxu0 %vm17564_vm0, %v17563_v0 }
 0x50f   : > { %v3226_v3 = vpop.f32.mrf.mxu1 }
 0x511   : > { %v15534_v19 = vpop.f32.mrf.mxu1 }
 0x513   : > { %v3377_v62 = vpop.f32.mrf.mxu1 }
 0x515   : > { %v15548_v58 = vpop.f32.mrf.mxu1 }
 0x517   : > { %v3145_v60 = vpop.f32.mrf.mxu0 }
 0x518   : > { %v3527_v1 = vpop.f32.mrf.mxu1  ;;  %v3227_v33 = vadd.f32 %v3226_v3, %v3145_v60 }
 0x519   : > { %v15527_v2 = vpop.f32.mrf.mxu0 }
 0x51a   : > { %v15562_v9 = vpop.f32.mrf.mxu1 }
 0x51c   : > { %v3302_v36 = vpop.f32.mrf.mxu0 }
 0x51d   : > { %v3303_v39 = vadd.f32 %v3302_v36, %v3227_v33 }
 0x51e   : > { %v15541_v41 = vpop.f32.mrf.mxu0 }
 0x51f   : > { %v3378_v50 = vadd.f32 %v3377_v62, %v3303_v39 }
 0x520   : > { %v3699_v51 = vpop.f32.mrf.mxu1 }
 0x521   : > { %v3454_v4 = vpop.f32.mrf.mxu0 }
 0x522   : > { %v3455_v5 = vadd.f32 %v3454_v4, %v3378_v50  ;;  %v15576_v10 = vpop.f32.mrf.mxu1 }
 0x523   : > { %v15555_v12 = vpop.f32.mrf.mxu0 }
 0x524   : > { %v3528_v15 = vadd.f32 %v3527_v1, %v3455_v5 }
 0x526   : > { %v3531_v16 = vadd.f32 %v3528_v15, %v18644_v27 }
 0x528   : > { %3532 = vst.msk [vmem:[#allocation2] sm:$0xff] %vm2587_vm2, %v3531_v16  ;;  %v3850_v18 = vpop.f32.mrf.mxu1 }
 0x529   : > { %v3618_v20 = vpop.f32.mrf.mxu0 }
 0x52a   : > { %v15590_v21 = vpop.f32.mrf.mxu1  ;;  %v3700_v24 = vadd.f32 %v3699_v51, %v3618_v20 }
 0x52b   : > { %v15569_v6 = vpop.f32.mrf.mxu0 }
 0x530   : > { %v4000_v23 = vpop.f32.mrf.mxu1 }
 0x531   : > { %v3775_v11 = vpop.f32.mrf.mxu0 }
 0x532   : > { %v15604_v17 = vpop.f32.mrf.mxu1  ;;  %v3776_v22 = vadd.f32 %v3775_v11, %v3700_v24 }
 0x533   : > { %v15583_v28 = vpop.f32.mrf.mxu0 }
 0x534   : > { %v3851_v29 = vadd.f32 %v3850_v18, %v3776_v22 }
 0x539   : > { %v3927_v25 = vpop.f32.mrf.mxu0 }
 0x53a   : > { %v3928_v35 = vadd.f32 %v3927_v25, %v3851_v29 }
 0x53b   : > { %v15597_v40 = vpop.f32.mrf.mxu0 }
 0x53c   : > { %v4001_v43 = vadd.f32 %v4000_v23, %v3928_v35 }
 0x53e   : > { %v4004_v46 = vmul.f32 0.088388346, %v4001_v43 }
 0x540   : > { %v4005_v8 = vsel %vm3057_vm3, %v4004_v46, -inf }
 0x541   : > { %4006 = vmax.xlane.f32.xlu1 %v4005_v8 }
 0x552   : > { %4020 = vrot.lane.b32.xlu1 %v18693_v45, %s17565_s17 }
 0x556   : > { %4497 = vrot.lane.b32.xlu1 %v18651_v42, %s17566_s8 }
 0x55a   : > { %4495 = vrot.lane.b32.xlu1 %v18653_v49, %s17566_s8 }
 0x55e   : > { %4493 = vrot.lane.b32.xlu1 %v18644_v27, %s17566_s8 }
 0x5ca   : > { %v4007_v63 = vpop.xlane.xlu1 %4006 }
 0x5cb   : > { %v4008_v26 = vsub.f32 %v4004_v46, %v4007_v63 }
 0x5cd   : > { %v4009_v37 = vmul.f32 1.442695, %v4008_v26 }
 0x5ce   : > { %v4021_v13 = vpop.permute.xlu1 %4020 }
 0x5cf   : > { %17159 = vpow2.f32 %v4009_v37  ;;  %v4056_v44 = vand.u32 4294901760, %v4021_v13 }
 0x5d1   : > { %v18828_v52 = vsub.f32 %v4021_v13, %v4056_v44  ;;  %15606 = vmatpush3.msra.mxu0 %v4056_v44 }
 0x5d2   : > { %15607 = vmatprep.subr.mxu0 %v17563_v0  ;;  %v4498_v61 = vpop.permute.xlu1 %4497 }
 0x5d3   : > { %v4135_v32 = vand.u32 4294901760, %v18828_v52  ;;  %v4503_v58 = vsel %vm2587_vm2, %v4498_v61, 0 }
 0x5d4   : > { %v18841_v9 = vand.u32 4294901760, %v4503_v58 }
 0x5d5   : > { %v4136_v54 = vsub.f32 %v18828_v52, %v4135_v32 }
 0x5d6   : > { %v4496_v1 = vpop.permute.xlu1 %4495  ;;  %v18845_v50 = vsub.f32 %v4503_v58, %v18841_v9 }
 0x5d7   : > { %v4137_v48 = vand.u32 4294901760, %v4136_v54  ;;  %v4501_v33 = vsel %vm2587_vm2, %v4496_v1, 0 }
 0x5d8   : > { %v18847_v51 = vand.u32 4294901760, %v4501_v33  ;;  %v4613_v10 = vand.u32 4294901760, %v18845_v50 }
 0x5d9   : > { %15613 = vmatpush3.msra.mxu1 %v4137_v48 }
 0x5da   : > { %15614 = vmatprep.subr.mxu1 %v17563_v0  ;;  %v18853_v12 = vsub.f32 %v4501_v33, %v18847_v51  ;;  %v4494_v16 = vpop.permute.xlu1 %4493  ;;  %v4614_v20 = vsub.f32 %v18845_v50, %v4613_v10 }
 0x5db   : > { %v4499_v23 = vsel %vm2587_vm2, %v4494_v16, 0 }
 0x5dc   : > { %v17160_v55 = vpop.eup %17159  ;;  %v4620_v21 = vand.u32 4294901760, %v18853_v12  ;;  %v4615_v24 = vand.u32 4294901760, %v4614_v20  ;;  %v4572_v28 = vand.u32 4294901760, %v4499_v23 }
 0x5dd   : > { %v4011_v56 = vsel %vm3057_vm3, %v17160_v55, 0.0 }
 0x5de   : > { %4012 = vadd.xlane.f32.xlu0 %v4011_v56  ;;  %v4621_v17 = vsub.f32 %v18853_v12, %v4620_v21  ;;  %v4573_v29 = vsub.f32 %v4499_v23, %v4572_v28 }
 0x5e0   : > { %v4622_v22 = vand.u32 4294901760, %v4621_v17  ;;  %v4574_v25 = vand.u32 4294901760, %v4573_v29 }
 0x5e2   : > { %v4575_v35 = vsub.f32 %v4573_v29, %v4574_v25 }
 0x5e4   : > { %v4576_v40 = vand.u32 4294901760, %v4575_v35 }
 0x5f4   : > { %4018 = vrot.lane.b32.xlu0 %v18695_v47, %s17565_s17 }
 0x667   : > { %v4013_v57 = vpop.xlane.xlu0 %4012 }
 0x668   : > { %17161 = vrcp.f32 %v4013_v57 }
 0x66b   : > { %v4019_v3 = vpop.permute.xlu0 %4018 }
 0x66c   : > { %v4059_v19 = vand.u32 4294901760, %v4019_v3 }
 0x66e   : > { %v4141_v62 = vsub.f32 %v4019_v3, %v4059_v19  ;;  %15608 = vmatpush3.msra.mxu0 %v4059_v19 }
 0x66f   : > { %15619 = vmatprep.subr.mxu0 %v17563_v0 }
 0x670   : > { %v4142_v60 = vand.u32 4294901760, %v4141_v62 }
 0x672   : > { %v4143_v2 = vsub.f32 %v4141_v62, %v4142_v60 }
 0x674   : > { %v4144_v36 = vand.u32 4294901760, %v4143_v2 }
 0x675   : > { %v17162_v39 = vpop.eup %17161 }
 0x676   : > { %15615 = vmatpush3.msra.mxu1 %v4144_v36  ;;  %v4015_v41 = vmul.f32 %v17162_v39, %v17160_v55 }
 0x677   : > { %15626 = vmatprep.subr.mxu1 %v17563_v0 }
 0x678   : > { %v4025_v4 = vsel %vm3057_vm3, %v4015_v41, 0 }
 0x679   : > { %v4094_v5 = vand.u32 4294901760, %v4025_v4 }
 0x67b   : > { %v4095_v15 = vsub.f32 %v4025_v4, %v4094_v5  ;;  %15617 = vmatmul.mubr.f32.vlgmr.msra.gmra.mxu1 %v4094_v5 }
 0x67c   : > { %15627 = vmatpush3.msra.mxu1 %v4056_v44  ;;  %15630 = vmatprep.mubr.msk.f32.mxu1 %vm17564_vm0, %v17563_v0 }
 0x67d   : > { %15628 = vmatprep.subr.mxu1 %v17563_v0  ;;  %v4096_v18 = vand.u32 4294901760, %v4095_v15 }
 0x67e   : > { %15629 = vmatpush3.msra.mxu1 %v4059_v19 }
 0x67f   : > { %15640 = vmatprep.subr.mxu1 %v17563_v0  ;;  %15631 = vmatmul.mubr.f32.vlgmr.msra.gmra.mxu1 %v4096_v18  ;;  %v4097_v6 = vsub.f32 %v4095_v15, %v4096_v18 }
 0x680   : > { %15641 = vmatpush3.msra.mxu1 %v4056_v44  ;;  %15644 = vmatprep.mubr.msk.f32.mxu1 %vm17564_vm0, %v17563_v0 }
 0x681   : > { %15642 = vmatprep.subr.mxu1 %v17563_v0  ;;  %v4098_v11 = vand.u32 4294901760, %v4097_v6 }
 0x682   : > { %15643 = vmatpush3.msra.mxu1 %v4059_v19 }
 0x683   : > { %15654 = vmatprep.subr.mxu1 %v17563_v0  ;;  %15610 = vmatmul.mubr.f32.vlgmr.msra.gmra.mxu0 %v4098_v11 }
 0x684   : > { %15620 = vmatpush3.msra.mxu0 %v18828_v52  ;;  %15645 = vmatmul.mubr.f32.vlgmr.msra.gmra.mxu1 %v4094_v5 }
 0x685   : > { %15655 = vmatpush3.xpose.msra.mxu1 %v4615_v24  ;;  %15621 = vmatprep.subr.mxu0 %v17563_v0 }
 0x686   : > { %15622 = vmatpush3.msra.mxu0 %v4141_v62  ;;  %15623 = vmatprep.mubr.msk.f32.mxu0 %vm17564_vm0, %v17563_v0 }
 0x687   : > { %15633 = vmatprep.subr.mxu0 %v17563_v0  ;;  %15656 = vmatprep.subr.mxu1 %v17563_v0 }
 0x688   : > { %15624 = vmatmul.mubr.f32.vlgmr.msra.gmra.mxu0 %v4095_v15  ;;  %15658 = vmatprep.mubr.msk.f32.mxu1 %vm17564_vm0, %v17563_v0 }
 0x689   : > { %15634 = vmatpush3.msra.mxu0 %v4135_v32  ;;  %15657 = vmatpush3.xpose.msra.mxu1 %v4622_v22 }
 0x68a   : > { %15635 = vmatprep.subr.mxu0 %v17563_v0  ;;  %15637 = vmatprep.mubr.msk.f32.mxu0 %vm17564_vm0, %v17563_v0 }
 0x68b   : > { %15636 = vmatpush3.msra.mxu0 %v4142_v60  ;;  %15668 = vmatprep.subr.mxu1 %v17563_v0 }
 0x68c   : > { %15647 = vmatprep.subr.mxu0 %v17563_v0  ;;  %15659 = vmatmul.mubr.f32.vlgmr.msra.gmra.mxu1 %v4572_v28 }
 0x68d   : > { %15638 = vmatmul.mubr.f32.vlgmr.msra.gmra.mxu0 %v4094_v5  ;;  %15669 = vmatpush3.xpose.msra.mxu1 %v18841_v9 }
 0x68e   : > { %15648 = vmatpush3.xpose.msra.mxu0 %v18841_v9  ;;  %15670 = vmatprep.subr.mxu1 %v17563_v0 }
 0x68f   : > { %15649 = vmatprep.subr.mxu0 %v17563_v0  ;;  %15651 = vmatprep.mubr.msk.f32.mxu0 %vm17564_vm0, %v17563_v0 }
 0x690   : > { %15672 = vmatprep.mubr.msk.f32.mxu1 %vm17564_vm0, %v17563_v0 }
 0x691   : > { %15671 = vmatpush3.xpose.msra.mxu1 %v18847_v51 }
 0x692   : > { %15650 = vmatpush3.xpose.msra.mxu0 %v18847_v51  ;;  %15682 = vmatprep.subr.mxu1 %v17563_v0 }
 0x693   : > { %15661 = vmatprep.subr.mxu0 %v17563_v0 }
 0x694   : > { %15673 = vmatmul.mubr.f32.vlgmr.msra.gmra.mxu1 %v4574_v25 }
 0x695   : > { %15652 = vmatmul.mubr.f32.vlgmr.msra.gmra.mxu0 %v4576_v40  ;;  %15683 = vmatpush3.xpose.msra.mxu1 %v18841_v9 }
 0x696   : > { %15662 = vmatpush3.xpose.msra.mxu0 %v18845_v50  ;;  %15684 = vmatprep.subr.mxu1 %v17563_v0 }
 0x697   : > { %15663 = vmatprep.subr.mxu0 %v17563_v0  ;;  %15665 = vmatprep.mubr.msk.f32.mxu0 %vm17564_vm0, %v17563_v0 }
 0x698   : > { %15686 = vmatprep.mubr.msk.f32.mxu1 %vm17564_vm0, %v17563_v0 }
 0x699   : > { %15685 = vmatpush3.xpose.msra.mxu1 %v18847_v51 }
 0x69a   : > { %15664 = vmatpush3.xpose.msra.mxu0 %v18853_v12  ;;  %15696 = vmatprep.subr.mxu1 %v17563_v0 }
 0x69b   : > { %15675 = vmatprep.subr.mxu0 %v17563_v0 }
 0x69c   : > { %15687 = vmatmul.mubr.f32.vlgmr.msra.gmra.mxu1 %v4572_v28 }
 0x69d   : > { %15666 = vmatmul.mubr.f32.vlgmr.msra.gmra.mxu0 %v4573_v29  ;;  %15700 = vmatprep.mubr.msk.f32.mxu1 %vm17564_vm0, %v17563_v0 }
 0x69e   : > { %15676 = vmatpush3.xpose.msra.mxu0 %v4613_v10  ;;  %15679 = vmatprep.mubr.msk.f32.mxu0 %vm17564_vm0, %v17563_v0 }
 0x69f   : > { %15677 = vmatprep.subr.mxu0 %v17563_v0 }
 0x6a2   : > { %15678 = vmatpush3.xpose.msra.mxu0 %v4620_v21 }
 0x6a3   : > { %15689 = vmatprep.subr.mxu0 %v17563_v0 }
 0x6a5   : > { %15680 = vmatmul.mubr.f32.vlgmr.msra.gmra.mxu0 %v4572_v28 }
 0x6a6   : > { %15693 = vmatprep.mubr.msk.f32.mxu0 %vm17564_vm0, %v17563_v0 }
 0x73b   : > { %v4181_v43 = vpop.f32.mrf.mxu1 }
 0x73d   : > { %v15618_v46 = vpop.f32.mrf.mxu1 }
 0x73f   : > { %v4332_v8 = vpop.f32.mrf.mxu1 }
 0x741   : > { %v15632_v63 = vpop.f32.mrf.mxu1 }
 0x743   : > { %v4100_v26 = vpop.f32.mrf.mxu0 }
 0x744   : > { %v4182_v37 = vadd.f32 %v4181_v43, %v4100_v26  ;;  %v4482_v13 = vpop.f32.mrf.mxu1 }
 0x745   : > { %v15611_v44 = vpop.f32.mrf.mxu0 }
 0x746   : > { %v15646_v52 = vpop.f32.mrf.mxu1 }
 0x748   : > { %v4257_v32 = vpop.f32.mrf.mxu0 }
 0x749   : > { %v4258_v54 = vadd.f32 %v4257_v32, %v4182_v37 }
 0x74a   : > { %v15625_v48 = vpop.f32.mrf.mxu0 }
 0x74b   : > { %v4333_v55 = vadd.f32 %v4332_v8, %v4258_v54 }
 0x74c   : > { %v4659_v56 = vpop.f32.mrf.mxu1 }
 0x74d   : > { %v4409_v57 = vpop.f32.mrf.mxu0 }
 0x74e   : > { %v4410_v61 = vadd.f32 %v4409_v57, %v4333_v55  ;;  %v15660_v3 = vpop.f32.mrf.mxu1 }
 0x74f   : > { %v15639_v19 = vpop.f32.mrf.mxu0 }
 0x750   : > { %v18922_v62 = vadd.f32 %v4482_v13, %v4410_v61 }
 0x754   : > { %v4810_v58 = vpop.f32.mrf.mxu1 }
 0x755   : > { %v4578_v60 = vpop.f32.mrf.mxu0 }
 0x756   : > { %v15674_v1 = vpop.f32.mrf.mxu1  ;;  %v4660_v36 = vadd.f32 %v4659_v56, %v4578_v60 }
 0x757   : > { %v15653_v2 = vpop.f32.mrf.mxu0 }
 0x75c   : > { %v4960_v9 = vpop.f32.mrf.mxu1 }
 0x75d   : > { %v4735_v33 = vpop.f32.mrf.mxu0 }
 0x75e   : > { %v15688_v39 = vpop.f32.mrf.mxu1  ;;  %v4736_v50 = vadd.f32 %v4735_v33, %v4660_v36 }
 0x75f   : > { %v15667_v41 = vpop.f32.mrf.mxu0 }
 0x760   : > { %v4811_v51 = vadd.f32 %v4810_v58, %v4736_v50 }
 0x765   : > { %v4887_v4 = vpop.f32.mrf.mxu0 }
 0x766   : > { %v4888_v5 = vadd.f32 %v4887_v4, %v4811_v51 }
 0x767   : > { %v15681_v10 = vpop.f32.mrf.mxu0 }
 0x768   : > { %v4961_v12 = vadd.f32 %v4960_v9, %v4888_v5 }
 0x76a   : > { %v4964_v15 = vmul.f32 0.088388346, %v4961_v12 }
 0x76c   : > { %v4965_v16 = vsel %vm3057_vm3, %v4964_v15, -inf }
 0x76d   : > { %4966 = vmax.xlane.f32.xlu1 %v4965_v16 }
 0x77e   : > { %4978 = vrot.lane.b32.xlu1 %v18693_v45, %s17566_s8 }
 0x782   : > { %5455 = vrot.lane.b32.xlu1 %v18651_v42, %s17567_s12 }
 0x786   : > { %5453 = vrot.lane.b32.xlu1 %v18653_v49, %s17567_s12 }
 0x78a   : > { %5451 = vrot.lane.b32.xlu1 %v18644_v27, %s17567_s12 }
 0x7f6   : > { %v4967_v18 = vpop.xlane.xlu1 %4966 }
 0x7f7   : > { %v4968_v20 = vsub.f32 %v4964_v15, %v4967_v18 }
 0x7f9   : > { %v4969_v21 = vmul.f32 1.442695, %v4968_v20 }
 0x7fa   : > { %v4979_v6 = vpop.permute.xlu1 %4978 }
 0x7fb   : > { %17163 = vpow2.f32 %v4969_v21  ;;  %v5014_v23 = vand.u32 4294901760, %v4979_v6 }
 0x7fd   : > { %v18933_v11 = vsub.f32 %v4979_v6, %v5014_v23  ;;  %15690 = vmatpush3.msra.mxu0 %v5014_v23 }
 0x7fe   : > { %15691 = vmatprep.subr.mxu0 %v17563_v0  ;;  %v5456_v29 = vpop.permute.xlu1 %5455 }
 0x7ff   : > { %v5093_v24 = vand.u32 4294901760, %v18933_v11  ;;  %v5461_v43 = vsel %vm2587_vm2, %v5456_v29, 0 }
 0x800   : > { %v18946_v26 = vand.u32 4294901760, %v5461_v43 }
 0x801   : > { %v5094_v42 = vsub.f32 %v18933_v11, %v5093_v24 }
 0x802   : > { %v5454_v8 = vpop.permute.xlu1 %5453  ;;  %v18950_v32 = vsub.f32 %v5461_v43, %v18946_v26 }
 0x803   : > { %v5095_v49 = vand.u32 4294901760, %v5094_v42  ;;  %v5459_v37 = vsel %vm2587_vm2, %v5454_v8, 0 }
 0x804   : > { %v18952_v54 = vand.u32 4294901760, %v5459_v37  ;;  %v5571_v56 = vand.u32 4294901760, %v18950_v32 }
 0x805   : > { %15697 = vmatpush3.msra.mxu1 %v5095_v49 }
 0x806   : > { %15698 = vmatprep.subr.mxu1 %v17563_v0  ;;  %v18958_v57 = vsub.f32 %v5459_v37, %v18952_v54  ;;  %v5452_v3 = vpop.permute.xlu1 %5451  ;;  %v5572_v58 = vsub.f32 %v18950_v32, %v5571_v56 }
 0x807   : > { %v5457_v2 = vsel %vm2587_vm2, %v5452_v3, 0 }
 0x808   : > { %v17164_v17 = vpop.eup %17163  ;;  %v5578_v60 = vand.u32 4294901760, %v18958_v57  ;;  %v5573_v33 = vand.u32 4294901760, %v5572_v58  ;;  %v5530_v39 = vand.u32 4294901760, %v5457_v2 }
 0x809   : > { %v4971_v28 = vsel %vm3057_vm3, %v17164_v17, 0.0 }
 0x80a   : > { %4972 = vadd.xlane.f32.xlu0 %v4971_v28  ;;  %v5579_v36 = vsub.f32 %v18958_v57, %v5578_v60  ;;  %v5531_v50 = vsub.f32 %v5457_v2, %v5530_v39 }
 0x80c   : > { %v5580_v41 = vand.u32 4294901760, %v5579_v36  ;;  %v5532_v51 = vand.u32 4294901760, %v5531_v50 }
 0x80e   : > { %v5533_v4 = vsub.f32 %v5531_v50, %v5532_v51 }
 0x810   : > { %v5534_v5 = vand.u32 4294901760, %v5533_v4 }
 0x820   : > { %4976 = vrot.lane.b32.xlu0 %v18695_v47, %s17566_s8 }
 0x893   : > { %v4973_v22 = vpop.xlane.xlu0 %4972 }
 0x894   : > { %17165 = vrcp.f32 %v4973_v22 }
 0x897   : > { %v4977_v25 = vpop.permute.xlu0 %4976 }
 0x898   : > { %v5017_v35 = vand.u32 4294901760, %v4977_v25 }
 0x89a   : > { %v5099_v40 = vsub.f32 %v4977_v25, %v5017_v35  ;;  %15692 = vmatpush3.msra.mxu0 %v5017_v35 }
 0x89b   : > { %15703 = vmatprep.subr.mxu0 %v17563_v0 }
 0x89c   : > { %v5100_v46 = vand.u32 4294901760, %v5099_v40 }
 0x89e   : > { %v5101_v63 = vsub.f32 %v5099_v40, %v5100_v46 }
 0x8a0   : > { %v5102_v13 = vand.u32 4294901760, %v5101_v63 }
 0x8a1   : > { %v17166_v44 = vpop.eup %17165 }
 0x8a2   : > { %15699 = vmatpush3.msra.mxu1 %v5102_v13  ;;  %v4975_v52 = vmul.f32 %v17166_v44, %v17164_v17 }
 0x8a3   : > { %15710 = vmatprep.subr.mxu1 %v17563_v0 }
 0x8a4   : > { %v4983_v48 = vsel %vm3057_vm3, %v4975_v52, 0 }
 0x8a5   : > { %v5052_v55 = vand.u32 4294901760, %v4983_v48 }
 0x8a7   : > { %v5053_v61 = vsub.f32 %v4983_v48, %v5052_v55  ;;  %15701 = vmatmul.mubr.f32.vlgmr.msra.gmra.mxu1 %v5052_v55 }
 0x8a8   : > { %15711 = vmatpush3.msra.mxu1 %v5014_v23  ;;  %15714 = vmatprep.mubr.msk.f32.mxu1 %vm17564_vm0, %v17563_v0 }
 0x8a9   : > { %15712 = vmatprep.subr.mxu1 %v17563_v0  ;;  %v5054_v19 = vand.u32 4294901760, %v5053_v61 }
 0x8aa   : > { %15713 = vmatpush3.msra.mxu1 %v5017_v35 }
 0x8ab   : > { %15724 = vmatprep.subr.mxu1 %v17563_v0  ;;  %15715 = vmatmul.mubr.f32.vlgmr.msra.gmra.mxu1 %v5054_v19  ;;  %v5055_v1 = vsub.f32 %v5053_v61, %v5054_v19 }
 0x8ac   : > { %15725 = vmatpush3.msra.mxu1 %v5014_v23  ;;  %15728 = vmatprep.mubr.msk.f32.mxu1 %vm17564_vm0, %v17563_v0 }
 0x8ad   : > { %15726 = vmatprep.subr.mxu1 %v17563_v0  ;;  %v5056_v9 = vand.u32 4294901760, %v5055_v1 }
 0x8ae   : > { %15727 = vmatpush3.msra.mxu1 %v5017_v35 }
 0x8af   : > { %15738 = vmatprep.subr.mxu1 %v17563_v0  ;;  %15694 = vmatmul.mubr.f32.vlgmr.msra.gmra.mxu0 %v5056_v9 }
 0x8b0   : > { %15704 = vmatpush3.msra.mxu0 %v18933_v11  ;;  %15729 = vmatmul.mubr.f32.vlgmr.msra.gmra.mxu1 %v5052_v55 }
 0x8b1   : > { %15739 = vmatpush3.xpose.msra.mxu1 %v5573_v33  ;;  %15705 = vmatprep.subr.mxu0 %v17563_v0 }
 0x8b2   : > { %15706 = vmatpush3.msra.mxu0 %v5099_v40  ;;  %15707 = vmatprep.mubr.msk.f32.mxu0 %vm17564_vm0, %v17563_v0 }
 0x8b3   : > { %15717 = vmatprep.subr.mxu0 %v17563_v0  ;;  %15740 = vmatprep.subr.mxu1 %v17563_v0 }
 0x8b4   : > { %15708 = vmatmul.mubr.f32.vlgmr.msra.gmra.mxu0 %v5053_v61  ;;  %15742 = vmatprep.mubr.msk.f32.mxu1 %vm17564_vm0, %v17563_v0 }
 0x8b5   : > { %15718 = vmatpush3.msra.mxu0 %v5093_v24  ;;  %15741 = vmatpush3.xpose.msra.mxu1 %v5580_v41 }
 0x8b6   : > { %15719 = vmatprep.subr.mxu0 %v17563_v0  ;;  %15721 = vmatprep.mubr.msk.f32.mxu0 %vm17564_vm0, %v17563_v0 }
 0x8b7   : > { %15720 = vmatpush3.msra.mxu0 %v5100_v46  ;;  %15752 = vmatprep.subr.mxu1 %v17563_v0 }
 0x8b8   : > { %15731 = vmatprep.subr.mxu0 %v17563_v0  ;;  %15743 = vmatmul.mubr.f32.vlgmr.msra.gmra.mxu1 %v5530_v39 }
 0x8b9   : > { %15722 = vmatmul.mubr.f32.vlgmr.msra.gmra.mxu0 %v5052_v55  ;;  %15753 = vmatpush3.xpose.msra.mxu1 %v18946_v26 }
 0x8ba   : > { %15732 = vmatpush3.xpose.msra.mxu0 %v18946_v26  ;;  %15754 = vmatprep.subr.mxu1 %v17563_v0 }
 0x8bb   : > { %15733 = vmatprep.subr.mxu0 %v17563_v0  ;;  %15735 = vmatprep.mubr.msk.f32.mxu0 %vm17564_vm0, %v17563_v0 }
 0x8bc   : > { %15756 = vmatprep.mubr.msk.f32.mxu1 %vm17564_vm0, %v17563_v0 }
 0x8bd   : > { %15755 = vmatpush3.xpose.msra.mxu1 %v18952_v54 }
 0x8be   : > { %15734 = vmatpush3.xpose.msra.mxu0 %v18952_v54  ;;  %15766 = vmatprep.subr.mxu1 %v17563_v0 }
 0x8bf   : > { %15745 = vmatprep.subr.mxu0 %v17563_v0 }
 0x8c0   : > { %15757 = vmatmul.mubr.f32.vlgmr.msra.gmra.mxu1 %v5532_v51 }
 0x8c1   : > { %15736 = vmatmul.mubr.f32.vlgmr.msra.gmra.mxu0 %v5534_v5  ;;  %15767 = vmatpush3.xpose.msra.mxu1 %v18946_v26 }
 0x8c2   : > { %15746 = vmatpush3.xpose.msra.mxu0 %v18950_v32  ;;  %15768 = vmatprep.subr.mxu1 %v17563_v0 }
 0x8c3   : > { %15747 = vmatprep.subr.mxu0 %v17563_v0  ;;  %15749 = vmatprep.mubr.msk.f32.mxu0 %vm17564_vm0, %v17563_v0 }
 0x8c4   : > { %15770 = vmatprep.mubr.msk.f32.mxu1 %vm17564_vm0, %v17563_v0 }
 0x8c5   : > { %15769 = vmatpush3.xpose.msra.mxu1 %v18952_v54 }
 0x8c6   : > { %15748 = vmatpush3.xpose.msra.mxu0 %v18958_v57  ;;  %15780 = vmatprep.subr.mxu1 %v17563_v0 }
 0x8c7   : > { %15759 = vmatprep.subr.mxu0 %v17563_v0 }
 0x8c8   : > { %15771 = vmatmul.mubr.f32.vlgmr.msra.gmra.mxu1 %v5530_v39 }
 0x8c9   : > { %15750 = vmatmul.mubr.f32.vlgmr.msra.gmra.mxu0 %v5531_v50  ;;  %15784 = vmatprep.mubr.msk.f32.mxu1 %vm17564_vm0, %v17563_v0 }
 0x8ca   : > { %15760 = vmatpush3.xpose.msra.mxu0 %v5571_v56  ;;  %15763 = vmatprep.mubr.msk.f32.mxu0 %vm17564_vm0, %v17563_v0 }
 0x8cb   : > { %15761 = vmatprep.subr.mxu0 %v17563_v0 }
 0x8ce   : > { %15762 = vmatpush3.xpose.msra.mxu0 %v5578_v60 }
 0x8cf   : > { %15773 = vmatprep.subr.mxu0 %v17563_v0 }
 0x8d1   : > { %15764 = vmatmul.mubr.f32.vlgmr.msra.gmra.mxu0 %v5530_v39 }
 0x8d2   : > { %15777 = vmatprep.mubr.msk.f32.mxu0 %vm17564_vm0, %v17563_v0 }
 0x967   : > { %v5139_v10 = vpop.f32.mrf.mxu1 }
 0x969   : > { %v15702_v12 = vpop.f32.mrf.mxu1 }
 0x96b   : > { %v5290_v15 = vpop.f32.mrf.mxu1 }
 0x96d   : > { %v15716_v16 = vpop.f32.mrf.mxu1 }
 0x96f   : > { %v5058_v18 = vpop.f32.mrf.mxu0 }
 0x970   : > { %v5140_v20 = vadd.f32 %v5139_v10, %v5058_v18  ;;  %v5440_v21 = vpop.f32.mrf.mxu1 }
 0x971   : > { %v15695_v6 = vpop.f32.mrf.mxu0 }
 0x972   : > { %v15730_v23 = vpop.f32.mrf.mxu1 }
 0x974   : > { %v5215_v11 = vpop.f32.mrf.mxu0 }
 0x975   : > { %v5216_v24 = vadd.f32 %v5215_v11, %v5140_v20 }
 0x976   : > { %v15709_v42 = vpop.f32.mrf.mxu0 }
 0x977   : > { %v5291_v49 = vadd.f32 %v5290_v15, %v5216_v24 }
 0x978   : > { %v5617_v17 = vpop.f32.mrf.mxu1 }
 0x979   : > { %v5367_v28 = vpop.f32.mrf.mxu0 }
 0x97a   : > { %v5368_v22 = vadd.f32 %v5367_v28, %v5291_v49  ;;  %v15744_v29 = vpop.f32.mrf.mxu1  ;;  %v6425_v49 = vld [vmem:[#allocation13 + $0x78] sm:$0xff]  ;;  %v6423_v28 = vld [vmem:[#allocation13 + $0x68] sm:$0xff] }
 0x97b   : > { %v15723_v25 = vpop.f32.mrf.mxu0 }
 0x97c   : > { %v5441_v35 = vadd.f32 %v5440_v21, %v5368_v22  ;;  %v19065_v22 = vand.u32 4294901760, %v6425_v49  ;;  %v19069_v25 = vand.u32 4294901760, %v6423_v28 }
 0x980   : > { %v5768_v40 = vpop.f32.mrf.mxu1 }
 0x981   : > { %v5536_v43 = vpop.f32.mrf.mxu0 }
 0x982   : > { %v15758_v46 = vpop.f32.mrf.mxu1  ;;  %v5618_v37 = vadd.f32 %v5617_v17, %v5536_v43  ;;  %v6424_v17 = vld [vmem:[#allocation13 + $0x70] sm:$0xff] }
 0x983   : > { %v15737_v8 = vpop.f32.mrf.mxu0  ;;  %v19067_v29 = vand.u32 4294901760, %v6424_v17  ;;  %v6420_v43 = vld [vmem:[#allocation13 + $0x50] sm:$0xff] }
 0x988   : > { %v5918_v63 = vpop.f32.mrf.mxu1 }
 0x989   : > { %v5693_v26 = vpop.f32.mrf.mxu0 }
 0x98a   : > { %v15772_v13 = vpop.f32.mrf.mxu1  ;;  %v5694_v52 = vadd.f32 %v5693_v26, %v5618_v37  ;;  %v6419_v26 = vld [vmem:[#allocation13 + $0x48] sm:$0xff]  ;;  %v6418_v37 = vld [vmem:[#allocation13 + $0x40] sm:$0xff] }
 0x98b   : > { %v15751_v44 = vpop.f32.mrf.mxu0  ;;  %v19078_v13 = vsub.f32 %v6425_v49, %v19065_v22 }
 0x98c   : > { %v5769_v32 = vadd.f32 %v5768_v40, %v5694_v52  ;;  %v6421_v40 = vld [vmem:[#allocation13 + $0x58] sm:$0xff]  ;;  %v19081_v44 = vsub.f32 %v6424_v17, %v19067_v29  ;;  %v19084_v52 = vsub.f32 %v6423_v28, %v19069_v25 }
 0x98d   : > { %v19073_v8 = vand.u32 4294901760, %v6421_v40 }
 0x991   : > { %v5845_v54 = vpop.f32.mrf.mxu0 }
 0x992   : > { %v5846_v48 = vadd.f32 %v5845_v54, %v5769_v32  ;;  %v19087_v32 = vand.u32 4294901760, %v6419_v26 }
 0x993   : > { %v15765_v55 = vpop.f32.mrf.mxu0 }
 0x994   : > { %v5919_v56 = vadd.f32 %v5918_v63, %v5846_v48  ;;  %v19075_v63 = vand.u32 4294901760, %v6420_v43  ;;  %v19093_v48 = vsub.f32 %v6421_v40, %v19073_v8 }
 0x996   : > { %v5922_v57 = vmul.f32 0.088388346, %v5919_v56  ;;  %v19097_v55 = vsub.f32 %v6420_v43, %v19075_v63  ;;  %v6527_v56 = vand.u32 4294901760, %v19078_v13 }
 0x998   : > { %v5923_v61 = vsel %vm3057_vm3, %v5922_v57, -inf }
 0x999   : > { %5924 = vmax.xlane.f32.xlu0 %v5923_v61  ;;  %v6541_v61 = vand.u32 4294901760, %v19084_v52 }
 0x9af   : > { %5936 = vrot.lane.b32.xlu0 %v18693_v45, %s17567_s12 }
 0x9b3   : > { %4487 = vrot.lane.b32.xlu0 %v18922_v62, %s17567_s12 }
 0xa22   : > { %v5925_v3 = vpop.xlane.xlu0 %5924 }
 0xa23   : > { %v5926_v19 = vsub.f32 %v5922_v57, %v5925_v3  ;;  %v6534_v57 = vand.u32 4294901760, %v19081_v44  ;;  %v19103_v3 = vand.u32 4294901760, %v6418_v37 }
 0xa25   : > { %v5927_v58 = vmul.f32 1.442695, %v5926_v19 }
 0xa26   : > { %v5937_v60 = vpop.permute.xlu0 %5936 }
 0xa27   : > { %17167 = vpow2.f32 %v5927_v58  ;;  %v5972_v1 = vand.u32 4294901760, %v5937_v60  ;;  %v19108_v58 = vsub.f32 %v6419_v26, %v19087_v32  ;;  %v6415_v26 = vld [vmem:[#allocation13 + $0x28] sm:$0xff] }
 0xa29   : > { %v6050_v2 = vsub.f32 %v5937_v60, %v5972_v1  ;;  %15774 = vmatpush3.msra.mxu0 %v5972_v1  ;;  %v6528_v60 = vsub.f32 %v19078_v13, %v6527_v56 }
 0xa2a   : > { %v4488_v9 = vpop.permute.xlu0 %4487  ;;  %15775 = vmatprep.subr.mxu0 %v17563_v0 }
 0xa2b   : > { %v6051_v33 = vand.u32 4294901760, %v6050_v2  ;;  %v4490_v36 = vadd.f32 %v4488_v9, %v18644_v27  ;;  %v6555_v9 = vand.u32 4294901760, %v19093_v48 }
 0xa2d   : > { %v6052_v39 = vsub.f32 %v6050_v2, %v6051_v33  ;;  %4492 = vst.msk [vmem:[#allocation2] sm:$0xff] %vm4491_vm4, %v4490_v36  ;;  %v6417_v36 = vld [vmem:[#allocation13 + $0x38] sm:$0xff] }
 0xa2f   : > { %v6053_v45 = vand.u32 4294901760, %v6052_v39  ;;  %v6416_v39 = vld [vmem:[#allocation13 + $0x30] sm:$0xff] }
 0xa31   : > { %15781 = vmatpush3.msra.mxu1 %v6053_v45  ;;  %v6529_v45 = vand.u32 4294901760, %v6528_v60 }
 0xa32   : > { %15782 = vmatprep.subr.mxu1 %v17563_v0 }
 0xa34   : > { %v17168_v62 = vpop.eup %17167 }
 0xa35   : > { %v5929_v41 = vsel %vm3057_vm3, %v17168_v62, 0.0 }
 0xa36   : > { %5930 = vadd.xlane.f32.xlu1 %v5929_v41 }
 0xa47   : > { %5934 = vrot.lane.b32.xlu1 %v18695_v47, %s17567_s12 }
 0xa4b   : > { %5445 = vrot.lane.b32.xlu1 %v5441_v35, %s17566_s8  ;;  %v6422_v35 = vld [vmem:[#allocation13 + $0x60] sm:$0xff] }
 0xa4c   : > { %v19071_v46 = vand.u32 4294901760, %v6422_v35 }
 0xa4e   : > { %v19090_v54 = vsub.f32 %v6422_v35, %v19071_v46 }
 0xa50   : > { %v6548_v19 = vand.u32 4294901760, %v19090_v54 }
 0xa52   : > { %v6549_v41 = vsub.f32 %v19090_v54, %v6548_v19 }
 0xabf   : > { %v5931_v50 = vpop.xlane.xlu1 %5930 }
 0xac0   : > { %17169 = vrcp.f32 %v5931_v50  ;;  %v19128_v50 = vsub.f32 %v6418_v37, %v19103_v3  ;;  %v19185_v37 = vand.u32 4294901760, %v6415_v26 }
 0xac3   : > { %v5935_v51 = vpop.permute.xlu1 %5934 }
 0xac4   : > { %v5975_v4 = vand.u32 4294901760, %v5935_v51 }
 0xac6   : > { %v6057_v5 = vsub.f32 %v5935_v51, %v5975_v4  ;;  %15776 = vmatpush3.msra.mxu0 %v5975_v4  ;;  %v6569_v51 = vand.u32 4294901760, %v19108_v58 }
 0xac7   : > { %v5446_v10 = vpop.permute.xlu1 %5445  ;;  %15787 = vmatprep.subr.mxu0 %v17563_v0 }
 0xac8   : > { %v6058_v12 = vand.u32 4294901760, %v6057_v5  ;;  %v5448_v15 = vadd.f32 %v5446_v10, %v18644_v27  ;;  %v19136_v10 = vand.u32 4294901760, %v6417_v36 }
 0xaca   : > { %v6059_v16 = vsub.f32 %v6057_v5, %v6058_v12  ;;  %5450 = vst.msk [vmem:[#allocation2] sm:$0xff] %vm5449_vm5, %v5448_v15 }
 0xacc   : > { %v6060_v18 = vand.u32 4294901760, %v6059_v16  ;;  %v6550_v16 = vand.u32 4294901760, %v6549_v41 }
 0xacd   : > { %v17170_v47 = vpop.eup %17169 }
 0xace   : > { %15783 = vmatpush3.msra.mxu1 %v6060_v18  ;;  %v5933_v20 = vmul.f32 %v17170_v47, %v17168_v62  ;;  %v20959_v18 = vand.u32 4294901760, %v19128_v50  ;;  %v19147_v47 = vsub.f32 %v6417_v36, %v19136_v10 }
 0xacf   : > { %15794 = vmatprep.subr.mxu1 %v17563_v0 }
 0xad0   : > { %v5941_v21 = vsel %vm3057_vm3, %v5933_v20, 0 }
 0xad1   : > { %v6010_v6 = vand.u32 4294901760, %v5941_v21 }
 0xad3   : > { %v6011_v23 = vsub.f32 %v5941_v21, %v6010_v6  ;;  %15785 = vmatmul.mubr.f32.vlgmr.msra.gmra.mxu1 %v6010_v6 }
 0xad4   : > { %15795 = vmatpush3.msra.mxu1 %v5972_v1  ;;  %15798 = vmatprep.mubr.msk.f32.mxu1 %vm17564_vm0, %v17563_v0 }
 0xad5   : > { %15796 = vmatprep.subr.mxu1 %v17563_v0  ;;  %v6012_v11 = vand.u32 4294901760, %v6011_v23 }
 0xad6   : > { %15797 = vmatpush3.msra.mxu1 %v5975_v4 }
 0xad7   : > { %15808 = vmatprep.subr.mxu1 %v17563_v0  ;;  %15799 = vmatmul.mubr.f32.vlgmr.msra.gmra.mxu1 %v6012_v11  ;;  %v6013_v24 = vsub.f32 %v6011_v23, %v6012_v11 }
 0xad8   : > { %15809 = vmatpush3.msra.mxu1 %v5972_v1  ;;  %15812 = vmatprep.mubr.msk.f32.mxu1 %vm17564_vm0, %v17563_v0  ;;  %v6535_v1 = vsub.f32 %v19081_v44, %v6534_v57 }
 0xad9   : > { %15810 = vmatprep.subr.mxu1 %v17563_v0  ;;  %v6014_v42 = vand.u32 4294901760, %v6013_v24  ;;  %v6577_v24 = vsub.f32 %v19128_v50, %v20959_v18 }
 0xada   : > { %15811 = vmatpush3.msra.mxu1 %v5975_v4  ;;  %v6536_v62 = vand.u32 4294901760, %v6535_v1  ;;  %v6414_v1 = vld [vmem:[#allocation13 + $0x20] sm:$0xff] }
 0xadb   : > { %15778 = vmatmul.mubr.f32.vlgmr.msra.gmra.mxu0 %v6014_v42  ;;  %15813 = vmatmul.mubr.f32.vlgmr.msra.gmra.mxu1 %v6010_v6  ;;  %v6578_v28 = vand.u32 4294901760, %v6577_v24  ;;  %v19190_v36 = vand.u32 4294901760, %v6414_v1 }
 0xadc   : > { %15788 = vmatpush3.msra.mxu0 %v6050_v2  ;;  %15791 = vmatprep.mubr.msk.f32.mxu0 %vm17564_vm0, %v17563_v0  ;;  %v6542_v2 = vsub.f32 %v19084_v52, %v6541_v61 }
 0xadd   : > { %15789 = vmatprep.subr.mxu0 %v17563_v0  ;;  %15850 = vmatprep.subr.mxu1 %v17563_v0  ;;  %v19196_v41 = vsub.f32 %v6414_v1, %v19190_v36 }
 0xade   : > { %15790 = vmatpush3.msra.mxu0 %v6057_v5  ;;  %15882 = vmatprep.mubr.msk.f32.mxu1 %vm17564_vm0, %v17563_v0  ;;  %v6543_v4 = vand.u32 4294901760, %v6542_v2  ;;  %v6556_v5 = vsub.f32 %v19093_v48, %v6555_v9  ;;  %v19188_v2 = vsub.f32 %v6415_v26, %v19185_v37 }
 0xadf   : > { %15801 = vmatprep.subr.mxu0 %v17563_v0  ;;  %15792 = vmatmul.mubr.f32.vlgmr.msra.gmra.mxu0 %v6011_v23  ;;  %v20956_v23 = vand.u32 4294901760, %v19147_v47 }
 0xae0   : > { %15802 = vmatpush3.msra.mxu0 %v6051_v33  ;;  %15805 = vmatprep.mubr.msk.f32.mxu0 %vm17564_vm0, %v17563_v0  ;;  %v6562_v33 = vand.u32 4294901760, %v19097_v55  ;;  %v6557_v21 = vand.u32 4294901760, %v6556_v5 }
 0xae1   : > { %15803 = vmatprep.subr.mxu0 %v17563_v0  ;;  %15851 = vmatpush3.msra.mxu1 %v6529_v45  ;;  %v6584_v17 = vsub.f32 %v19147_v47, %v20956_v23  ;;  %v6413_v45 = vld [vmem:[#allocation13 + $0x18] sm:$0xff] }
 0xae2   : > { %15804 = vmatpush3.msra.mxu0 %v6058_v12  ;;  %v19138_v12 = vand.u32 4294901760, %v6416_v39  ;;  %15852 = vmatprep.subr.mxu1 %v17563_v0  ;;  %v6563_v15 = vsub.f32 %v19097_v55, %v6562_v33 }
 0xae3   : > { %15806 = vmatmul.mubr.f32.vlgmr.msra.gmra.mxu0 %v6010_v6  ;;  %15815 = vmatprep.subr.mxu0 %v17563_v0  ;;  %v6570_v6 = vsub.f32 %v19108_v58, %v6569_v51  ;;  %v6585_v40 = vand.u32 4294901760, %v6584_v17 }
 0xae4   : > { %15847 = vmatprep.mubr.msk.f32.mxu0 %vm17564_vm0, %v17563_v0  ;;  %15816 = vmatpush3.msra.mxu0 %v19065_v22  ;;  %v19151_v20 = vsub.f32 %v6416_v39, %v19138_v12  ;;  %v6564_v11 = vand.u32 4294901760, %v6563_v15  ;;  %v6412_v15 = vld [vmem:[#allocation13 + $0x10] sm:$0xff] }
 0xae5   : > { %15817 = vmatprep.subr.mxu0 %v17563_v0  ;;  %15853 = vmatpush3.msra.mxu1 %v6536_v62  ;;  %v6571_v49 = vand.u32 4294901760, %v6570_v6  ;;  %v20954_v62 = vand.u32 4294901760, %v19188_v2 }
 0xae6   : > { %15818 = vmatpush3.msra.mxu0 %v19067_v29  ;;  %15854 = vmatprep.subr.mxu1 %v17563_v0  ;;  %v20955_v42 = vand.u32 4294901760, %v19151_v20 }
 0xae7   : > { %15819 = vmatprep.subr.mxu0 %v17563_v0  ;;  %15855 = vmatpush3.msra.mxu1 %v6543_v4  ;;  %v19198_v4 = vand.u32 4294901760, %v6413_v45 }
 0xae8   : > { %15820 = vmatpush3.msra.mxu0 %v19069_v25  ;;  %15856 = vmatprep.subr.mxu1 %v17563_v0  ;;  %v6591_v35 = vsub.f32 %v19151_v20, %v20955_v42 }
 0xae9   : > { %15821 = vmatprep.subr.mxu0 %v17563_v0  ;;  %15857 = vmatpush3.msra.mxu1 %v6550_v16  ;;  %v6598_v16 = vsub.f32 %v19188_v2, %v20954_v62  ;;  %v19207_v6 = vsub.f32 %v6413_v45, %v19198_v4 }
 0xaea   : > { %15822 = vmatpush3.msra.mxu0 %v19071_v46  ;;  %15858 = vmatprep.subr.mxu1 %v17563_v0  ;;  %v6592_v43 = vand.u32 4294901760, %v6591_v35 }
 0xaeb   : > { %15823 = vmatprep.subr.mxu0 %v17563_v0  ;;  %15859 = vmatpush3.msra.mxu1 %v6557_v21  ;;  %v20953_v21 = vand.u32 4294901760, %v19196_v41  ;;  %v6599_v17 = vand.u32 4294901760, %v6598_v16  ;;  %v20957_v35 = vand.u32 4294901760, %v19207_v6 }
 0xaec   : > { %15824 = vmatpush3.msra.mxu0 %v19073_v8  ;;  %15860 = vmatprep.subr.mxu1 %v17563_v0 }
 0xaed   : > { %15825 = vmatprep.subr.mxu0 %v17563_v0  ;;  %15861 = vmatpush3.msra.mxu1 %v6564_v11  ;;  %v19209_v11 = vand.u32 4294901760, %v6412_v15  ;;  %v6612_v16 = vsub.f32 %v19207_v6, %v20957_v35 }
 0xaee   : > { %15826 = vmatpush3.msra.mxu0 %v19075_v63  ;;  %15862 = vmatprep.subr.mxu1 %v17563_v0 }
 0xaef   : > { %15827 = vmatprep.subr.mxu0 %v17563_v0  ;;  %15863 = vmatpush3.msra.mxu1 %v6571_v49  ;;  %v6411_v49 = vld [vmem:[#allocation13 + $0x8] sm:$0xff] }
 0xaf0   : > { %15828 = vmatpush3.msra.mxu0 %v19087_v32  ;;  %15864 = vmatprep.subr.mxu1 %v17563_v0  ;;  %v19221_v1 = vand.u32 4294901760, %v6411_v49 }
 0xaf1   : > { %15829 = vmatprep.subr.mxu0 %v17563_v0  ;;  %15865 = vmatpush3.msra.mxu1 %v6578_v28  ;;  %v6605_v28 = vsub.f32 %v19196_v41, %v20953_v21 }
 0xaf2   : > { %15830 = vmatpush3.msra.mxu0 %v19103_v3  ;;  %15866 = vmatprep.subr.mxu1 %v17563_v0  ;;  %v19230_v62 = vsub.f32 %v6411_v49, %v19221_v1 }
 0xaf3   : > { %15831 = vmatprep.subr.mxu0 %v17563_v0  ;;  %15867 = vmatpush3.msra.mxu1 %v6585_v40  ;;  %v19218_v40 = vsub.f32 %v6412_v15, %v19209_v11  ;;  %v6606_v45 = vand.u32 4294901760, %v6605_v28 }
 0xaf4   : > { %15832 = vmatpush3.msra.mxu0 %v19136_v10  ;;  %15868 = vmatprep.subr.mxu1 %v17563_v0 }
 0xaf5   : > { %15833 = vmatprep.subr.mxu0 %v17563_v0  ;;  %15869 = vmatpush3.msra.mxu1 %v6592_v43 }
 0xaf6   : > { %15834 = vmatpush3.msra.mxu0 %v19138_v12  ;;  %15870 = vmatprep.subr.mxu1 %v17563_v0 }
 0xaf7   : > { %15835 = vmatprep.subr.mxu0 %v17563_v0  ;;  %15871 = vmatpush3.msra.mxu1 %v6599_v17  ;;  %v6613_v17 = vand.u32 4294901760, %v6612_v16 }
 0xaf8   : > { %15836 = vmatpush3.msra.mxu0 %v19185_v37  ;;  %15872 = vmatprep.subr.mxu1 %v17563_v0 }
 0xaf9   : > { %15837 = vmatprep.subr.mxu0 %v17563_v0  ;;  %15873 = vmatpush3.msra.mxu1 %v6606_v45 }
 0xafa   : > { %15838 = vmatpush3.msra.mxu0 %v19190_v36  ;;  %15874 = vmatprep.subr.mxu1 %v17563_v0 }
 0xafb   : > { %15839 = vmatprep.subr.mxu0 %v17563_v0  ;;  %15875 = vmatpush3.msra.mxu1 %v6613_v17 }
 0xafc   : > { %15840 = vmatpush3.msra.mxu0 %v19198_v4  ;;  %15876 = vmatprep.subr.mxu1 %v17563_v0 }
 0xafd   : > { %15841 = vmatprep.subr.mxu0 %v17563_v0 }
 0xafe   : > { %15842 = vmatpush3.msra.mxu0 %v19209_v11 }
 0xaff   : > { %15843 = vmatprep.subr.mxu0 %v17563_v0 }
 0xb00   : > { %15844 = vmatpush3.msra.mxu0 %v19221_v1 }
 0xb01   : > { %15845 = vmatprep.subr.mxu0 %v17563_v0 }
 0xb93   : > { %v6097_v60 = vpop.f32.mrf.mxu1 }
 0xb95   : > { %v15786_v39 = vpop.f32.mrf.mxu1 }
 0xb96   : > { %v6410_v39 = vld [vmem:[#allocation13] sm:$0xff] }
 0xb97   : > { %v6248_v5 = vpop.f32.mrf.mxu1  ;;  %v19232_v42 = vand.u32 4294901760, %v6410_v39 }
 0xb99   : > { %v15800_v24 = vpop.f32.mrf.mxu1  ;;  %v19242_v49 = vsub.f32 %v6410_v39, %v19232_v42  ;;  %15846 = vmatpush3.msra.mxu0 %v19232_v42 }
 0xb9a   : > { %v20958_v24 = vand.u32 4294901760, %v19218_v40  ;;  %15885 = vmatprep.subr.mxu0 %v17563_v0 }
 0xb9b   : > { %v6016_v43 = vpop.f32.mrf.mxu0  ;;  %v6398_v26 = vpop.f32.mrf.mxu1  ;;  %v6632_v16 = vand.u32 4294901760, %v19242_v49 }
 0xb9c   : > { %v6098_v23 = vadd.f32 %v6097_v60, %v6016_v43  ;;  %v6619_v28 = vsub.f32 %v19218_v40, %v20958_v24 }
 0xb9d   : > { %v15779_v21 = vpop.f32.mrf.mxu0  ;;  %v15814_v15 = vpop.f32.mrf.mxu1 }
 0xb9e   : > { %v6625_v15 = vand.u32 4294901760, %v19230_v62  ;;  %v6620_v60 = vand.u32 4294901760, %v6619_v28 }
 0xb9f   : > { %v6173_v21 = vpop.f32.mrf.mxu0 }
 0xba0   : > { %v6174_v35 = vadd.f32 %v6173_v21, %v6098_v23  ;;  %v6626_v45 = vsub.f32 %v19230_v62, %v6625_v15  ;;  %15877 = vmatpush3.msra.mxu1 %v6620_v60  ;;  %v6633_v23 = vsub.f32 %v19242_v49, %v6632_v16 }
 0xba1   : > { %v15793_v43 = vpop.f32.mrf.mxu0  ;;  %15878 = vmatprep.subr.mxu1 %v17563_v0 }
 0xba2   : > { %v6249_v24 = vadd.f32 %v6248_v5, %v6174_v35  ;;  %v6627_v18 = vand.u32 4294901760, %v6626_v45  ;;  %v6634_v21 = vand.u32 4294901760, %v6633_v23 }
 0xba3   : > { %v6325_v39 = vpop.f32.mrf.mxu0 }
 0xba4   : > { %v6326_v17 = vadd.f32 %v6325_v39, %v6249_v24  ;;  %15879 = vmatpush3.msra.mxu1 %v6627_v18  ;;  %v21016_v39 = vand.u32 4294901760, %v19196_v41 }
 0xba5   : > { %v15807_v28 = vpop.f32.mrf.mxu0  ;;  %15880 = vmatprep.subr.mxu1 %v17563_v0 }
 0xba6   : > { %v6399_v43 = vadd.f32 %v6398_v26, %v6326_v17  ;;  %15881 = vmatpush3.msra.mxu1 %v6634_v21  ;;  %v21017_v21 = vand.u32 4294901760, %v19207_v6 }
 0xba7   : > { %15920 = vmatprep.subr.mxu1 %v17563_v0 }
 0xba8   : > { %6403 = vrot.lane.b32.xlu0 %v6399_v43, %s17565_s17 }
 0xc1a   : > { %v6404_v5 = vpop.permute.xlu0 %6403 }
 0xc1b   : > { %v6406_v35 = vadd.f32 %v6404_v5, %v18644_v27 }
 0xc1d   : > { %6408 = vst.msk [vmem:[#allocation2] sm:$0xff] %vm6407_vm6, %v6406_v35 }
 0xc24   : > { %v19260_v60 = vld [vmem:[#allocation2] sm:$0xff] }
 0xc25   : > { %v19263_v24 = vand.u32 4294901760, %v19260_v60 }
 0xc27   : > { %v19267_v18 = vsub.f32 %v19260_v60, %v19263_v24  ;;  %15883 = vmatmul.mubr.f32.vlgmr.msra.gmra.mxu1 %v19263_v24 }
 0xc28   : > { %15921 = vmatpush3.msra.mxu1 %v19065_v22  ;;  %15952 = vmatprep.mubr.msk.f32.mxu1 %vm17564_vm0, %v17563_v0 }
 0xc29   : > { %15922 = vmatprep.subr.mxu1 %v17563_v0  ;;  %v6516_v27 = vand.u32 4294901760, %v19267_v18 }
 0xc2a   : > { %15923 = vmatpush3.msra.mxu1 %v19067_v29 }
 0xc2b   : > { %15924 = vmatprep.subr.mxu1 %v17563_v0  ;;  %v6517_v26 = vsub.f32 %v19267_v18, %v6516_v27 }
 0xc2c   : > { %15925 = vmatpush3.msra.mxu1 %v19069_v25 }
 0xc2d   : > { %15926 = vmatprep.subr.mxu1 %v17563_v0  ;;  %v6518_v45 = vand.u32 4294901760, %v6517_v26 }
 0xc2e   : > { %15927 = vmatpush3.msra.mxu1 %v19071_v46 }
 0xc2f   : > { %15928 = vmatprep.subr.mxu1 %v17563_v0  ;;  %15848 = vmatmul.mubr.f32.vlgmr.msra.gmra.mxu0 %v6518_v45 }
 0xc30   : > { %15886 = vmatpush3.msra.mxu0 %v19078_v13  ;;  %15929 = vmatpush3.msra.mxu1 %v19073_v8 }
 0xc31   : > { %15887 = vmatprep.subr.mxu0 %v17563_v0  ;;  %15930 = vmatprep.subr.mxu1 %v17563_v0 }
 0xc32   : > { %15888 = vmatpush3.msra.mxu0 %v19081_v44  ;;  %15931 = vmatpush3.msra.mxu1 %v19075_v63  ;;  %v7080_v44 = vld [vmem:[#allocation15 + $0x20] sm:$0xff] }
 0xc33   : > { %15889 = vmatprep.subr.mxu0 %v17563_v0  ;;  %15932 = vmatprep.subr.mxu1 %v17563_v0 }
 0xc34   : > { %15890 = vmatpush3.msra.mxu0 %v19084_v52  ;;  %15933 = vmatpush3.msra.mxu1 %v19087_v32 }
 0xc35   : > { %15891 = vmatprep.subr.mxu0 %v17563_v0  ;;  %15934 = vmatprep.subr.mxu1 %v17563_v0 }
 0xc36   : > { %15892 = vmatpush3.msra.mxu0 %v19090_v54  ;;  %15935 = vmatpush3.msra.mxu1 %v19103_v3  ;;  %v19395_v54 = vand.u32 4294901760, %v7080_v44 }
 0xc37   : > { %15893 = vmatprep.subr.mxu0 %v17563_v0  ;;  %15936 = vmatprep.subr.mxu1 %v17563_v0 }
 0xc38   : > { %15894 = vmatpush3.msra.mxu0 %v19093_v48  ;;  %15937 = vmatpush3.msra.mxu1 %v19136_v10  ;;  %v21012_v48 = vand.u32 4294901760, %v19128_v50 }
 0xc39   : > { %15895 = vmatprep.subr.mxu0 %v17563_v0  ;;  %15938 = vmatprep.subr.mxu1 %v17563_v0 }
 0xc3a   : > { %15896 = vmatpush3.msra.mxu0 %v19097_v55  ;;  %15939 = vmatpush3.msra.mxu1 %v19138_v12 }
 0xc3b   : > { %15897 = vmatprep.subr.mxu0 %v17563_v0  ;;  %15940 = vmatprep.subr.mxu1 %v17563_v0 }
 0xc3c   : > { %15898 = vmatpush3.msra.mxu0 %v19108_v58  ;;  %15941 = vmatpush3.msra.mxu1 %v19185_v37  ;;  %v7077_v58 = vld [vmem:[#allocation15 + $0x8] sm:$0xff] }
 0xc3d   : > { %15899 = vmatprep.subr.mxu0 %v17563_v0  ;;  %15942 = vmatprep.subr.mxu1 %v17563_v0 }
 0xc3e   : > { %15900 = vmatpush3.msra.mxu0 %v19128_v50  ;;  %15943 = vmatpush3.msra.mxu1 %v19190_v36  ;;  %v21014_v50 = vand.u32 4294901760, %v19151_v20 }
 0xc3f   : > { %15901 = vmatprep.subr.mxu0 %v17563_v0  ;;  %15944 = vmatprep.subr.mxu1 %v17563_v0 }
 0xc40   : > { %15902 = vmatpush3.msra.mxu0 %v19147_v47  ;;  %15945 = vmatpush3.msra.mxu1 %v19198_v4 }
 0xc41   : > { %15903 = vmatprep.subr.mxu0 %v17563_v0  ;;  %15946 = vmatprep.subr.mxu1 %v17563_v0 }
 0xc42   : > { %15904 = vmatpush3.msra.mxu0 %v19151_v20  ;;  %15947 = vmatpush3.msra.mxu1 %v19209_v11  ;;  %v21015_v20 = vand.u32 4294901760, %v19188_v2 }
 0xc43   : > { %15905 = vmatprep.subr.mxu0 %v17563_v0  ;;  %15948 = vmatprep.subr.mxu1 %v17563_v0 }
 0xc44   : > { %15906 = vmatpush3.msra.mxu0 %v19188_v2  ;;  %15949 = vmatpush3.msra.mxu1 %v19221_v1 }
 0xc45   : > { %15907 = vmatprep.subr.mxu0 %v17563_v0  ;;  %15950 = vmatprep.subr.mxu1 %v17563_v0 }
 0xc46   : > { %15908 = vmatpush3.msra.mxu0 %v19196_v41  ;;  %15951 = vmatpush3.msra.mxu1 %v19232_v42 }
 0xc47   : > { %15909 = vmatprep.subr.mxu0 %v17563_v0  ;;  %15953 = vmatmul.mubr.f32.vlgmr.msra.gmra.mxu1 %v6516_v27 }
 0xc48   : > { %15990 = vmatprep.subr.mxu1 %v17563_v0  ;;  %15910 = vmatpush3.msra.mxu0 %v19207_v6 }
 0xc49   : > { %15991 = vmatpush3.msra.mxu1 %v19065_v22  ;;  %15911 = vmatprep.subr.mxu0 %v17563_v0  ;;  %v7083_v22 = vld [vmem:[#allocation15 + $0x38] sm:$0xff] }
 0xc4a   : > { %15992 = vmatprep.subr.mxu1 %v17563_v0  ;;  %15912 = vmatpush3.msra.mxu0 %v19218_v40 }
 0xc4b   : > { %15993 = vmatpush3.msra.mxu1 %v19067_v29  ;;  %15913 = vmatprep.subr.mxu0 %v17563_v0  ;;  %v7082_v29 = vld [vmem:[#allocation15 + $0x30] sm:$0xff] }
 0xc4c   : > { %15994 = vmatprep.subr.mxu1 %v17563_v0  ;;  %15914 = vmatpush3.msra.mxu0 %v19230_v62 }
 0xc4d   : > { %15995 = vmatpush3.msra.mxu1 %v19069_v25  ;;  %15915 = vmatprep.subr.mxu0 %v17563_v0  ;;  %v19366_v25 = vand.u32 4294901760, %v7083_v22 }
 0xc4e   : > { %15996 = vmatprep.subr.mxu1 %v17563_v0  ;;  %15916 = vmatpush3.msra.mxu0 %v19242_v49 }
 0xc4f   : > { %15917 = vmatprep.mubr.msk.f32.mxu0 %vm17564_vm0, %v17563_v0  ;;  %15997 = vmatpush3.msra.mxu1 %v19071_v46  ;;  %v7081_v46 = vld [vmem:[#allocation15 + $0x28] sm:$0xff] }
 0xc50   : > { %15918 = vmatmul.mubr.f32.vlgmr.msra.gmra.mxu0 %v19267_v18  ;;  %15955 = vmatprep.subr.mxu0 %v17563_v0  ;;  %v19383_v13 = vand.u32 4294901760, %v7081_v46  ;;  %v21018_v18 = vand.u32 4294901760, %v19218_v40 }
 0xc51   : > { %15998 = vmatprep.subr.mxu1 %v17563_v0  ;;  %15956 = vmatpush3.msra.mxu0 %v6527_v56 }
 0xc52   : > { %15999 = vmatpush3.msra.mxu1 %v19073_v8  ;;  %15957 = vmatprep.subr.mxu0 %v17563_v0  ;;  %v19373_v8 = vand.u32 4294901760, %v7082_v29  ;;  %v19404_v56 = vsub.f32 %v7081_v46, %v19383_v13 }
 0xc53   : > { %16000 = vmatprep.subr.mxu1 %v17563_v0  ;;  %15958 = vmatpush3.msra.mxu0 %v6534_v57  ;;  %v7078_v57 = vld [vmem:[#allocation15 + $0x10] sm:$0xff] }
 0xc54   : > { %16001 = vmatpush3.msra.mxu1 %v19075_v63  ;;  %15959 = vmatprep.subr.mxu0 %v17563_v0  ;;  %v19381_v63 = vsub.f32 %v7083_v22, %v19366_v25  ;;  %v19391_v52 = vsub.f32 %v7082_v29, %v19373_v8  ;;  %v7684_v29 = vld [vmem:[#allocation16 + $0x68] sm:$0xff] }
 0xc55   : > { %16002 = vmatprep.subr.mxu1 %v17563_v0  ;;  %15960 = vmatpush3.msra.mxu0 %v6541_v61 }
 0xc56   : > { %16003 = vmatpush3.msra.mxu1 %v19087_v32  ;;  %15961 = vmatprep.subr.mxu0 %v17563_v0  ;;  %v7079_v32 = vld [vmem:[#allocation15 + $0x18] sm:$0xff]  ;;  %v19401_v55 = vand.u32 4294901760, %v19381_v63 }
 0xc57   : > { %16004 = vmatprep.subr.mxu1 %v17563_v0  ;;  %15962 = vmatpush3.msra.mxu0 %v6548_v19  ;;  %v19408_v61 = vand.u32 4294901760, %v7079_v32  ;;  %v19414_v19 = vand.u32 4294901760, %v19391_v52 }
 0xc58   : > { %16005 = vmatpush3.msra.mxu1 %v19103_v3  ;;  %15963 = vmatprep.subr.mxu0 %v17563_v0  ;;  %v21013_v3 = vand.u32 4294901760, %v19147_v47  ;;  %v19436_v47 = vand.u32 4294901760, %v7077_v58 }
 0xc59   : > { %16006 = vmatprep.subr.mxu1 %v17563_v0  ;;  %15964 = vmatpush3.msra.mxu0 %v6555_v9  ;;  %v19419_v9 = vsub.f32 %v7080_v44, %v19395_v54  ;;  %v7682_v44 = vld [vmem:[#allocation16 + $0x58] sm:$0xff] }
 0xc5a   : > { %16007 = vmatpush3.msra.mxu1 %v19136_v10  ;;  %15965 = vmatprep.subr.mxu0 %v17563_v0  ;;  %v19429_v10 = vand.u32 4294901760, %v19404_v56  ;;  %v19465_v28 = vsub.f32 %v7077_v58, %v19436_v47 }
 0xc5b   : > { %16008 = vmatprep.subr.mxu1 %v17563_v0  ;;  %15966 = vmatpush3.msra.mxu0 %v6562_v33  ;;  %v19421_v33 = vand.u32 4294901760, %v7078_v57 }
 0xc5c   : > { %16009 = vmatpush3.msra.mxu1 %v19138_v12  ;;  %15967 = vmatprep.subr.mxu0 %v17563_v0  ;;  %v19434_v12 = vsub.f32 %v7079_v32, %v19408_v61  ;;  %v7218_v23 = vsub.f32 %v19404_v56, %v19429_v10  ;;  %v19487_v27 = vand.u32 4294901760, %v19465_v28 }
 0xc5d   : > { %16010 = vmatprep.subr.mxu1 %v17563_v0  ;;  %15968 = vmatpush3.msra.mxu0 %v6569_v51  ;;  %v7204_v51 = vsub.f32 %v19381_v63, %v19401_v55 }
 0xc5e   : > { %16011 = vmatpush3.msra.mxu1 %v19185_v37  ;;  %15969 = vmatprep.subr.mxu0 %v17563_v0  ;;  %v7076_v37 = vld [vmem:[#allocation15] sm:$0xff]  ;;  %v7219_v5 = vand.u32 4294901760, %v7218_v23  ;;  %v7246_v62 = vsub.f32 %v19465_v28, %v19487_v27  ;;  %v7677_v23 = vld [vmem:[#allocation16 + $0x30] sm:$0xff] }
 0xc5f   : > { %16012 = vmatprep.subr.mxu1 %v17563_v0  ;;  %15970 = vmatpush3.msra.mxu0 %v21012_v48  ;;  %v7205_v2 = vand.u32 4294901760, %v7204_v51  ;;  %v19456_v17 = vand.u32 4294901760, %v7076_v37  ;;  %v19594_v48 = vand.u32 4294901760, %v7682_v44  ;;  %v7679_v51 = vld [vmem:[#allocation16 + $0x40] sm:$0xff] }
 0xc60   : > { %16013 = vmatpush3.msra.mxu1 %v19190_v36  ;;  %15971 = vmatprep.subr.mxu0 %v17563_v0  ;;  %v7211_v36 = vsub.f32 %v19391_v52, %v19414_v19 }
 0xc61   : > { %16014 = vmatprep.subr.mxu1 %v17563_v0  ;;  %15972 = vmatpush3.msra.mxu0 %v21013_v3  ;;  %v19480_v35 = vsub.f32 %v7076_v37, %v19456_v17  ;;  %v19617_v58 = vsub.f32 %v7682_v44, %v19594_v48 }
 0xc62   : > { %16015 = vmatpush3.msra.mxu1 %v19198_v4  ;;  %15973 = vmatprep.subr.mxu0 %v17563_v0  ;;  %v19446_v4 = vand.u32 4294901760, %v19419_v9  ;;  %v7212_v41 = vand.u32 4294901760, %v7211_v36  ;;  %v7678_v36 = vld [vmem:[#allocation16 + $0x38] sm:$0xff] }
 0xc63   : > { %16016 = vmatprep.subr.mxu1 %v17563_v0  ;;  %15974 = vmatpush3.msra.mxu0 %v21014_v50  ;;  %v19496_v40 = vand.u32 4294901760, %v19480_v35 }
 0xc64   : > { %16017 = vmatpush3.msra.mxu1 %v19209_v11  ;;  %15975 = vmatprep.subr.mxu0 %v17563_v0  ;;  %v19449_v11 = vsub.f32 %v7078_v57, %v19421_v33 }
 0xc65   : > { %16018 = vmatprep.subr.mxu1 %v17563_v0  ;;  %15976 = vmatpush3.msra.mxu0 %v21015_v20  ;;  %v7253_v49 = vsub.f32 %v19480_v35, %v19496_v40  ;;  %v7816_v20 = vand.u32 4294901760, %v19617_v58 }
 0xc66   : > { %16019 = vmatpush3.msra.mxu1 %v19221_v1  ;;  %15977 = vmatprep.subr.mxu0 %v17563_v0  ;;  %v19462_v1 = vand.u32 4294901760, %v19434_v12  ;;  %v19476_v43 = vand.u32 4294901760, %v19449_v11 }
 0xc67   : > { %16020 = vmatprep.subr.mxu1 %v17563_v0  ;;  %15978 = vmatpush3.msra.mxu0 %v21016_v39 }
 0xc68   : > { %16021 = vmatpush3.msra.mxu1 %v19232_v42  ;;  %16022 = vmatprep.mubr.msk.f32.mxu1 %vm17564_vm0, %v17563_v0  ;;  %v7225_v42 = vsub.f32 %v19419_v9, %v19446_v4  ;;  %v7232_v6 = vsub.f32 %v19434_v12, %v19462_v1  ;;  %v7239_v45 = vsub.f32 %v19449_v11, %v19476_v43 }
 0xc69   : > { %15979 = vmatprep.subr.mxu0 %v17563_v0  ;;  %16023 = vmatmul.mubr.f32.vlgmr.msra.gmra.mxu1 %v19263_v24 }
 0xc6a   : > { %15980 = vmatpush3.msra.mxu0 %v21017_v21  ;;  %15987 = vmatprep.mubr.msk.f32.mxu0 %vm17564_vm0, %v17563_v0  ;;  %v7226_v26 = vand.u32 4294901760, %v7225_v42  ;;  %v7233_v22 = vand.u32 4294901760, %v7232_v6  ;;  %v7676_v21 = vld [vmem:[#allocation16 + $0x28] sm:$0xff] }
 0xc6b   : > { %15981 = vmatprep.subr.mxu0 %v17563_v0  ;;  %16044 = vmatprep.subr.mxu1 %v7205_v2 }
 0xc6c   : > { %15982 = vmatpush3.msra.mxu0 %v21018_v18  ;;  %16045 = vmatpush3.msra.mxu1 %v7205_v2  ;;  %v7675_v18 = vld [vmem:[#allocation16 + $0x20] sm:$0xff] }
 0xc6d   : > { %15983 = vmatprep.subr.mxu0 %v17563_v0  ;;  %16046 = vmatprep.subr.mxu1 %v7212_v41 }
 0xc6e   : > { %15984 = vmatpush3.msra.mxu0 %v6625_v15  ;;  %16047 = vmatpush3.msra.mxu1 %v7212_v41  ;;  %v7240_v15 = vand.u32 4294901760, %v7239_v45 }
 0xc6f   : > { %15985 = vmatprep.subr.mxu0 %v17563_v0  ;;  %16048 = vmatprep.subr.mxu1 %v7219_v5 }
 0xc70   : > { %15986 = vmatpush3.msra.mxu0 %v6632_v16  ;;  %16049 = vmatpush3.msra.mxu1 %v7219_v5  ;;  %v7247_v16 = vand.u32 4294901760, %v7246_v62 }
 0xc71   : > { %15988 = vmatmul.mubr.f32.vlgmr.msra.gmra.mxu0 %v19263_v24  ;;  %16025 = vmatprep.subr.mxu0 %v19366_v25  ;;  %v7254_v24 = vand.u32 4294901760, %v7253_v49 }
 0xc72   : > { %16026 = vmatpush3.msra.mxu0 %v19366_v25  ;;  %16050 = vmatprep.subr.mxu1 %v7226_v26 }
 0xc73   : > { %16027 = vmatprep.subr.mxu0 %v19373_v8  ;;  %16051 = vmatpush3.msra.mxu1 %v7226_v26 }
 0xc74   : > { %16028 = vmatpush3.msra.mxu0 %v19373_v8  ;;  %16052 = vmatprep.subr.mxu1 %v7233_v22 }
 0xc75   : > { %16029 = vmatprep.subr.mxu0 %v19383_v13  ;;  %16053 = vmatpush3.msra.mxu1 %v7233_v22  ;;  %v7674_v22 = vld [vmem:[#allocation16 + $0x18] sm:$0xff] }
 0xc76   : > { %16030 = vmatpush3.msra.mxu0 %v19383_v13  ;;  %16054 = vmatprep.subr.mxu1 %v7240_v15  ;;  %v19694_v62 = vand.u32 4294901760, %v7674_v22 }
 0xc77   : > { %16031 = vmatprep.subr.mxu0 %v19395_v54  ;;  %16055 = vmatpush3.msra.mxu1 %v7240_v15 }
 0xc78   : > { %16032 = vmatpush3.msra.mxu0 %v19395_v54  ;;  %16056 = vmatprep.subr.mxu1 %v7247_v16 }
 0xc79   : > { %16033 = vmatprep.subr.mxu0 %v19408_v61  ;;  %16057 = vmatpush3.msra.mxu1 %v7247_v16 }
 0xc7a   : > { %16034 = vmatpush3.msra.mxu0 %v19408_v61  ;;  %16041 = vmatprep.mubr.f32.mxu0 %v18391_v7  ;;  %v7686_v7 = vld [vmem:[#allocation16 + $0x78] sm:$0xff] }
 0xc7b   : > { %16035 = vmatprep.subr.mxu0 %v19421_v33  ;;  %16058 = vmatprep.subr.mxu1 %v7254_v24 }
 0xc7c   : > { %16036 = vmatpush3.msra.mxu0 %v19421_v33  ;;  %16059 = vmatpush3.msra.mxu1 %v7254_v24 }
 0xc7d   : > { %16037 = vmatprep.subr.mxu0 %v19436_v47  ;;  %16060 = vmatprep.mubr.f32.mxu1 %v18287_v30 }
 0xc7e   : > { %16038 = vmatpush3.msra.mxu0 %v19436_v47  ;;  %16082 = vmatprep.subr.mxu1 %v19366_v25 }
 0xc7f   : > { %16039 = vmatprep.subr.mxu0 %v19456_v17  ;;  %16061 = vmatmul.mubr.f32.vlgmr.msra.gmra.mxu1 %v18293_v34 }
 0xc80   : > { %16040 = vmatpush3.msra.mxu0 %v19456_v17  ;;  %16083 = vmatpush3.msra.mxu1 %v19366_v25 }
 0xc81   : > { %16063 = vmatprep.subr.mxu0 %v19381_v63  ;;  %16042 = vmatmul.mubr.f32.vlgmr.msra.gmra.mxu0 %v18394_v14  ;;  %v19562_v14 = vand.u32 4294901760, %v7686_v7 }
 0xc82   : > { %16064 = vmatpush3.msra.mxu0 %v19381_v63  ;;  %16084 = vmatprep.subr.mxu1 %v19373_v8  ;;  %v19575_v63 = vand.u32 4294901760, %v7684_v29 }
 0xc83   : > { %16065 = vmatprep.subr.mxu0 %v19391_v52  ;;  %16085 = vmatpush3.msra.mxu1 %v19373_v8 }
 0xc84   : > { %16066 = vmatpush3.msra.mxu0 %v19391_v52  ;;  %16086 = vmatprep.subr.mxu1 %v19383_v13  ;;  %v7681_v52 = vld [vmem:[#allocation16 + $0x50] sm:$0xff] }
 0xc85   : > { %16067 = vmatprep.subr.mxu0 %v19404_v56  ;;  %16087 = vmatpush3.msra.mxu1 %v19383_v13  ;;  %v19604_v57 = vand.u32 4294901760, %v7681_v52 }
 0xc86   : > { %16068 = vmatpush3.msra.mxu0 %v19404_v56  ;;  %16088 = vmatprep.subr.mxu1 %v19395_v54 }
 0xc87   : > { %16069 = vmatprep.subr.mxu0 %v19419_v9  ;;  %16089 = vmatpush3.msra.mxu1 %v19395_v54  ;;  %v19628_v50 = vsub.f32 %v7681_v52, %v19604_v57  ;;  %v19714_v52 = vsub.f32 %v7674_v22, %v19694_v62 }
 0xc88   : > { %16070 = vmatpush3.msra.mxu0 %v19419_v9  ;;  %16090 = vmatprep.subr.mxu1 %v19408_v61 }
 0xc89   : > { %16071 = vmatprep.subr.mxu0 %v19434_v12  ;;  %16091 = vmatpush3.msra.mxu1 %v19408_v61  ;;  %v7823_v39 = vand.u32 4294901760, %v19628_v50 }
 0xc8a   : > { %16072 = vmatpush3.msra.mxu0 %v19434_v12  ;;  %16092 = vmatprep.subr.mxu1 %v19421_v33 }
 0xc8b   : > { %16073 = vmatprep.subr.mxu0 %v19449_v11  ;;  %16093 = vmatpush3.msra.mxu1 %v19421_v33 }
 0xc8c   : > { %16074 = vmatpush3.msra.mxu0 %v19449_v11  ;;  %16094 = vmatprep.subr.mxu1 %v19436_v47 }
 0xc8d   : > { %16075 = vmatprep.subr.mxu0 %v19465_v28  ;;  %16095 = vmatpush3.msra.mxu1 %v19436_v47 }
 0xc8e   : > { %16076 = vmatpush3.msra.mxu0 %v19465_v28  ;;  %16079 = vmatprep.mubr.f32.mxu0 %v18315_v53  ;;  %v7685_v53 = vld [vmem:[#allocation16 + $0x70] sm:$0xff]  ;;  %v7817_v28 = vsub.f32 %v19617_v58, %v7816_v20 }
 0xc8f   : > { %16077 = vmatprep.subr.mxu0 %v19480_v35  ;;  %16096 = vmatprep.subr.mxu1 %v19456_v17  ;;  %v19566_v46 = vand.u32 4294901760, %v7685_v53 }
 0xc90   : > { %16078 = vmatpush3.msra.mxu0 %v19480_v35  ;;  %16097 = vmatpush3.msra.mxu1 %v19456_v17 }
 0xc91   : > { %16101 = vmatprep.subr.mxu0 %v19401_v55  ;;  %16080 = vmatmul.mubr.f32.vlgmr.msra.gmra.mxu0 %v18325_v59  ;;  %v7683_v59 = vld [vmem:[#allocation16 + $0x60] sm:$0xff] }
 0xc92   : > { %16102 = vmatpush3.msra.mxu0 %v19401_v55  ;;  %16098 = vmatprep.mubr.f32.mxu1 %v18346_v31  ;;  %v19573_v31 = vsub.f32 %v7686_v7, %v19562_v14  ;;  %v7680_v55 = vld [vmem:[#allocation16 + $0x48] sm:$0xff]  ;;  %v7673_v7 = vld [vmem:[#allocation16 + $0x10] sm:$0xff] }
 0xc93   : > { %16103 = vmatprep.subr.mxu0 %v19414_v19  ;;  %16120 = vmatprep.subr.mxu1 %v19366_v25  ;;  %v19608_v3 = vand.u32 4294901760, %v7680_v55 }
 0xc94   : > { %16099 = vmatmul.mubr.f32.vlgmr.msra.gmra.mxu1 %v18354_v38  ;;  %16104 = vmatpush3.msra.mxu0 %v19414_v19  ;;  %v19582_v38 = vsub.f32 %v7685_v53, %v19566_v46  ;;  %v7788_v32 = vand.u32 4294901760, %v19573_v31  ;;  %v19706_v53 = vand.u32 4294901760, %v7673_v7 }
 0xc95   : > { %16121 = vmatpush3.msra.mxu1 %v19366_v25  ;;  %16105 = vmatprep.subr.mxu0 %v19429_v10  ;;  %v19584_v25 = vand.u32 4294901760, %v7683_v59 }
 0xc96   : > { %16122 = vmatprep.subr.mxu1 %v19373_v8  ;;  %16106 = vmatpush3.msra.mxu0 %v19429_v10  ;;  %v19633_v10 = vsub.f32 %v7680_v55, %v19608_v3  ;;  %v7672_v55 = vld [vmem:[#allocation16 + $0x8] sm:$0xff] }
 0xc97   : > { %16123 = vmatpush3.msra.mxu1 %v19373_v8  ;;  %16107 = vmatprep.subr.mxu0 %v19446_v4  ;;  %v19592_v8 = vsub.f32 %v7684_v29, %v19575_v63  ;;  %v19602_v56 = vsub.f32 %v7683_v59, %v19584_v25 }
 0xc98   : > { %16124 = vmatprep.subr.mxu1 %v19383_v13  ;;  %16108 = vmatpush3.msra.mxu0 %v19446_v4  ;;  %v19645_v4 = vand.u32 4294901760, %v7678_v36 }
 0xc99   : > { %16125 = vmatpush3.msra.mxu1 %v19383_v13  ;;  %16109 = vmatprep.subr.mxu0 %v19462_v1  ;;  %v7795_v13 = vand.u32 4294901760, %v19582_v38  ;;  %v7802_v19 = vand.u32 4294901760, %v19592_v8  ;;  %v7809_v9 = vand.u32 4294901760, %v19602_v56 }
 0xc9a   : > { %16126 = vmatprep.subr.mxu1 %v19395_v54  ;;  %16110 = vmatpush3.msra.mxu0 %v19462_v1  ;;  %v7830_v1 = vand.u32 4294901760, %v19633_v10  ;;  %v19666_v41 = vsub.f32 %v7678_v36, %v19645_v4  ;;  %v7671_v36 = vld [vmem:[#allocation16] sm:$0xff] }
 0xc9b   : > { %16127 = vmatpush3.msra.mxu1 %v19395_v54  ;;  %16111 = vmatprep.subr.mxu0 %v19476_v43  ;;  %v7789_v54 = vsub.f32 %v19573_v31, %v7788_v32  ;;  %v7803_v37 = vsub.f32 %v19592_v8, %v7802_v19 }
 0xc9c   : > { %16128 = vmatprep.subr.mxu1 %v19408_v61  ;;  %16112 = vmatpush3.msra.mxu0 %v19476_v43  ;;  %v7824_v43 = vsub.f32 %v19628_v50, %v7823_v39  ;;  %v7831_v6 = vsub.f32 %v19633_v10, %v7830_v1  ;;  %v7844_v26 = vand.u32 4294901760, %v19666_v41 }
 0xc9d   : > { %16129 = vmatpush3.msra.mxu1 %v19408_v61  ;;  %16113 = vmatprep.subr.mxu0 %v19487_v27  ;;  %v7796_v61 = vsub.f32 %v19582_v38, %v7795_v13  ;;  %v7790_v12 = vand.u32 4294901760, %v7789_v54  ;;  %v19718_v54 = vand.u32 4294901760, %v7672_v55 }
 0xc9e   : > { %16130 = vmatprep.subr.mxu1 %v19421_v33  ;;  %16114 = vmatpush3.msra.mxu0 %v19487_v27  ;;  %v7818_v27 = vand.u32 4294901760, %v7817_v28  ;;  %v7825_v15 = vand.u32 4294901760, %v7824_v43  ;;  %v7832_v29 = vand.u32 4294901760, %v7831_v6  ;;  %v7845_v59 = vsub.f32 %v19666_v41, %v7844_v26 }
 0xc9f   : > { %16131 = vmatpush3.msra.mxu1 %v19421_v33  ;;  %16115 = vmatprep.subr.mxu0 %v19496_v40  ;;  %v19635_v33 = vand.u32 4294901760, %v7679_v51  ;;  %v7797_v11 = vand.u32 4294901760, %v7796_v61  ;;  %v19738_v28 = vsub.f32 %v7672_v55, %v19718_v54 }
 0xca0   : > { %16132 = vmatprep.subr.mxu1 %v19436_v47  ;;  %16116 = vmatpush3.msra.mxu0 %v19496_v40  ;;  %v19690_v40 = vand.u32 4294901760, %v7675_v18 }
 0xca1   : > { %16117 = vmatprep.mubr.f32.mxu0 %v18287_v30  ;;  %16133 = vmatpush3.msra.mxu1 %v19436_v47  ;;  %v7810_v47 = vsub.f32 %v19602_v56, %v7809_v9  ;;  %v19654_v2 = vsub.f32 %v7679_v51, %v19635_v33  ;;  %v20961_v22 = vand.u32 4294901760, %v19738_v28 }
 0xca2   : > { %16118 = vmatmul.mubr.f32.vlgmr.msra.gmra.mxu0 %v18293_v34  ;;  %16134 = vmatprep.subr.mxu1 %v19456_v17  ;;  %v19702_v24 = vsub.f32 %v7675_v18, %v19690_v40 }
 0xca3   : > { %16135 = vmatpush3.msra.mxu1 %v19456_v17  ;;  %16136 = vmatprep.mubr.f32.mxu1 %v18287_v30  ;;  %v19659_v17 = vand.u32 4294901760, %v7677_v23  ;;  %v7804_v30 = vand.u32 4294901760, %v7803_v37  ;;  %v7811_v42 = vand.u32 4294901760, %v7810_v47  ;;  %v7837_v5 = vand.u32 4294901760, %v19654_v2 }
 0xca4   : > { %16137 = vmatmul.mubr.f32.vlgmr.msra.gmra.mxu1 %v18293_v34  ;;  %16174 = vmatprep.subr.mxu1 %v17563_v0  ;;  %v19670_v34 = vand.u32 4294901760, %v7676_v21  ;;  %v19726_v37 = vsub.f32 %v7673_v7, %v19706_v53  ;;  %v7846_v47 = vand.u32 4294901760, %v7845_v59  ;;  %v7887_v59 = vsub.f32 %v19738_v28, %v20961_v22 }
 0xca5   : > { %16175 = vmatpush3.msra.mxu1 %v7790_v12  ;;  %16139 = vmatprep.subr.mxu0 %v17563_v0  ;;  %v19678_v35 = vsub.f32 %v7677_v23, %v19659_v17  ;;  %v7838_v49 = vsub.f32 %v19654_v2, %v7837_v5  ;;  %v20964_v12 = vand.u32 4294901760, %v19702_v24 }
 0xca6   : > { %16176 = vmatprep.subr.mxu1 %v17563_v0  ;;  %16140 = vmatpush3.msra.mxu0 %v19562_v14  ;;  %v19688_v45 = vsub.f32 %v7676_v21, %v19670_v34  ;;  %v20962_v43 = vand.u32 4294901760, %v19726_v37 }
 0xca7   : > { %16177 = vmatpush3.msra.mxu1 %v7797_v11  ;;  %16141 = vmatprep.subr.mxu0 %v17563_v0  ;;  %v7851_v16 = vand.u32 4294901760, %v19678_v35  ;;  %v7839_v61 = vand.u32 4294901760, %v7838_v49  ;;  %v19730_v11 = vand.u32 4294901760, %v7671_v36 }
 0xca8   : > { %16178 = vmatprep.subr.mxu1 %v17563_v0  ;;  %16142 = vmatpush3.msra.mxu0 %v19566_v46  ;;  %v7858_v44 = vand.u32 4294901760, %v19688_v45  ;;  %v7880_v49 = vsub.f32 %v19726_v37, %v20962_v43 }
 0xca9   : > { %16179 = vmatpush3.msra.mxu1 %v7804_v30  ;;  %16143 = vmatprep.subr.mxu0 %v17563_v0  ;;  %v7852_v51 = vsub.f32 %v19678_v35, %v7851_v16  ;;  %v20963_v30 = vand.u32 4294901760, %v19714_v52  ;;  %v19748_v18 = vsub.f32 %v7671_v36, %v19730_v11 }
 0xcaa   : > { %16180 = vmatprep.subr.mxu1 %v17563_v0  ;;  %16144 = vmatpush3.msra.mxu0 %v19575_v63  ;;  %v7859_v23 = vsub.f32 %v19688_v45, %v7858_v44  ;;  %v7881_v55 = vand.u32 4294901760, %v7880_v49 }
 0xcab   : > { %16181 = vmatpush3.msra.mxu1 %v7811_v42  ;;  %16145 = vmatprep.subr.mxu0 %v17563_v0  ;;  %v7853_v21 = vand.u32 4294901760, %v7852_v51  ;;  %v7866_v42 = vsub.f32 %v19702_v24, %v20964_v12  ;;  %v20960_v7 = vand.u32 4294901760, %v19748_v18  ;;  %v7888_v51 = vand.u32 4294901760, %v7887_v59 }
 0xcac   : > { %16182 = vmatprep.subr.mxu1 %v17563_v0  ;;  %16146 = vmatpush3.msra.mxu0 %v19584_v25  ;;  %v7860_v6 = vand.u32 4294901760, %v7859_v23 }
 0xcad   : > { %16183 = vmatpush3.msra.mxu1 %v7818_v27  ;;  %16147 = vmatprep.subr.mxu0 %v17563_v0  ;;  %v7873_v27 = vsub.f32 %v19714_v52, %v20963_v30 }
 0xcae   : > { %16184 = vmatprep.subr.mxu1 %v17563_v0  ;;  %16148 = vmatpush3.msra.mxu0 %v19594_v48 }
 0xcaf   : > { %16185 = vmatpush3.msra.mxu1 %v7825_v15  ;;  %16149 = vmatprep.subr.mxu0 %v17563_v0  ;;  %v7867_v15 = vand.u32 4294901760, %v7866_v42 }
 0xcb0   : > { %16186 = vmatprep.subr.mxu1 %v17563_v0  ;;  %16150 = vmatpush3.msra.mxu0 %v19604_v57 }
 0xcb1   : > { %16187 = vmatpush3.msra.mxu1 %v7832_v29  ;;  %16151 = vmatprep.subr.mxu0 %v17563_v0  ;;  %v7874_v29 = vand.u32 4294901760, %v7873_v27 }
 0xcb2   : > { %16188 = vmatprep.subr.mxu1 %v17563_v0  ;;  %16152 = vmatpush3.msra.mxu0 %v19608_v3 }
 0xcb3   : > { %16189 = vmatpush3.msra.mxu1 %v7839_v61  ;;  %16153 = vmatprep.subr.mxu0 %v17563_v0  ;;  %v7894_v61 = vsub.f32 %v19748_v18, %v20960_v7 }
 0xcb4   : > { %16190 = vmatprep.subr.mxu1 %v17563_v0  ;;  %16154 = vmatpush3.msra.mxu0 %v19635_v33 }
 0xcb5   : > { %16191 = vmatpush3.msra.mxu1 %v7846_v47  ;;  %16155 = vmatprep.subr.mxu0 %v17563_v0  ;;  %v7895_v36 = vand.u32 4294901760, %v7894_v61 }
 0xcb6   : > { %16192 = vmatprep.subr.mxu1 %v17563_v0  ;;  %16156 = vmatpush3.msra.mxu0 %v19645_v4 }
 0xcb7   : > { %16193 = vmatpush3.msra.mxu1 %v7853_v21  ;;  %16157 = vmatprep.subr.mxu0 %v17563_v0 }
 0xcb8   : > { %16194 = vmatprep.subr.mxu1 %v17563_v0  ;;  %16158 = vmatpush3.msra.mxu0 %v19659_v17 }
 0xcb9   : > { %16195 = vmatpush3.msra.mxu1 %v7860_v6  ;;  %16159 = vmatprep.subr.mxu0 %v17563_v0 }
 0xcba   : > { %16196 = vmatprep.subr.mxu1 %v17563_v0  ;;  %16160 = vmatpush3.msra.mxu0 %v19670_v34 }
 0xcbb   : > { %16197 = vmatpush3.msra.mxu1 %v7867_v15  ;;  %16161 = vmatprep.subr.mxu0 %v17563_v0 }
 0xcbc   : > { %16198 = vmatprep.subr.mxu1 %v17563_v0  ;;  %16162 = vmatpush3.msra.mxu0 %v19690_v40 }
 0xcbd   : > { %16199 = vmatpush3.msra.mxu1 %v7874_v29  ;;  %16163 = vmatprep.subr.mxu0 %v17563_v0  ;;  %v14045_v29 = vld [vmem:[%s20935_s9] ss:$0 sm:$0xff] }
 0xcbe   : > { %16200 = vmatprep.subr.mxu1 %v17563_v0  ;;  %16206 = vmatprep.mubr.msk.f32.mxu1 %vm17564_vm0, %v17563_v0 }
 0xcbf   : > { %16201 = vmatpush3.msra.mxu1 %v7881_v55  ;;  %16164 = vmatpush3.msra.mxu0 %v19694_v62 }
 0xcc0   : > { %16202 = vmatprep.subr.mxu1 %v17563_v0  ;;  %16165 = vmatprep.subr.mxu0 %v17563_v0 }
 0xcc1   : > { %16203 = vmatpush3.msra.mxu1 %v7888_v51  ;;  %16166 = vmatpush3.msra.mxu0 %v19706_v53 }
 0xcc2   : > { %16204 = vmatprep.subr.mxu1 %v17563_v0  ;;  %16167 = vmatprep.subr.mxu0 %v17563_v0 }
 0xcc3   : > { %16205 = vmatpush3.msra.mxu1 %v7895_v36  ;;  %16168 = vmatpush3.msra.mxu0 %v19718_v54 }
 0xcc4   : > { %16244 = vmatprep.subr.mxu1 %v17563_v0  ;;  %16169 = vmatprep.subr.mxu0 %v17563_v0 }
 0xcc5   : > { %16170 = vmatpush3.msra.mxu0 %v19730_v11  ;;  %16171 = vmatprep.mubr.msk.f32.mxu0 %vm17564_vm0, %v17563_v0 }
 0xcc6   : > { %16209 = vmatprep.subr.mxu0 %v17563_v0 }
 0xce7   : > { %v6671_v47 = vpop.f32.mrf.mxu1 }
 0xce9   : > { %v15884_v23 = vpop.f32.mrf.mxu1 }
 0xcef   : > { %v6520_v21 = vpop.f32.mrf.mxu0 }
 0xcf0   : > { %v6521_v59 = vadd.f32 %v14045_v29, %v6520_v21 }
 0xcf1   : > { %v15849_v42 = vpop.f32.mrf.mxu0 }
 0xcf2   : > { %v6672_v61 = vadd.f32 %v6671_v47, %v6521_v59 }
 0xd07   : > { %v6864_v6 = vpop.f32.mrf.mxu1 }
 0xd09   : > { %v15954_v27 = vpop.f32.mrf.mxu1 }
 0xd10   : > { %v6775_v15 = vpop.f32.mrf.mxu0 }
 0xd11   : > { %v6776_v36 = vadd.f32 %v6775_v15, %v6672_v61 }
 0xd12   : > { %v15919_v49 = vpop.f32.mrf.mxu0 }
 0xd13   : > { %v6865_v7 = vadd.f32 %v6864_v6, %v6776_v36 }
 0xd29   : > { %v7070_v55 = vpop.f32.mrf.mxu1 }
 0xd2b   : > { %v16024_v51 = vpop.f32.mrf.mxu1 }
 0xd31   : > { %v6983_v22 = vpop.f32.mrf.mxu0 }
 0xd32   : > { %v6984_v43 = vadd.f32 %v6983_v22, %v6865_v7  ;;  %v19828_v22 = vld [vmem:[%s20937_s11] ss:$0 sm:$0xff] }
 0xd33   : > { %v15989_v30 = vpop.f32.mrf.mxu0 }
 0xd34   : > { %v7071_v23 = vadd.f32 %v7070_v55, %v6984_v43 }
 0xd36   : > { %v7074_v12 = vmax.f32 %v7071_v23, 0.0 }
 0xd38   : > { %v7075_v42 = vadd.f32 %v7074_v12, %v19260_v60 }
 0xd3a   : > { %v19799_v27 = vand.u32 4294901760, %v7075_v42 }
 0xd3c   : > { %v19802_v49 = vsub.f32 %v7075_v42, %v19799_v27  ;;  %16207 = vmatmul.mubr.f32.vlgmr.msra.gmra.mxu1 %v19799_v27 }
 0xd3d   : > { %16245 = vmatpush3.msra.mxu1 %v19562_v14  ;;  %16276 = vmatprep.mubr.msk.f32.mxu1 %vm17564_vm0, %v17563_v0 }
 0xd3e   : > { %16246 = vmatprep.subr.mxu1 %v17563_v0  ;;  %v19810_v30 = vand.u32 4294901760, %v19802_v49 }
 0xd3f   : > { %16247 = vmatpush3.msra.mxu1 %v19566_v46  ;;  %v16062_v47 = vpop.f32.mrf.mxu1 }
 0xd40   : > { %16248 = vmatprep.subr.mxu1 %v17563_v0  ;;  %v7778_v60 = vsub.f32 %v19802_v49, %v19810_v30 }
 0xd41   : > { %16249 = vmatpush3.msra.mxu1 %v19575_v63  ;;  %v16043_v43 = vpop.f32.mrf.mxu0  ;;  %v19855_v15 = vpop.f32.mrf.mxu1 }
 0xd42   : > { %16250 = vmatprep.subr.mxu1 %v17563_v0  ;;  %v19818_v12 = vand.u32 4294901760, %v7778_v60  ;;  %v7181_v7 = vadd.f32 %v16043_v43, %v19828_v22 }
 0xd43   : > { %16251 = vmatpush3.msra.mxu1 %v19584_v25  ;;  %v19847_v6 = vpop.f32.mrf.mxu0 }
 0xd44   : > { %16252 = vmatprep.subr.mxu1 %v17563_v0  ;;  %16172 = vmatmul.mubr.f32.vlgmr.msra.gmra.mxu0 %v19818_v12  ;;  %v7298_v21 = vadd.f32 %v16062_v47, %v7181_v7  ;;  %v21020_v47 = vand.u32 4294901760, %v19714_v52 }
 0xd45   : > { %16210 = vmatpush3.msra.mxu0 %v19573_v31  ;;  %16253 = vmatpush3.msra.mxu1 %v19594_v48  ;;  %v8349_v31 = vld [vmem:[#allocation18 + $0x70] sm:$0xff] }
 0xd46   : > { %16211 = vmatprep.subr.mxu0 %v17563_v0  ;;  %16254 = vmatprep.subr.mxu1 %v17563_v0 }
 0xd47   : > { %16212 = vmatpush3.msra.mxu0 %v19582_v38  ;;  %16255 = vmatpush3.msra.mxu1 %v19604_v57 }
 0xd48   : > { %16213 = vmatprep.subr.mxu0 %v17563_v0  ;;  %16256 = vmatprep.subr.mxu1 %v17563_v0 }
 0xd49   : > { %16214 = vmatpush3.msra.mxu0 %v19592_v8  ;;  %16257 = vmatpush3.msra.mxu1 %v19608_v3  ;;  %v8347_v8 = vld [vmem:[#allocation18 + $0x60] sm:$0xff] }
 0xd4a   : > { %16215 = vmatprep.subr.mxu0 %v17563_v0  ;;  %16258 = vmatprep.subr.mxu1 %v17563_v0 }
 0xd4b   : > { %16216 = vmatpush3.msra.mxu0 %v19602_v56  ;;  %16259 = vmatpush3.msra.mxu1 %v19635_v33 }
 0xd4c   : > { %16217 = vmatprep.subr.mxu0 %v17563_v0  ;;  %16260 = vmatprep.subr.mxu1 %v17563_v0 }
 0xd4d   : > { %16218 = vmatpush3.msra.mxu0 %v19617_v58  ;;  %16261 = vmatpush3.msra.mxu1 %v19645_v4 }
 0xd4e   : > { %16219 = vmatprep.subr.mxu0 %v17563_v0  ;;  %16262 = vmatprep.subr.mxu1 %v17563_v0 }
 0xd4f   : > { %16220 = vmatpush3.msra.mxu0 %v19628_v50  ;;  %16263 = vmatpush3.msra.mxu1 %v19659_v17 }
 0xd50   : > { %16221 = vmatprep.subr.mxu0 %v17563_v0  ;;  %16264 = vmatprep.subr.mxu1 %v17563_v0 }
 0xd51   : > { %16222 = vmatpush3.msra.mxu0 %v19633_v10  ;;  %16265 = vmatpush3.msra.mxu1 %v19670_v34  ;;  %v16081_v29 = vpop.f32.mrf.mxu0  ;;  %v8344_v10 = vld [vmem:[#allocation18 + $0x48] sm:$0xff] }
 0xd52   : > { %16223 = vmatprep.subr.mxu0 %v17563_v0  ;;  %16266 = vmatprep.subr.mxu1 %v17563_v0  ;;  %v7393_v59 = vadd.f32 %v16081_v29, %v7298_v21 }
 0xd53   : > { %16224 = vmatpush3.msra.mxu0 %v19654_v2  ;;  %16267 = vmatpush3.msra.mxu1 %v19690_v40  ;;  %v19885_v51 = vpop.f32.mrf.mxu0 }
 0xd54   : > { %16225 = vmatprep.subr.mxu0 %v17563_v0  ;;  %16268 = vmatprep.subr.mxu1 %v17563_v0  ;;  %v16100_v55 = vpop.f32.mrf.mxu1 }
 0xd55   : > { %16226 = vmatpush3.msra.mxu0 %v19666_v41  ;;  %16269 = vmatpush3.msra.mxu1 %v19694_v62  ;;  %v7482_v61 = vadd.f32 %v16100_v55, %v7393_v59 }
 0xd56   : > { %16227 = vmatprep.subr.mxu0 %v17563_v0  ;;  %16270 = vmatprep.subr.mxu1 %v17563_v0  ;;  %v19891_v36 = vpop.f32.mrf.mxu1 }
 0xd57   : > { %16228 = vmatpush3.msra.mxu0 %v19678_v35  ;;  %16271 = vmatpush3.msra.mxu1 %v19706_v53 }
 0xd58   : > { %16229 = vmatprep.subr.mxu0 %v17563_v0  ;;  %16272 = vmatprep.subr.mxu1 %v17563_v0 }
 0xd59   : > { %16230 = vmatpush3.msra.mxu0 %v19688_v45  ;;  %16273 = vmatpush3.msra.mxu1 %v19718_v54  ;;  %v21019_v45 = vand.u32 4294901760, %v19702_v24 }
 0xd5a   : > { %16231 = vmatprep.subr.mxu0 %v17563_v0  ;;  %16274 = vmatprep.subr.mxu1 %v17563_v0 }
 0xd5b   : > { %16232 = vmatpush3.msra.mxu0 %v19702_v24  ;;  %16275 = vmatpush3.msra.mxu1 %v19730_v11 }
 0xd5c   : > { %16233 = vmatprep.subr.mxu0 %v17563_v0  ;;  %16277 = vmatmul.mubr.f32.vlgmr.msra.gmra.mxu1 %v19810_v30 }
 0xd5d   : > { %16314 = vmatprep.subr.mxu1 %v17563_v0  ;;  %16234 = vmatpush3.msra.mxu0 %v19714_v52 }
 0xd5e   : > { %16315 = vmatpush3.msra.mxu1 %v19562_v14  ;;  %16235 = vmatprep.subr.mxu0 %v17563_v0 }
 0xd5f   : > { %16316 = vmatprep.subr.mxu1 %v17563_v0  ;;  %16236 = vmatpush3.msra.mxu0 %v19726_v37 }
 0xd60   : > { %16317 = vmatpush3.msra.mxu1 %v19566_v46  ;;  %16237 = vmatprep.subr.mxu0 %v17563_v0 }
 0xd61   : > { %16318 = vmatprep.subr.mxu1 %v17563_v0  ;;  %16238 = vmatpush3.msra.mxu0 %v19738_v28 }
 0xd62   : > { %16319 = vmatpush3.msra.mxu1 %v19575_v63  ;;  %16239 = vmatprep.subr.mxu0 %v17563_v0  ;;  %v16119_v14 = vpop.f32.mrf.mxu0  ;;  %v8350_v63 = vld [vmem:[#allocation18 + $0x78] sm:$0xff] }
 0xd63   : > { %16320 = vmatprep.subr.mxu1 %v17563_v0  ;;  %16240 = vmatpush3.msra.mxu0 %v19748_v18  ;;  %v7583_v23 = vadd.f32 %v16119_v14, %v7482_v61  ;;  %v19924_v38 = vand.u32 4294901760, %v8350_v63  ;;  %v8339_v61 = vld [vmem:[#allocation18 + $0x20] sm:$0xff]  ;;  %v21021_v14 = vand.u32 4294901760, %v19726_v37  ;;  %v21022_v37 = vand.u32 4294901760, %v19738_v28 }
 0xd64   : > { %16241 = vmatprep.mubr.msk.f32.mxu0 %vm17564_vm0, %v17563_v0  ;;  %16321 = vmatpush3.msra.mxu1 %v19584_v25  ;;  %v16138_v46 = vpop.f32.mrf.mxu1  ;;  %v8348_v25 = vld [vmem:[#allocation18 + $0x68] sm:$0xff]  ;;  %v21023_v28 = vand.u32 4294901760, %v19748_v18 }
 0xd65   : > { %16242 = vmatmul.mubr.f32.vlgmr.msra.gmra.mxu0 %v19802_v49  ;;  %16279 = vmatprep.subr.mxu0 %v17563_v0  ;;  %v19904_v42 = vadd.f32 %v16138_v46, %v7583_v23 }
 0xd66   : > { %16322 = vmatprep.subr.mxu1 %v17563_v0  ;;  %16280 = vmatpush3.msra.mxu0 %v7788_v32  ;;  %v19931_v32 = vand.u32 4294901760, %v8349_v31 }
 0xd67   : > { %16323 = vmatpush3.msra.mxu1 %v19594_v48  ;;  %16281 = vmatprep.subr.mxu0 %v17563_v0  ;;  %v19939_v48 = vsub.f32 %v8350_v63, %v19924_v38 }
 0xd68   : > { %16324 = vmatprep.subr.mxu1 %v17563_v0  ;;  %16282 = vmatpush3.msra.mxu0 %v7795_v13  ;;  %v19941_v13 = vand.u32 4294901760, %v8348_v25  ;;  %v19949_v56 = vsub.f32 %v8349_v31, %v19931_v32 }
 0xd69   : > { %16325 = vmatpush3.msra.mxu1 %v19604_v57  ;;  %16283 = vmatprep.subr.mxu0 %v17563_v0  ;;  %v19951_v57 = vand.u32 4294901760, %v8347_v8 }
 0xd6a   : > { %16326 = vmatprep.subr.mxu1 %v17563_v0  ;;  %16284 = vmatpush3.msra.mxu0 %v7802_v19  ;;  %v8452_v19 = vand.u32 4294901760, %v19939_v48  ;;  %v19960_v58 = vsub.f32 %v8348_v25, %v19941_v13  ;;  %v8338_v25 = vld [vmem:[#allocation18 + $0x18] sm:$0xff] }
 0xd6b   : > { %16327 = vmatpush3.msra.mxu1 %v19608_v3  ;;  %16285 = vmatprep.subr.mxu0 %v17563_v0  ;;  %v8346_v3 = vld [vmem:[#allocation18 + $0x58] sm:$0xff] }
 0xd6c   : > { %16328 = vmatprep.subr.mxu1 %v17563_v0  ;;  %16286 = vmatpush3.msra.mxu0 %v7809_v9  ;;  %v8345_v9 = vld [vmem:[#allocation18 + $0x50] sm:$0xff]  ;;  %v19964_v50 = vand.u32 4294901760, %v8346_v3  ;;  %v8453_v2 = vsub.f32 %v19939_v48, %v8452_v19 }
 0xd6d   : > { %16329 = vmatpush3.msra.mxu1 %v19635_v33  ;;  %16287 = vmatprep.subr.mxu0 %v17563_v0  ;;  %v8459_v33 = vand.u32 4294901760, %v19949_v56 }
 0xd6e   : > { %16330 = vmatprep.subr.mxu1 %v17563_v0  ;;  %16288 = vmatpush3.msra.mxu0 %v7816_v20  ;;  %v19971_v20 = vsub.f32 %v8347_v8, %v19951_v57  ;;  %v19989_v41 = vsub.f32 %v8346_v3, %v19964_v50 }
 0xd6f   : > { %16331 = vmatpush3.msra.mxu1 %v19645_v4  ;;  %16289 = vmatprep.subr.mxu0 %v17563_v0  ;;  %v19975_v4 = vand.u32 4294901760, %v8345_v9 }
 0xd70   : > { %16332 = vmatprep.subr.mxu1 %v17563_v0  ;;  %16290 = vmatpush3.msra.mxu0 %v7823_v39  ;;  %v8343_v39 = vld [vmem:[#allocation18 + $0x40] sm:$0xff] }
 0xd71   : > { %16333 = vmatpush3.msra.mxu1 %v19659_v17  ;;  %16291 = vmatprep.subr.mxu0 %v17563_v0  ;;  %v19984_v17 = vand.u32 4294901760, %v8344_v10  ;;  %v19998_v35 = vand.u32 4294901760, %v8343_v39 }
 0xd72   : > { %16334 = vmatprep.subr.mxu1 %v17563_v0  ;;  %16292 = vmatpush3.msra.mxu0 %v7830_v1  ;;  %v8466_v1 = vand.u32 4294901760, %v19960_v58 }
 0xd73   : > { %16335 = vmatpush3.msra.mxu1 %v19670_v34  ;;  %16293 = vmatprep.subr.mxu0 %v17563_v0  ;;  %v8460_v34 = vsub.f32 %v19949_v56, %v8459_v33  ;;  %v20026_v7 = vsub.f32 %v8343_v39, %v19998_v35  ;;  %v8337_v39 = vld [vmem:[#allocation18 + $0x10] sm:$0xff] }
 0xd74   : > { %16336 = vmatprep.subr.mxu1 %v17563_v0  ;;  %16294 = vmatpush3.msra.mxu0 %v7837_v5  ;;  %v8473_v5 = vand.u32 4294901760, %v19971_v20 }
 0xd75   : > { %16337 = vmatpush3.msra.mxu1 %v19690_v40  ;;  %16295 = vmatprep.subr.mxu0 %v17563_v0  ;;  %v20003_v40 = vsub.f32 %v8345_v9, %v19975_v4  ;;  %v8461_v24 = vand.u32 4294901760, %v8460_v34  ;;  %v8501_v31 = vand.u32 4294901760, %v20026_v7  ;;  %v20058_v9 = vand.u32 4294901760, %v8339_v61 }
 0xd76   : > { %16338 = vmatprep.subr.mxu1 %v17563_v0  ;;  %16296 = vmatpush3.msra.mxu0 %v7844_v26  ;;  %v8342_v26 = vld [vmem:[#allocation18 + $0x38] sm:$0xff]  ;;  %v8474_v43 = vsub.f32 %v19971_v20, %v8473_v5 }
 0xd77   : > { %16339 = vmatpush3.msra.mxu1 %v19694_v62  ;;  %16297 = vmatprep.subr.mxu0 %v17563_v0  ;;  %v8454_v62 = vand.u32 4294901760, %v8453_v2  ;;  %v20018_v60 = vand.u32 4294901760, %v8342_v26  ;;  %v8487_v21 = vand.u32 4294901760, %v20003_v40 }
 0xd78   : > { %16340 = vmatprep.subr.mxu1 %v17563_v0  ;;  %16298 = vmatpush3.msra.mxu0 %v7851_v16  ;;  %v8467_v16 = vsub.f32 %v19960_v58, %v8466_v1  ;;  %v8475_v63 = vand.u32 4294901760, %v8474_v43  ;;  %v20084_v43 = vand.u32 4294901760, %v8337_v39 }
 0xd79   : > { %16341 = vmatpush3.msra.mxu1 %v19706_v53  ;;  %16299 = vmatprep.subr.mxu0 %v17563_v0  ;;  %v20012_v53 = vsub.f32 %v8344_v10, %v19984_v17  ;;  %v20043_v23 = vsub.f32 %v8342_v26, %v20018_v60  ;;  %v8488_v8 = vsub.f32 %v20003_v40, %v8487_v21 }
 0xd7a   : > { %16342 = vmatprep.subr.mxu1 %v17563_v0  ;;  %16300 = vmatpush3.msra.mxu0 %v7858_v44  ;;  %v8341_v44 = vld [vmem:[#allocation18 + $0x30] sm:$0xff]  ;;  %v8468_v59 = vand.u32 4294901760, %v8467_v16  ;;  %v8336_v16 = vld [vmem:[#allocation18 + $0x8] sm:$0xff] }
 0xd7b   : > { %16343 = vmatpush3.msra.mxu1 %v19718_v54  ;;  %16301 = vmatprep.subr.mxu0 %v17563_v0  ;;  %v8480_v54 = vand.u32 4294901760, %v19989_v41  ;;  %v20032_v29 = vand.u32 4294901760, %v8341_v44  ;;  %v8494_v55 = vand.u32 4294901760, %v20012_v53  ;;  %v8508_v34 = vand.u32 4294901760, %v20043_v23 }
 0xd7c   : > { %16344 = vmatprep.subr.mxu1 %v17563_v0  ;;  %16302 = vmatpush3.msra.mxu0 %v21019_v45  ;;  %v20071_v45 = vand.u32 4294901760, %v8338_v25  ;;  %v8489_v18 = vand.u32 4294901760, %v8488_v8 }
 0xd7d   : > { %16345 = vmatpush3.msra.mxu1 %v19730_v11  ;;  %16346 = vmatprep.mubr.msk.f32.mxu1 %vm17564_vm0, %v17563_v0  ;;  %v8340_v11 = vld [vmem:[#allocation18 + $0x28] sm:$0xff]  ;;  %v8481_v52 = vsub.f32 %v19989_v41, %v8480_v54  ;;  %v20056_v3 = vsub.f32 %v8341_v44, %v20032_v29  ;;  %v8495_v10 = vsub.f32 %v20012_v53, %v8494_v55 }
 0xd7e   : > { %16303 = vmatprep.subr.mxu0 %v17563_v0  ;;  %16347 = vmatmul.mubr.f32.vlgmr.msra.gmra.mxu1 %v19799_v27  ;;  %v20045_v46 = vand.u32 4294901760, %v8340_v11 }
 0xd7f   : > { %16384 = vmatprep.subr.mxu1 %v17563_v0  ;;  %16304 = vmatpush3.msra.mxu0 %v21020_v47  ;;  %v8482_v2 = vand.u32 4294901760, %v8481_v52  ;;  %v8515_v44 = vand.u32 4294901760, %v20056_v3  ;;  %v8335_v47 = vld [vmem:[#allocation18] sm:$0xff]  ;;  %v20096_v52 = vand.u32 4294901760, %v8336_v16 }
 0xd80   : > { %16385 = vmatpush3.msra.mxu1 %v8454_v62  ;;  %16305 = vmatprep.subr.mxu0 %v17563_v0  ;;  %v20069_v26 = vsub.f32 %v8340_v11, %v20045_v46  ;;  %v8502_v62 = vsub.f32 %v20026_v7, %v8501_v31  ;;  %v8496_v11 = vand.u32 4294901760, %v8495_v10  ;;  %v20106_v10 = vsub.f32 %v8337_v39, %v20084_v43 }
 0xd81   : > { %16386 = vmatprep.subr.mxu1 %v17563_v0  ;;  %16306 = vmatpush3.msra.mxu0 %v21021_v14 }
 0xd82   : > { %16387 = vmatpush3.msra.mxu1 %v8461_v24  ;;  %16307 = vmatprep.subr.mxu0 %v17563_v0  ;;  %v20082_v24 = vsub.f32 %v8339_v61, %v20058_v9  ;;  %v20965_v14 = vand.u32 4294901760, %v20069_v26  ;;  %v20094_v61 = vsub.f32 %v8338_v25, %v20071_v45  ;;  %v20108_v25 = vand.u32 4294901760, %v8335_v47 }
 0xd83   : > { %16388 = vmatprep.subr.mxu1 %v17563_v0  ;;  %16308 = vmatpush3.msra.mxu0 %v21022_v37  ;;  %v8516_v37 = vsub.f32 %v20056_v3, %v8515_v44 }
 0xd84   : > { %16389 = vmatpush3.msra.mxu1 %v8468_v59  ;;  %16309 = vmatprep.subr.mxu0 %v17563_v0  ;;  %v8509_v59 = vsub.f32 %v20043_v23, %v8508_v34  ;;  %v8529_v8 = vand.u32 4294901760, %v20082_v24 }
 0xd85   : > { %16390 = vmatprep.subr.mxu1 %v17563_v0  ;;  %16310 = vmatpush3.msra.mxu0 %v21023_v28  ;;  %v8517_v39 = vand.u32 4294901760, %v8516_v37 }
 0xd86   : > { %16311 = vmatprep.mubr.msk.f32.mxu0 %vm17564_vm0, %v17563_v0  ;;  %16391 = vmatpush3.msra.mxu1 %v8475_v63  ;;  %v8503_v63 = vand.u32 4294901760, %v8502_v62  ;;  %v8510_v28 = vand.u32 4294901760, %v8509_v59  ;;  %v20966_v62 = vand.u32 4294901760, %v20094_v61  ;;  %v20967_v59 = vand.u32 4294901760, %v20106_v10 }
 0xd87   : > { %16312 = vmatmul.mubr.f32.vlgmr.msra.gmra.mxu0 %v19799_v27  ;;  %16349 = vmatprep.subr.mxu0 %v17563_v0 }
 0xd88   : > { %16392 = vmatprep.subr.mxu1 %v17563_v0  ;;  %16350 = vmatpush3.msra.mxu0 %v19924_v38 }
 0xd89   : > { %16393 = vmatpush3.msra.mxu1 %v8482_v2  ;;  %16351 = vmatprep.subr.mxu0 %v17563_v0  ;;  %v8523_v2 = vsub.f32 %v20069_v26, %v20965_v14  ;;  %v20128_v14 = vsub.f32 %v8335_v47, %v20108_v25 }
 0xd8a   : > { %16394 = vmatprep.subr.mxu1 %v17563_v0  ;;  %16352 = vmatpush3.msra.mxu0 %v19931_v32 }
 0xd8b   : > { %16395 = vmatpush3.msra.mxu1 %v8489_v18  ;;  %16353 = vmatprep.subr.mxu0 %v17563_v0  ;;  %v20118_v18 = vsub.f32 %v8336_v16, %v20096_v52  ;;  %v8524_v16 = vand.u32 4294901760, %v8523_v2  ;;  %v8557_v2 = vand.u32 4294901760, %v20128_v14 }
 0xd8c   : > { %16396 = vmatprep.subr.mxu1 %v17563_v0  ;;  %16354 = vmatpush3.msra.mxu0 %v19941_v13 }
 0xd8d   : > { %16397 = vmatpush3.msra.mxu1 %v8496_v11  ;;  %16355 = vmatprep.subr.mxu0 %v17563_v0  ;;  %v8530_v11 = vsub.f32 %v20082_v24, %v8529_v8  ;;  %v8550_v37 = vand.u32 4294901760, %v20118_v18 }
 0xd8e   : > { %16398 = vmatprep.subr.mxu1 %v17563_v0  ;;  %16356 = vmatpush3.msra.mxu0 %v19951_v57 }
 0xd8f   : > { %16399 = vmatpush3.msra.mxu1 %v8503_v63  ;;  %16357 = vmatprep.subr.mxu0 %v17563_v0  ;;  %v8537_v63 = vsub.f32 %v20094_v61, %v20966_v62  ;;  %v8531_v47 = vand.u32 4294901760, %v8530_v11 }
 0xd90   : > { %16400 = vmatprep.subr.mxu1 %v17563_v0  ;;  %16358 = vmatpush3.msra.mxu0 %v19964_v50 }
 0xd91   : > { %16401 = vmatpush3.msra.mxu1 %v8510_v28  ;;  %16359 = vmatprep.subr.mxu0 %v17563_v0  ;;  %v8544_v28 = vsub.f32 %v20106_v10, %v20967_v59  ;;  %v8538_v62 = vand.u32 4294901760, %v8537_v63  ;;  %v8558_v59 = vsub.f32 %v20128_v14, %v8557_v2 }
 0xd92   : > { %16402 = vmatprep.subr.mxu1 %v17563_v0  ;;  %16360 = vmatpush3.msra.mxu0 %v19975_v4 }
 0xd93   : > { %16403 = vmatpush3.msra.mxu1 %v8517_v39  ;;  %16361 = vmatprep.subr.mxu0 %v17563_v0  ;;  %v8551_v39 = vsub.f32 %v20118_v18, %v8550_v37  ;;  %v8545_v11 = vand.u32 4294901760, %v8544_v28  ;;  %v8559_v63 = vand.u32 4294901760, %v8558_v59 }
 0xd94   : > { %16404 = vmatprep.subr.mxu1 %v17563_v0  ;;  %16362 = vmatpush3.msra.mxu0 %v19984_v17 }
 0xd95   : > { %16405 = vmatpush3.msra.mxu1 %v8524_v16  ;;  %16363 = vmatprep.subr.mxu0 %v17563_v0  ;;  %v8552_v16 = vand.u32 4294901760, %v8551_v39 }
 0xd96   : > { %16406 = vmatprep.subr.mxu1 %v17563_v0  ;;  %16364 = vmatpush3.msra.mxu0 %v19998_v35 }
 0xd97   : > { %16407 = vmatpush3.msra.mxu1 %v8531_v47  ;;  %16365 = vmatprep.subr.mxu0 %v17563_v0  ;;  %v14048_v47 = vld [vmem:[%s20941_s15] ss:$0 sm:$0xff] }
 0xd98   : > { %16408 = vmatprep.subr.mxu1 %v17563_v0  ;;  %16366 = vmatpush3.msra.mxu0 %v20018_v60 }
 0xd99   : > { %16409 = vmatpush3.msra.mxu1 %v8538_v62  ;;  %16367 = vmatprep.subr.mxu0 %v17563_v0 }
 0xd9a   : > { %16410 = vmatprep.subr.mxu1 %v17563_v0  ;;  %16368 = vmatpush3.msra.mxu0 %v20032_v29 }
 0xd9b   : > { %16411 = vmatpush3.msra.mxu1 %v8545_v11  ;;  %16369 = vmatprep.subr.mxu0 %v17563_v0 }
 0xd9c   : > { %16412 = vmatprep.subr.mxu1 %v17563_v0  ;;  %16370 = vmatpush3.msra.mxu0 %v20045_v46 }
 0xd9d   : > { %16413 = vmatpush3.msra.mxu1 %v8552_v16  ;;  %16371 = vmatprep.subr.mxu0 %v17563_v0 }
 0xd9e   : > { %16414 = vmatprep.subr.mxu1 %v17563_v0  ;;  %16372 = vmatpush3.msra.mxu0 %v20058_v9 }
 0xd9f   : > { %16415 = vmatpush3.msra.mxu1 %v8559_v63  ;;  %16416 = vmatprep.mubr.msk.f32.mxu1 %vm17564_vm0, %v17563_v0 }
 0xda0   : > { %16373 = vmatprep.subr.mxu0 %v17563_v0  ;;  %16417 = vmatmul.mubr.f32.vlgmr.msra.gmra.mxu1 %v19799_v27 }
 0xda1   : > { %16454 = vmatprep.subr.mxu1 %v17563_v0  ;;  %16374 = vmatpush3.msra.mxu0 %v20071_v45 }
 0xda2   : > { %16455 = vmatpush3.msra.mxu1 %v19924_v38  ;;  %16375 = vmatprep.subr.mxu0 %v17563_v0 }
 0xda3   : > { %16456 = vmatprep.subr.mxu1 %v17563_v0  ;;  %16376 = vmatpush3.msra.mxu0 %v20084_v43 }
 0xda4   : > { %16457 = vmatpush3.msra.mxu1 %v19931_v32  ;;  %16377 = vmatprep.subr.mxu0 %v17563_v0 }
 0xda5   : > { %16458 = vmatprep.subr.mxu1 %v17563_v0  ;;  %16378 = vmatpush3.msra.mxu0 %v20096_v52 }
 0xda6   : > { %16459 = vmatpush3.msra.mxu1 %v19941_v13  ;;  %16379 = vmatprep.subr.mxu0 %v17563_v0 }
 0xda7   : > { %16460 = vmatprep.subr.mxu1 %v17563_v0  ;;  %16380 = vmatpush3.msra.mxu0 %v20108_v25 }
 0xda8   : > { %16381 = vmatprep.mubr.msk.f32.mxu0 %vm17564_vm0, %v17563_v0  ;;  %16461 = vmatpush3.msra.mxu1 %v19951_v57 }
 0xda9   : > { %16382 = vmatmul.mubr.f32.vlgmr.msra.gmra.mxu0 %v19818_v12  ;;  %16419 = vmatprep.subr.mxu0 %v17563_v0  ;;  %v7171_v12 = vadd.f32 %v19828_v22, %v19847_v6  ;;  %v7576_v6 = vpop.f32.mrf.mxu0 }
 0xdaa   : > { %16462 = vmatprep.subr.mxu1 %v17563_v0  ;;  %16420 = vmatpush3.msra.mxu0 %v19939_v48  ;;  %v21024_v48 = vand.u32 4294901760, %v20069_v26 }
 0xdab   : > { %16463 = vmatpush3.msra.mxu1 %v19964_v50  ;;  %16421 = vmatprep.subr.mxu0 %v17563_v0  ;;  %v7292_v62 = vadd.f32 %v19855_v15, %v7171_v12  ;;  %v7661_v15 = vpop.f32.mrf.mxu1 }
 0xdac   : > { %16464 = vmatprep.subr.mxu1 %v17563_v0  ;;  %16422 = vmatpush3.msra.mxu0 %v19949_v56  ;;  %v21025_v56 = vand.u32 4294901760, %v20094_v61 }
 0xdad   : > { %16465 = vmatpush3.msra.mxu1 %v19975_v4  ;;  %16423 = vmatprep.subr.mxu0 %v17563_v0 }
 0xdae   : > { %16466 = vmatprep.subr.mxu1 %v17563_v0  ;;  %16424 = vmatpush3.msra.mxu0 %v19960_v58 }
 0xdaf   : > { %16467 = vmatpush3.msra.mxu1 %v19984_v17  ;;  %16425 = vmatprep.subr.mxu0 %v17563_v0 }
 0xdb0   : > { %16468 = vmatprep.subr.mxu1 %v17563_v0  ;;  %16426 = vmatpush3.msra.mxu0 %v19971_v20 }
 0xdb1   : > { %16469 = vmatpush3.msra.mxu1 %v19998_v35  ;;  %16427 = vmatprep.subr.mxu0 %v17563_v0 }
 0xdb2   : > { %16470 = vmatprep.subr.mxu1 %v17563_v0  ;;  %16428 = vmatpush3.msra.mxu0 %v19989_v41 }
 0xdb3   : > { %16471 = vmatpush3.msra.mxu1 %v20018_v60  ;;  %16429 = vmatprep.subr.mxu0 %v17563_v0 }
 0xdb4   : > { %16472 = vmatprep.subr.mxu1 %v17563_v0  ;;  %16430 = vmatpush3.msra.mxu0 %v20003_v40 }
 0xdb5   : > { %16473 = vmatpush3.msra.mxu1 %v20032_v29  ;;  %16431 = vmatprep.subr.mxu0 %v17563_v0 }
 0xdb6   : > { %16474 = vmatprep.subr.mxu1 %v17563_v0  ;;  %16432 = vmatpush3.msra.mxu0 %v20012_v53  ;;  %v9003_v53 = vsel %vm2587_vm2, %v19904_v42, 0 }
 0xdb7   : > { %16475 = vmatpush3.msra.mxu1 %v20045_v46  ;;  %16433 = vmatprep.subr.mxu0 %v17563_v0 }
 0xdb8   : > { %16476 = vmatprep.subr.mxu1 %v17563_v0  ;;  %16434 = vmatpush3.msra.mxu0 %v20026_v7 }
 0xdb9   : > { %16477 = vmatpush3.msra.mxu1 %v20058_v9  ;;  %16435 = vmatprep.subr.mxu0 %v17563_v0 }
 0xdba   : > { %16478 = vmatprep.subr.mxu1 %v17563_v0  ;;  %16436 = vmatpush3.msra.mxu0 %v20043_v23 }
 0xdbb   : > { %16479 = vmatpush3.msra.mxu1 %v20071_v45  ;;  %16437 = vmatprep.subr.mxu0 %v17563_v0 }
 0xdbc   : > { %16480 = vmatprep.subr.mxu1 %v17563_v0  ;;  %16438 = vmatpush3.msra.mxu0 %v20056_v3 }
 0xdbd   : > { %16481 = vmatpush3.msra.mxu1 %v20084_v43  ;;  %16439 = vmatprep.subr.mxu0 %v17563_v0 }
 0xdbe   : > { %16482 = vmatprep.subr.mxu1 %v17563_v0  ;;  %16440 = vmatpush3.msra.mxu0 %v20069_v26 }
 0xdbf   : > { %16483 = vmatpush3.msra.mxu1 %v20096_v52  ;;  %16441 = vmatprep.subr.mxu0 %v17563_v0 }
 0xdc0   : > { %16484 = vmatprep.subr.mxu1 %v17563_v0  ;;  %16442 = vmatpush3.msra.mxu0 %v20082_v24 }
 0xdc1   : > { %16485 = vmatpush3.msra.mxu1 %v20108_v25  ;;  %16486 = vmatprep.mubr.msk.f32.mxu1 %vm17564_vm0, %v17563_v0 }
 0xdc2   : > { %16443 = vmatprep.subr.mxu0 %v17563_v0  ;;  %16487 = vmatmul.mubr.f32.vlgmr.msra.gmra.mxu1 %v19810_v30  ;;  %v7386_v30 = vadd.f32 %v19885_v51, %v7292_v62 }
 0xdc3   : > { %16524 = vmatprep.subr.mxu1 %v17563_v0  ;;  %16444 = vmatpush3.msra.mxu0 %v20094_v61 }
 0xdc4   : > { %16525 = vmatpush3.msra.mxu1 %v19924_v38  ;;  %16445 = vmatprep.subr.mxu0 %v17563_v0  ;;  %v7474_v22 = vadd.f32 %v19891_v36, %v7386_v30 }
 0xdc5   : > { %16526 = vmatprep.subr.mxu1 %v17563_v0  ;;  %16446 = vmatpush3.msra.mxu0 %v20106_v10 }
 0xdc6   : > { %16527 = vmatpush3.msra.mxu1 %v19931_v32  ;;  %16447 = vmatprep.subr.mxu0 %v17563_v0 }
 0xdc7   : > { %16528 = vmatprep.subr.mxu1 %v17563_v0  ;;  %16448 = vmatpush3.msra.mxu0 %v20118_v18 }
 0xdc8   : > { %16529 = vmatpush3.msra.mxu1 %v19941_v13  ;;  %16449 = vmatprep.subr.mxu0 %v17563_v0 }
 0xdc9   : > { %16530 = vmatprep.subr.mxu1 %v17563_v0  ;;  %16450 = vmatpush3.msra.mxu0 %v20128_v14 }
 0xdca   : > { %16451 = vmatprep.mubr.msk.f32.mxu0 %vm17564_vm0, %v17563_v0  ;;  %16531 = vmatpush3.msra.mxu1 %v19951_v57  ;;  %v21026_v57 = vand.u32 4294901760, %v20106_v10 }
 0xdcb   : > { %16452 = vmatmul.mubr.f32.vlgmr.msra.gmra.mxu0 %v19802_v49  ;;  %16489 = vmatprep.subr.mxu0 %v17563_v0  ;;  %v7577_v49 = vadd.f32 %v7576_v6, %v7474_v22 }
 0xdcc   : > { %16532 = vmatprep.subr.mxu1 %v17563_v0  ;;  %16490 = vmatpush3.msra.mxu0 %v8452_v19 }
 0xdcd   : > { %16533 = vmatpush3.msra.mxu1 %v19964_v50  ;;  %16491 = vmatprep.subr.mxu0 %v17563_v0  ;;  %v20285_v51 = vadd.f32 %v7661_v15, %v7577_v49 }
 0xdce   : > { %16534 = vmatprep.subr.mxu1 %v17563_v0  ;;  %16492 = vmatpush3.msra.mxu0 %v8459_v33 }
 0xdcf   : > { %16535 = vmatpush3.msra.mxu1 %v19975_v4  ;;  %16493 = vmatprep.subr.mxu0 %v17563_v0  ;;  %v9000_v36 = vsel %vm2587_vm2, %v20285_v51, 0 }
 0xdd0   : > { %16536 = vmatprep.subr.mxu1 %v17563_v0  ;;  %16494 = vmatpush3.msra.mxu0 %v8466_v1  ;;  %v20309_v38 = vand.u32 4294901760, %v9000_v36 }
 0xdd1   : > { %16537 = vmatpush3.msra.mxu1 %v19984_v17  ;;  %16495 = vmatprep.subr.mxu0 %v17563_v0 }
 0xdd2   : > { %16538 = vmatprep.subr.mxu1 %v17563_v0  ;;  %16496 = vmatpush3.msra.mxu0 %v8473_v5  ;;  %v20322_v32 = vsub.f32 %v9000_v36, %v20309_v38 }
 0xdd3   : > { %16539 = vmatpush3.msra.mxu1 %v19998_v35  ;;  %16497 = vmatprep.subr.mxu0 %v17563_v0  ;;  %v14047_v35 = vld [vmem:[%s20939_s13] ss:$0 sm:$0xff] }
 0xdd4   : > { %16540 = vmatprep.subr.mxu1 %v17563_v0  ;;  %16498 = vmatpush3.msra.mxu0 %v8480_v54  ;;  %v9076_v13 = vand.u32 4294901760, %v20322_v32 }
 0xdd5   : > { %16541 = vmatpush3.msra.mxu1 %v20018_v60  ;;  %16499 = vmatprep.subr.mxu0 %v17563_v0  ;;  %v9084_v60 = vand.u32 4294901760, %v9003_v53 }
 0xdd6   : > { %16542 = vmatprep.subr.mxu1 %v17563_v0  ;;  %16500 = vmatpush3.msra.mxu0 %v8487_v21  ;;  %v9077_v19 = vsub.f32 %v20322_v32, %v9076_v13 }
 0xdd7   : > { %16543 = vmatpush3.msra.mxu1 %v20032_v29  ;;  %16501 = vmatprep.subr.mxu0 %v17563_v0  ;;  %v9085_v21 = vsub.f32 %v9003_v53, %v9084_v60 }
 0xdd8   : > { %16544 = vmatprep.subr.mxu1 %v17563_v0  ;;  %16502 = vmatpush3.msra.mxu0 %v8494_v55  ;;  %v9078_v58 = vand.u32 4294901760, %v9077_v19 }
 0xdd9   : > { %16545 = vmatpush3.msra.mxu1 %v20045_v46  ;;  %16503 = vmatprep.subr.mxu0 %v17563_v0 }
 0xdda   : > { %16546 = vmatprep.subr.mxu1 %v17563_v0  ;;  %16504 = vmatpush3.msra.mxu0 %v8501_v31  ;;  %v9086_v31 = vand.u32 4294901760, %v9085_v21 }
 0xddb   : > { %16547 = vmatpush3.msra.mxu1 %v20058_v9  ;;  %16505 = vmatprep.subr.mxu0 %v17563_v0 }
 0xddc   : > { %16548 = vmatprep.subr.mxu1 %v17563_v0  ;;  %16506 = vmatpush3.msra.mxu0 %v8508_v34  ;;  %v9087_v26 = vsub.f32 %v9085_v21, %v9086_v31 }
 0xddd   : > { %16549 = vmatpush3.msra.mxu1 %v20071_v45  ;;  %16507 = vmatprep.subr.mxu0 %v17563_v0 }
 0xdde   : > { %16550 = vmatprep.subr.mxu1 %v17563_v0  ;;  %16508 = vmatpush3.msra.mxu0 %v8515_v44  ;;  %v9088_v44 = vand.u32 4294901760, %v9087_v26 }
 0xddf   : > { %16551 = vmatpush3.msra.mxu1 %v20084_v43  ;;  %16509 = vmatprep.subr.mxu0 %v17563_v0 }
 0xde0   : > { %16552 = vmatprep.subr.mxu1 %v17563_v0  ;;  %16510 = vmatpush3.msra.mxu0 %v21024_v48 }
 0xde1   : > { %16553 = vmatpush3.msra.mxu1 %v20096_v52  ;;  %16511 = vmatprep.subr.mxu0 %v17563_v0 }
 0xde2   : > { %16554 = vmatprep.subr.mxu1 %v17563_v0  ;;  %16512 = vmatpush3.msra.mxu0 %v8529_v8 }
 0xde3   : > { %16555 = vmatpush3.msra.mxu1 %v20108_v25  ;;  %16556 = vmatprep.mubr.msk.f32.mxu1 %vm17564_vm0, %v17563_v0 }
 0xde4   : > { %16513 = vmatprep.subr.mxu0 %v17563_v0  ;;  %16557 = vmatmul.mubr.f32.vlgmr.msra.gmra.mxu1 %v19799_v27 }
 0xde5   : > { %16514 = vmatpush3.msra.mxu0 %v21025_v56  ;;  %16566 = vmatprep.mubr.f32.mxu1 %v20309_v38 }
 0xde6   : > { %16515 = vmatprep.subr.mxu0 %v17563_v0  ;;  %16521 = vmatprep.mubr.msk.f32.mxu0 %vm17564_vm0, %v17563_v0 }
 0xde7   : > { %16516 = vmatpush3.msra.mxu0 %v21026_v57 }
 0xde8   : > { %16517 = vmatprep.subr.mxu0 %v17563_v0 }
 0xde9   : > { %16518 = vmatpush3.msra.mxu0 %v8550_v37 }
 0xdea   : > { %16519 = vmatprep.subr.mxu0 %v17563_v0 }
 0xdeb   : > { %16520 = vmatpush3.msra.mxu0 %v8557_v2 }
 0xdec   : > { %16522 = vmatmul.mubr.f32.vlgmr.msra.gmra.mxu0 %v19799_v27 }
 0xded   : > { %16561 = vmatprep.mubr.f32.mxu0 %v9078_v58 }
 0xdfc   : > { %v7932_v50 = vpop.f32.mrf.mxu1 }
 0xdfe   : > { %v16208_v33 = vpop.f32.mrf.mxu1 }
 0xe04   : > { %v7781_v20 = vpop.f32.mrf.mxu0 }
 0xe05   : > { %v7782_v0 = vadd.f32 %v14047_v35, %v7781_v20 }
 0xe06   : > { %v16173_v4 = vpop.f32.mrf.mxu0 }
 0xe07   : > { %v7933_v54 = vadd.f32 %v7932_v50, %v7782_v0 }
 0xe1c   : > { %v8125_v1 = vpop.f32.mrf.mxu1 }
 0xe1e   : > { %v16278_v17 = vpop.f32.mrf.mxu1 }
 0xe25   : > { %v8036_v41 = vpop.f32.mrf.mxu0 }
 0xe26   : > { %v8037_v7 = vadd.f32 %v8036_v41, %v7933_v54 }
 0xe27   : > { %v16243_v5 = vpop.f32.mrf.mxu0 }
 0xe28   : > { %v8126_v29 = vadd.f32 %v8125_v1, %v8037_v7 }
 0xe3e   : > { %v8331_v40 = vpop.f32.mrf.mxu1 }
 0xe40   : > { %v16348_v27 = vpop.f32.mrf.mxu1 }
 0xe47   : > { %v8244_v55 = vpop.f32.mrf.mxu0 }
 0xe48   : > { %v8245_v23 = vadd.f32 %v8244_v55, %v8126_v29 }
 0xe49   : > { %v16313_v46 = vpop.f32.mrf.mxu0 }
 0xe4a   : > { %v20359_v3 = vadd.f32 %v8331_v40, %v8245_v23 }
 0xe4c   : > { %v9006_v9 = vsel %vm2587_vm2, %v20359_v3, 0 }
 0xe4d   : > { %v9039_v34 = vand.u32 4294901760, %v9006_v9 }
 0xe4f   : > { %16559 = vmatprep.subr.mxu0 %v9039_v34  ;;  %v9126_v45 = vsub.f32 %v9006_v9, %v9039_v34 }
 0xe50   : > { %16560 = vmatpush3.xpose.msra.mxu0 %v9039_v34 }
 0xe51   : > { %16569 = vmatprep.subr.mxu0 %v9126_v45  ;;  %v9127_v24 = vand.u32 4294901760, %v9126_v45 }
 0xe53   : > { %16562 = vmatmul.mubr.f32.vlgmr.msra.gmra.mxu0 %v9088_v44  ;;  %v9128_v43 = vsub.f32 %v9126_v45, %v9127_v24 }
 0xe54   : > { %16570 = vmatpush3.xpose.msra.mxu0 %v9126_v45  ;;  %16571 = vmatprep.mubr.f32.mxu0 %v20322_v32 }
 0xe55   : > { %16579 = vmatprep.subr.mxu0 %v9127_v24  ;;  %v9129_v14 = vand.u32 4294901760, %v9128_v43 }
 0xe57   : > { %16564 = vmatprep.subr.mxu1 %v9129_v14  ;;  %16572 = vmatmul.mubr.f32.vlgmr.msra.gmra.mxu0 %v9085_v21 }
 0xe58   : > { %16565 = vmatpush3.xpose.msra.mxu1 %v9129_v14  ;;  %16580 = vmatpush3.xpose.msra.mxu0 %v9127_v24 }
 0xe59   : > { %16581 = vmatprep.mubr.f32.mxu0 %v20309_v38  ;;  %16574 = vmatprep.subr.mxu1 %v9039_v34 }
 0xe5b   : > { %16567 = vmatmul.mubr.f32.vlgmr.msra.gmra.mxu1 %v9084_v60  ;;  %16582 = vmatmul.mubr.f32.vlgmr.msra.gmra.mxu0 %v9084_v60 }
 0xe5c   : > { %16575 = vmatpush3.xpose.msra.mxu1 %v9039_v34  ;;  %16576 = vmatprep.mubr.f32.mxu1 %v9076_v13 }
 0xe5d   : > { %16584 = vmatprep.subr.mxu1 %v9039_v34 }
 0xe5f   : > { %16577 = vmatmul.mubr.f32.vlgmr.msra.gmra.mxu1 %v9086_v31 }
 0xe60   : > { %v8596_v61 = vpop.f32.mrf.mxu1  ;;  %16585 = vmatpush3.xpose.msra.mxu1 %v9039_v34  ;;  %16586 = vmatprep.mubr.f32.mxu1 %v20309_v38 }
 0xe62   : > { %v16418_v52 = vpop.f32.mrf.mxu1 }
 0xe63   : > { %16587 = vmatmul.mubr.f32.vlgmr.msra.gmra.mxu1 %v9084_v60 }
 0xe69   : > { %v8445_v8 = vpop.f32.mrf.mxu0 }
 0xe6a   : > { %v8446_v28 = vadd.f32 %v14048_v47, %v8445_v8 }
 0xe6b   : > { %v16383_v10 = vpop.f32.mrf.mxu0 }
 0xe6c   : > { %v8597_v39 = vadd.f32 %v8596_v61, %v8446_v28 }
 0xe82   : > { %v8789_v25 = vpop.f32.mrf.mxu1 }
 0xe84   : > { %v16488_v18 = vpop.f32.mrf.mxu1 }
 0xe8b   : > { %v8700_v59 = vpop.f32.mrf.mxu0 }
 0xe8c   : > { %v8701_v16 = vadd.f32 %v8700_v59, %v8597_v39 }
 0xe8d   : > { %v16453_v37 = vpop.f32.mrf.mxu0 }
 0xe8e   : > { %v8790_v63 = vadd.f32 %v8789_v25, %v8701_v16 }
 0xea4   : > { %v8995_v2 = vpop.f32.mrf.mxu1 }
 0xea6   : > { %v16558_v11 = vpop.f32.mrf.mxu1 }
 0xeac   : > { %v8908_v12 = vpop.f32.mrf.mxu0 }
 0xead   : > { %v8909_v62 = vadd.f32 %v8908_v12, %v8790_v63 }
 0xeae   : > { %v16523_v30 = vpop.f32.mrf.mxu0 }
 0xeaf   : > { %v20369_v22 = vadd.f32 %v8995_v2, %v8909_v62 }
 0xeb1   : > { %v20372_v6 = vand.u32 4294901760, %v20369_v22 }
 0xeb3   : > { %16589 = vmatprep.subr.mxu0 %v20372_v6  ;;  %v20377_v49 = vsub.f32 %v20369_v22, %v20372_v6 }
 0xeb4   : > { %16590 = vmatpush3.msra.mxu0 %v20372_v6 }
 0xeb5   : > { %16599 = vmatprep.subr.mxu0 %v20377_v49  ;;  %v20382_v15 = vand.u32 4294901760, %v20377_v49 }
 0xeb7   : > { %v9648_v36 = vsub.f32 %v20377_v49, %v20382_v15 }
 0xeb9   : > { %v9649_v38 = vand.u32 4294901760, %v9648_v36 }
 0xebb   : > { %16594 = vmatprep.subr.mxu1 %v9649_v38 }
 0xebc   : > { %16595 = vmatpush3.msra.mxu1 %v9649_v38 }
 0xebd   : > { %16604 = vmatprep.subr.mxu1 %v20372_v6 }
 0xf13   : > { %v16563_v32 = vpop.f32.mrf.mxu0 }
 0xf15   : > { %v9080_v48 = vpop.f32.mrf.mxu0 }
 0xf17   : > { %v16573_v13 = vpop.f32.mrf.mxu0 }
 0xf19   : > { %v9246_v56 = vpop.f32.mrf.mxu0 }
 0xf1b   : > { %v16568_v57 = vpop.f32.mrf.mxu1  ;;  %v16583_v20 = vpop.f32.mrf.mxu0 }
 0xf1c   : > { %v9173_v19 = vadd.f32 %v16568_v57, %v16563_v32 }
 0xf1d   : > { %v9166_v58 = vpop.f32.mrf.mxu1  ;;  %v9409_v0 = vpop.f32.mrf.mxu0 }
 0xf1e   : > { %v9167_v50 = vadd.f32 %v9166_v58, %v9080_v48  ;;  %v9254_v33 = vadd.f32 %v16573_v13, %v9173_v19 }
 0xf1f   : > { %v16578_v4 = vpop.f32.mrf.mxu1 }
 0xf20   : > { %v9336_v1 = vadd.f32 %v16578_v4, %v9254_v33  ;;  %v9247_v17 = vadd.f32 %v9246_v56, %v9167_v50 }
 0xf21   : > { %v9327_v41 = vpop.f32.mrf.mxu1 }
 0xf22   : > { %v9328_v5 = vadd.f32 %v9327_v41, %v9247_v17  ;;  %v9416_v35 = vadd.f32 %v16583_v20, %v9336_v1 }
 0xf23   : > { %v16588_v40 = vpop.f32.mrf.mxu1 }
 0xf24   : > { %v9494_v53 = vadd.f32 %v16588_v40, %v9416_v35  ;;  %v9410_v54 = vadd.f32 %v9409_v0, %v9328_v5 }
 0xf25   : > { %v9487_v27 = vpop.f32.mrf.mxu1 }
 0xf26   : > { %v9498_v60 = vmul.f32 0.088388346, %v9494_v53  ;;  %v9488_v7 = vadd.f32 %v9487_v27, %v9410_v54 }
 0xf28   : > { %v9497_v21 = vmul.f32 0.088388346, %v9488_v7  ;;  %v9503_v29 = vsel %vm9499_vm7, %v9498_v60, -inf }
 0xf29   : > { %9504 = vmax.xlane.f32.xlu0 %v9503_v29 }
 0xf2a   : > { %v9500_v55 = vsel %vm9499_vm7, %v9497_v21, -inf }
 0xf2b   : > { %9501 = vmax.xlane.f32.xlu1 %v9500_v55 }
 0xfb2   : > { %v9505_v23 = vpop.xlane.xlu0 %9504 }
 0xfb3   : > { %v9507_v46 = vsub.f32 %v9498_v60, %v9505_v23 }
 0xfb4   : > { %v9502_v31 = vpop.xlane.xlu1 %9501 }
 0xfb5   : > { %v9510_v9 = vmul.f32 1.442695, %v9507_v46  ;;  %v9506_v34 = vsub.f32 %v9497_v21, %v9502_v31 }
 0xfb7   : > { %17171 = vpow2.f32 %v9510_v9  ;;  %v9508_v26 = vmul.f32 1.442695, %v9506_v34 }
 0xfb9   : > { %17173 = vpow2.f32 %v9508_v26 }
 0xfc4   : > { %v17172_v45 = vpop.eup %17171 }
 0xfc5   : > { %v9515_v44 = vsel %vm9499_vm7, %v17172_v45, 0.0 }
 0xfc6   : > { %v17174_v24 = vpop.eup %17173  ;;  %9516 = vadd.xlane.f32.xlu1 %v9515_v44 }
 0xfc7   : > { %v9512_v43 = vsel %vm9499_vm7, %v17174_v24, 0.0 }
 0xfc8   : > { %9513 = vadd.xlane.f32.xlu0 %v9512_v43 }
 0xfd7   : > { %10021 = vrot.lane.b32.xlu1 %v20285_v51, %s17565_s17 }
 0xfdb   : > { %10023 = vrot.lane.b32.xlu1 %v19904_v42, %s17565_s17 }
 0xfde   : > { %10025 = vrot.lane.b32.xlu0 %v20359_v3, %s17565_s17 }
0x104f   : > { %v9517_v14 = vpop.xlane.xlu1 %9516 }
0x1050   : > { %17175 = vrcp.f32 %v9517_v14 }
0x1051   : > { %v9514_v61 = vpop.xlane.xlu0 %9513 }
0x1052   : > { %17177 = vrcp.f32 %v9514_v61 }
0x1053   : > { %v10022_v25 = vpop.permute.xlu1 %10021 }
0x1054   : > { %v10027_v12 = vsel %vm2587_vm2, %v10022_v25, 0 }
0x1055   : > { %v10026_v52 = vpop.permute.xlu0 %10025  ;;  %v10099_v48 = vand.u32 4294901760, %v10027_v12 }
0x1056   : > { %v10031_v8 = vsel %vm2587_vm2, %v10026_v52, 0 }
0x1057   : > { %v10064_v10 = vand.u32 4294901760, %v10031_v8  ;;  %v10024_v11 = vpop.permute.xlu1 %10023  ;;  %v10100_v50 = vsub.f32 %v10027_v12, %v10099_v48 }
0x1058   : > { %v10029_v36 = vsel %vm2587_vm2, %v10024_v11, 0 }
0x1059   : > { %v20398_v59 = vsub.f32 %v10031_v8, %v10064_v10  ;;  %v10109_v57 = vand.u32 4294901760, %v10029_v36  ;;  %v10101_v17 = vand.u32 4294901760, %v10100_v50 }
0x105b   : > { %v10152_v63 = vand.u32 4294901760, %v20398_v59  ;;  %v10110_v4 = vsub.f32 %v10029_v36, %v10109_v57 }
0x105d   : > { %v17176_v18 = vpop.eup %17175  ;;  %v10153_v13 = vsub.f32 %v20398_v59, %v10152_v63  ;;  %v10111_v41 = vand.u32 4294901760, %v10110_v4 }
0x105e   : > { %v9521_v37 = vmul.f32 %v17176_v18, %v17172_v45 }
0x105f   : > { %v17178_v47 = vpop.eup %17177  ;;  %v10154_v33 = vand.u32 4294901760, %v10153_v13  ;;  %v10112_v5 = vsub.f32 %v10110_v4, %v10111_v41 }
0x1060   : > { %v9519_v28 = vmul.f32 %v17178_v47, %v17174_v24  ;;  %v9526_v2 = vsel %vm9499_vm7, %v9521_v37, 0 }
0x1061   : > { %v9604_v39 = vand.u32 4294901760, %v9526_v2  ;;  %v10113_v35 = vand.u32 4294901760, %v10112_v5 }
0x1062   : > { %v9523_v16 = vsel %vm9499_vm7, %v9519_v28, 0 }
0x1063   : > { %v9594_v62 = vand.u32 4294901760, %v9523_v16  ;;  %v9605_v30 = vsub.f32 %v9526_v2, %v9604_v39 }
0x1065   : > { %16596 = vmatprep.mubr.f32.mxu1 %v9594_v62  ;;  %v9595_v38 = vsub.f32 %v9523_v16, %v9594_v62  ;;  %v9606_v32 = vand.u32 4294901760, %v9605_v30 }
0x1066   : > { %16597 = vmatmul.mubr.f32.vlgmr.msra.gmra.mxu1 %v9604_v39 }
0x1067   : > { %16605 = vmatpush3.msra.mxu1 %v20372_v6  ;;  %v9596_v56 = vand.u32 4294901760, %v9595_v38  ;;  %v9607_v19 = vsub.f32 %v9605_v30, %v9606_v32 }
0x1068   : > { %16614 = vmatprep.subr.mxu1 %v20372_v6 }
0x1069   : > { %16606 = vmatprep.mubr.f32.mxu1 %v9596_v56  ;;  %v9597_v58 = vsub.f32 %v9595_v38, %v9596_v56  ;;  %v9608_v1 = vand.u32 4294901760, %v9607_v19 }
0x106a   : > { %16607 = vmatmul.mubr.f32.vlgmr.msra.gmra.mxu1 %v9606_v32 }
0x106b   : > { %16615 = vmatpush3.msra.mxu1 %v20372_v6  ;;  %16616 = vmatprep.mubr.f32.mxu1 %v9594_v62  ;;  %v9598_v20 = vand.u32 4294901760, %v9597_v58  ;;  %v10102_v6 = vsub.f32 %v10100_v50, %v10101_v17 }
0x106c   : > { %16624 = vmatprep.subr.mxu1 %v10154_v33 }
0x106d   : > { %16591 = vmatprep.mubr.f32.mxu0 %v9598_v20 }
0x106e   : > { %16592 = vmatmul.mubr.f32.vlgmr.msra.gmra.mxu0 %v9608_v1  ;;  %16617 = vmatmul.mubr.f32.vlgmr.msra.gmra.mxu1 %v9604_v39 }
0x106f   : > { %16600 = vmatpush3.msra.mxu0 %v20377_v49  ;;  %16625 = vmatpush3.xpose.msra.mxu1 %v10154_v33  ;;  %v10103_v49 = vand.u32 4294901760, %v10102_v6 }
0x1070   : > { %16601 = vmatprep.mubr.f32.mxu0 %v9595_v38  ;;  %16609 = vmatprep.subr.mxu0 %v20382_v15 }
0x1071   : > { %16626 = vmatprep.mubr.f32.mxu1 %v10099_v48  ;;  %16634 = vmatprep.subr.mxu1 %v10064_v10 }
0x1072   : > { %16602 = vmatmul.mubr.f32.vlgmr.msra.gmra.mxu0 %v9605_v30  ;;  %16627 = vmatmul.mubr.f32.vlgmr.msra.gmra.mxu1 %v10109_v57 }
0x1073   : > { %16610 = vmatpush3.msra.mxu0 %v20382_v15  ;;  %16635 = vmatpush3.xpose.msra.mxu1 %v10064_v10 }
0x1074   : > { %16611 = vmatprep.mubr.f32.mxu0 %v9594_v62  ;;  %16619 = vmatprep.subr.mxu0 %v10064_v10 }
0x1075   : > { %16636 = vmatprep.mubr.f32.mxu1 %v10101_v17  ;;  %16644 = vmatprep.subr.mxu1 %v10064_v10 }
0x1076   : > { %16612 = vmatmul.mubr.f32.vlgmr.msra.gmra.mxu0 %v9604_v39  ;;  %16637 = vmatmul.mubr.f32.vlgmr.msra.gmra.mxu1 %v10111_v41 }
0x1077   : > { %16620 = vmatpush3.xpose.msra.mxu0 %v10064_v10  ;;  %16645 = vmatpush3.xpose.msra.mxu1 %v10064_v10 }
0x1078   : > { %16621 = vmatprep.mubr.f32.mxu0 %v10103_v49  ;;  %16629 = vmatprep.subr.mxu0 %v20398_v59 }
0x1079   : > { %16646 = vmatprep.mubr.f32.mxu1 %v10099_v48 }
0x107a   : > { %16622 = vmatmul.mubr.f32.vlgmr.msra.gmra.mxu0 %v10113_v35  ;;  %16647 = vmatmul.mubr.f32.vlgmr.msra.gmra.mxu1 %v10109_v57 }
0x107b   : > { %16630 = vmatpush3.xpose.msra.mxu0 %v20398_v59  ;;  %16631 = vmatprep.mubr.f32.mxu0 %v10100_v50 }
0x107c   : > { %16639 = vmatprep.subr.mxu0 %v10152_v63 }
0x107e   : > { %16632 = vmatmul.mubr.f32.vlgmr.msra.gmra.mxu0 %v10110_v4 }
0x107f   : > { %16640 = vmatpush3.xpose.msra.mxu0 %v10152_v63  ;;  %16641 = vmatprep.mubr.f32.mxu0 %v10099_v48 }
0x1082   : > { %16642 = vmatmul.mubr.f32.vlgmr.msra.gmra.mxu0 %v10109_v57 }
0x1126   : > { %v16598_v15 = vpop.f32.mrf.mxu1 }
0x1128   : > { %v9686_v0 = vpop.f32.mrf.mxu1 }
0x112a   : > { %v16608_v40 = vpop.f32.mrf.mxu1 }
0x112c   : > { %v9847_v53 = vpop.f32.mrf.mxu1 }
0x112e   : > { %v16593_v54 = vpop.f32.mrf.mxu0  ;;  %v16618_v27 = vpop.f32.mrf.mxu1 }
0x112f   : > { %v9693_v21 = vadd.f32 %v16598_v15, %v16593_v54 }
0x1130   : > { %v9600_v60 = vpop.f32.mrf.mxu0  ;;  %v10007_v7 = vpop.f32.mrf.mxu1 }
0x1131   : > { %v9687_v23 = vadd.f32 %v9686_v0, %v9600_v60 }
0x1132   : > { %v16603_v29 = vpop.f32.mrf.mxu0  ;;  %v16628_v55 = vpop.f32.mrf.mxu1 }
0x1133   : > { %v9774_v46 = vadd.f32 %v16603_v29, %v9693_v21 }
0x1134   : > { %v9766_v31 = vpop.f32.mrf.mxu0  ;;  %v10191_v26 = vpop.f32.mrf.mxu1 }
0x1135   : > { %v9767_v9 = vadd.f32 %v9766_v31, %v9687_v23  ;;  %v9856_v34 = vadd.f32 %v16608_v40, %v9774_v46 }
0x1136   : > { %v16613_v45 = vpop.f32.mrf.mxu0  ;;  %v16638_v52 = vpop.f32.mrf.mxu1 }
0x1137   : > { %v9936_v44 = vadd.f32 %v16613_v45, %v9856_v34  ;;  %v9848_v24 = vadd.f32 %v9847_v53, %v9767_v9 }
0x1138   : > { %v9929_v43 = vpop.f32.mrf.mxu0  ;;  %v10352_v47 = vpop.f32.mrf.mxu1 }
0x1139   : > { %v10014_v14 = vadd.f32 %v16618_v27, %v9936_v44  ;;  %v9930_v61 = vadd.f32 %v9929_v43, %v9848_v24 }
0x113a   : > { %v16623_v8 = vpop.f32.mrf.mxu0  ;;  %v16648_v12 = vpop.f32.mrf.mxu1 }
0x113b   : > { %v10018_v10 = vadd.f32 %v10014_v14, %v19904_v42  ;;  %v10008_v25 = vadd.f32 %v10007_v7, %v9930_v61  ;;  %v10198_v37 = vadd.f32 %v16628_v55, %v16623_v8 }
0x113c   : > { %v10105_v18 = vpop.f32.mrf.mxu0  ;;  %v10512_v13 = vpop.f32.mrf.mxu1 }
0x113d   : > { %10020 = vst.msk [vmem:[#allocation3 + $0x8] sm:$0xff] %vm2587_vm2, %v10018_v10  ;;  %v10017_v59 = vadd.f32 %v10008_v25, %v20285_v51  ;;  %v10192_v2 = vadd.f32 %v10191_v26, %v10105_v18 }
0x113e   : > { %v16633_v28 = vpop.f32.mrf.mxu0 }
0x113f   : > { %10019 = vst.msk [vmem:[#allocation3] sm:$0xff] %vm2587_vm2, %v10017_v59  ;;  %v10279_v39 = vadd.f32 %v16633_v28, %v10198_v37 }
0x1140   : > { %v10271_v11 = vpop.f32.mrf.mxu0 }
0x1141   : > { %v10272_v16 = vadd.f32 %v10271_v11, %v10192_v2  ;;  %v10361_v63 = vadd.f32 %v16638_v52, %v10279_v39 }
0x1142   : > { %v16643_v62 = vpop.f32.mrf.mxu0 }
0x1143   : > { %v10441_v30 = vadd.f32 %v16643_v62, %v10361_v63  ;;  %v10353_v36 = vadd.f32 %v10352_v47, %v10272_v16 }
0x1144   : > { %v10434_v38 = vpop.f32.mrf.mxu0 }
0x1145   : > { %v10519_v32 = vadd.f32 %v16648_v12, %v10441_v30  ;;  %v10435_v48 = vadd.f32 %v10434_v38, %v10353_v36 }
0x1147   : > { %v10513_v56 = vadd.f32 %v10512_v13, %v10435_v48  ;;  %v10523_v57 = vmul.f32 0.088388346, %v10519_v32 }
0x1149   : > { %v10527_v19 = vsel %vm9499_vm7, %v10523_v57, -inf  ;;  %v10522_v58 = vmul.f32 0.088388346, %v10513_v56 }
0x114a   : > { %10528 = vmax.xlane.f32.xlu1 %v10527_v19 }
0x114b   : > { %v10524_v50 = vsel %vm9499_vm7, %v10522_v58, -inf }
0x114c   : > { %10525 = vmax.xlane.f32.xlu0 %v10524_v50 }
0x115b   : > { %10547 = vrot.lane.b32.xlu1 %v20369_v22, %s17565_s17 }
0x115f   : > { %11057 = vrot.lane.b32.xlu1 %v20285_v51, %s17566_s8 }
0x1163   : > { %11059 = vrot.lane.b32.xlu1 %v19904_v42, %s17566_s8 }
0x11d3   : > { %v10529_v33 = vpop.xlane.xlu1 %10528 }
0x11d4   : > { %v10531_v20 = vsub.f32 %v10523_v57, %v10529_v33 }
0x11d5   : > { %v10526_v4 = vpop.xlane.xlu0 %10525 }
0x11d6   : > { %v10530_v1 = vsub.f32 %v10522_v58, %v10526_v4  ;;  %v10534_v41 = vmul.f32 1.442695, %v10531_v20 }
0x11d7   : > { %v10548_v17 = vpop.permute.xlu1 %10547 }
0x11d8   : > { %v10532_v6 = vmul.f32 1.442695, %v10530_v1  ;;  %v10587_v5 = vand.u32 4294901760, %v10548_v17 }
0x11da   : > { %17179 = vpow2.f32 %v10532_v6  ;;  %v20426_v49 = vsub.f32 %v10548_v17, %v10587_v5  ;;  %16649 = vmatprep.subr.mxu0 %v10587_v5 }
0x11db   : > { %16650 = vmatpush3.msra.mxu0 %v10587_v5  ;;  %17181 = vpow2.f32 %v10534_v41  ;;  %v11058_v46 = vpop.permute.xlu1 %11057 }
0x11dc   : > { %16659 = vmatprep.subr.mxu0 %v20426_v49  ;;  %v20430_v35 = vand.u32 4294901760, %v20426_v49  ;;  %v11063_v61 = vsel %vm2587_vm2, %v11058_v46, 0 }
0x11dd   : > { %v11135_v18 = vand.u32 4294901760, %v11063_v61 }
0x11de   : > { %v10676_v15 = vsub.f32 %v20426_v49, %v20430_v35 }
0x11df   : > { %v11060_v24 = vpop.permute.xlu1 %11059  ;;  %v11136_v11 = vsub.f32 %v11063_v61, %v11135_v18 }
0x11e0   : > { %v10677_v0 = vand.u32 4294901760, %v10676_v15  ;;  %v11065_v25 = vsel %vm2587_vm2, %v11060_v24, 0 }
0x11e1   : > { %v11145_v28 = vand.u32 4294901760, %v11065_v25  ;;  %v11137_v30 = vand.u32 4294901760, %v11136_v11 }
0x11e2   : > { %16654 = vmatprep.subr.mxu1 %v10677_v0 }
0x11e3   : > { %16655 = vmatpush3.msra.mxu1 %v10677_v0  ;;  %v11146_v12 = vsub.f32 %v11065_v25, %v11145_v28  ;;  %v11138_v38 = vsub.f32 %v11136_v11, %v11137_v30 }
0x11e4   : > { %16664 = vmatprep.subr.mxu1 %v10587_v5 }
0x11e5   : > { %v11147_v36 = vand.u32 4294901760, %v11146_v12  ;;  %v11139_v48 = vand.u32 4294901760, %v11138_v38 }
0x11e7   : > { %v17180_v40 = vpop.eup %17179  ;;  %v11148_v32 = vsub.f32 %v11146_v12, %v11147_v36 }
0x11e8   : > { %v10536_v53 = vsel %vm9499_vm7, %v17180_v40, 0.0  ;;  %v17182_v54 = vpop.eup %17181 }
0x11e9   : > { %10537 = vadd.xlane.f32.xlu0 %v10536_v53  ;;  %v10539_v27 = vsel %vm9499_vm7, %v17182_v54, 0.0  ;;  %v11149_v13 = vand.u32 4294901760, %v11148_v32 }
0x11ed   : > { %10540 = vadd.xlane.f32.xlu0 %v10539_v27 }
0x1203   : > { %11061 = vrot.lane.b32.xlu0 %v20359_v3, %s17566_s8 }
0x1272   : > { %v10538_v60 = vpop.xlane.xlu0 %10537 }
0x1273   : > { %17183 = vrcp.f32 %v10538_v60 }
0x1276   : > { %v10541_v7 = vpop.xlane.xlu0 %10540 }
0x1277   : > { %17185 = vrcp.f32 %v10541_v7 }
0x127a   : > { %v11062_v21 = vpop.permute.xlu0 %11061 }
0x127b   : > { %v11067_v29 = vsel %vm2587_vm2, %v11062_v21, 0 }
0x127c   : > { %v11100_v55 = vand.u32 4294901760, %v11067_v29 }
0x127e   : > { %v20439_v9 = vsub.f32 %v11067_v29, %v11100_v55 }
0x1280   : > { %v17184_v23 = vpop.eup %17183  ;;  %v11188_v14 = vand.u32 4294901760, %v20439_v9 }
0x1281   : > { %v10543_v31 = vmul.f32 %v17184_v23, %v17180_v40 }
0x1282   : > { %v11189_v47 = vsub.f32 %v20439_v9, %v11188_v14 }
0x1283   : > { %v10551_v34 = vsel %vm9499_vm7, %v10543_v31, 0 }
0x1284   : > { %v17186_v26 = vpop.eup %17185  ;;  %v10622_v45 = vand.u32 4294901760, %v10551_v34  ;;  %v11190_v16 = vand.u32 4294901760, %v11189_v47 }
0x1285   : > { %v10545_v44 = vmul.f32 %v17186_v26, %v17182_v54 }
0x1286   : > { %16656 = vmatprep.mubr.f32.mxu1 %v10622_v45  ;;  %v10623_v43 = vsub.f32 %v10551_v34, %v10622_v45 }
0x1287   : > { %v10554_v52 = vsel %vm9499_vm7, %v10545_v44, 0 }
0x1288   : > { %v10632_v8 = vand.u32 4294901760, %v10554_v52  ;;  %v10624_v10 = vand.u32 4294901760, %v10623_v43 }
0x128a   : > { %v10633_v59 = vsub.f32 %v10554_v52, %v10632_v8  ;;  %16657 = vmatmul.mubr.f32.vlgmr.msra.gmra.mxu1 %v10632_v8  ;;  %v10625_v37 = vsub.f32 %v10623_v43, %v10624_v10 }
0x128b   : > { %16665 = vmatpush3.msra.mxu1 %v10587_v5  ;;  %16666 = vmatprep.mubr.f32.mxu1 %v10624_v10 }
0x128c   : > { %16674 = vmatprep.subr.mxu1 %v10587_v5  ;;  %v10626_v2 = vand.u32 4294901760, %v10625_v37  ;;  %v10634_v39 = vand.u32 4294901760, %v10633_v59 }
0x128e   : > { %16651 = vmatprep.mubr.f32.mxu0 %v10626_v2  ;;  %16667 = vmatmul.mubr.f32.vlgmr.msra.gmra.mxu1 %v10634_v39  ;;  %v10635_v63 = vsub.f32 %v10633_v59, %v10634_v39 }
0x128f   : > { %16675 = vmatpush3.msra.mxu1 %v10587_v5  ;;  %16676 = vmatprep.mubr.f32.mxu1 %v10622_v45 }
0x1290   : > { %16684 = vmatprep.subr.mxu1 %v11190_v16  ;;  %v10636_v62 = vand.u32 4294901760, %v10635_v63 }
0x1292   : > { %16652 = vmatmul.mubr.f32.vlgmr.msra.gmra.mxu0 %v10636_v62  ;;  %16677 = vmatmul.mubr.f32.vlgmr.msra.gmra.mxu1 %v10632_v8 }
0x1293   : > { %16660 = vmatpush3.msra.mxu0 %v20426_v49  ;;  %16685 = vmatpush3.xpose.msra.mxu1 %v11190_v16 }
0x1294   : > { %16661 = vmatprep.mubr.f32.mxu0 %v10623_v43  ;;  %16669 = vmatprep.subr.mxu0 %v20430_v35 }
0x1295   : > { %16686 = vmatprep.mubr.f32.mxu1 %v11135_v18  ;;  %16694 = vmatprep.subr.mxu1 %v11100_v55 }
0x1296   : > { %16662 = vmatmul.mubr.f32.vlgmr.msra.gmra.mxu0 %v10633_v59  ;;  %16687 = vmatmul.mubr.f32.vlgmr.msra.gmra.mxu1 %v11145_v28 }
0x1297   : > { %16670 = vmatpush3.msra.mxu0 %v20430_v35  ;;  %16695 = vmatpush3.xpose.msra.mxu1 %v11100_v55 }
0x1298   : > { %16671 = vmatprep.mubr.f32.mxu0 %v10622_v45  ;;  %16679 = vmatprep.subr.mxu0 %v11100_v55 }
0x1299   : > { %16696 = vmatprep.mubr.f32.mxu1 %v11137_v30  ;;  %16704 = vmatprep.subr.mxu1 %v11100_v55 }
0x129a   : > { %16672 = vmatmul.mubr.f32.vlgmr.msra.gmra.mxu0 %v10632_v8  ;;  %16697 = vmatmul.mubr.f32.vlgmr.msra.gmra.mxu1 %v11147_v36 }
0x129b   : > { %16680 = vmatpush3.xpose.msra.mxu0 %v11100_v55  ;;  %16705 = vmatpush3.xpose.msra.mxu1 %v11100_v55 }
0x129c   : > { %16681 = vmatprep.mubr.f32.mxu0 %v11139_v48  ;;  %16689 = vmatprep.subr.mxu0 %v20439_v9 }
0x129d   : > { %16706 = vmatprep.mubr.f32.mxu1 %v11135_v18 }
0x129e   : > { %16682 = vmatmul.mubr.f32.vlgmr.msra.gmra.mxu0 %v11149_v13  ;;  %16707 = vmatmul.mubr.f32.vlgmr.msra.gmra.mxu1 %v11145_v28 }
0x129f   : > { %16690 = vmatpush3.xpose.msra.mxu0 %v20439_v9  ;;  %16691 = vmatprep.mubr.f32.mxu0 %v11136_v11 }
0x12a0   : > { %16699 = vmatprep.subr.mxu0 %v11188_v14 }
0x12a2   : > { %16692 = vmatmul.mubr.f32.vlgmr.msra.gmra.mxu0 %v11146_v12 }
0x12a3   : > { %16700 = vmatpush3.xpose.msra.mxu0 %v11188_v14  ;;  %16701 = vmatprep.mubr.f32.mxu0 %v11135_v18 }
0x12a6   : > { %16702 = vmatmul.mubr.f32.vlgmr.msra.gmra.mxu0 %v11145_v28 }
0x134a   : > { %v16658_v56 = vpop.f32.mrf.mxu1 }
0x134c   : > { %v10714_v57 = vpop.f32.mrf.mxu1 }
0x134e   : > { %v16668_v19 = vpop.f32.mrf.mxu1 }
0x1350   : > { %v10875_v58 = vpop.f32.mrf.mxu1 }
0x1352   : > { %v16653_v50 = vpop.f32.mrf.mxu0  ;;  %v16678_v33 = vpop.f32.mrf.mxu1 }
0x1353   : > { %v10721_v20 = vadd.f32 %v16658_v56, %v16653_v50 }
0x1354   : > { %v10628_v4 = vpop.f32.mrf.mxu0  ;;  %v11035_v1 = vpop.f32.mrf.mxu1 }
0x1355   : > { %v10715_v17 = vadd.f32 %v10714_v57, %v10628_v4 }
0x1356   : > { %v16663_v41 = vpop.f32.mrf.mxu0  ;;  %v16688_v6 = vpop.f32.mrf.mxu1 }
0x1357   : > { %v10802_v5 = vadd.f32 %v16663_v41, %v10721_v20 }
0x1358   : > { %v10794_v49 = vpop.f32.mrf.mxu0  ;;  %v11227_v0 = vpop.f32.mrf.mxu1 }
0x1359   : > { %v10795_v35 = vadd.f32 %v10794_v49, %v10715_v17  ;;  %v10884_v15 = vadd.f32 %v16668_v19, %v10802_v5 }
0x135a   : > { %v16673_v40 = vpop.f32.mrf.mxu0  ;;  %v16698_v21 = vpop.f32.mrf.mxu1 }
0x135b   : > { %v10964_v53 = vadd.f32 %v16673_v40, %v10884_v15  ;;  %v10876_v54 = vadd.f32 %v10875_v58, %v10795_v35 }
0x135c   : > { %v10957_v27 = vpop.f32.mrf.mxu0  ;;  %v11388_v31 = vpop.f32.mrf.mxu1 }
0x135d   : > { %v20452_v60 = vadd.f32 %v16678_v33, %v10964_v53  ;;  %v10958_v7 = vadd.f32 %v10957_v27, %v10876_v54 }
0x135e   : > { %v16683_v29 = vpop.f32.mrf.mxu0  ;;  %v16708_v43 = vpop.f32.mrf.mxu1 }
0x135f   : > { %v20454_v55 = vadd.f32 %v11035_v1, %v10958_v7  ;;  %v11234_v46 = vadd.f32 %v16688_v6, %v16683_v29 }
0x1360   : > { %v11141_v23 = vpop.f32.mrf.mxu0  ;;  %v11548_v18 = vpop.f32.mrf.mxu1 }
0x1361   : > { %v11228_v34 = vadd.f32 %v11227_v0, %v11141_v23 }
0x1362   : > { %v16693_v9 = vpop.f32.mrf.mxu0 }
0x1363   : > { %v11315_v26 = vadd.f32 %v16693_v9, %v11234_v46 }
0x1364   : > { %v11307_v45 = vpop.f32.mrf.mxu0 }
0x1365   : > { %v11308_v44 = vadd.f32 %v11307_v45, %v11228_v34  ;;  %v11397_v24 = vadd.f32 %v16698_v21, %v11315_v26 }
0x1366   : > { %v16703_v14 = vpop.f32.mrf.mxu0 }
0x1367   : > { %v11477_v61 = vadd.f32 %v16703_v14, %v11397_v24  ;;  %v11389_v52 = vadd.f32 %v11388_v31, %v11308_v44 }
0x1368   : > { %v11470_v8 = vpop.f32.mrf.mxu0 }
0x1369   : > { %v11555_v10 = vadd.f32 %v16708_v43, %v11477_v61  ;;  %v11471_v25 = vadd.f32 %v11470_v8, %v11389_v52 }
0x136b   : > { %v11549_v59 = vadd.f32 %v11548_v18, %v11471_v25  ;;  %v11559_v37 = vmul.f32 0.088388346, %v11555_v10 }
0x136d   : > { %v11563_v47 = vsel %vm9499_vm7, %v11559_v37, -inf  ;;  %v11558_v28 = vmul.f32 0.088388346, %v11549_v59 }
0x136e   : > { %11564 = vmax.xlane.f32.xlu1 %v11563_v47 }
0x136f   : > { %v11560_v2 = vsel %vm9499_vm7, %v11558_v28, -inf }
0x1370   : > { %11561 = vmax.xlane.f32.xlu0 %v11560_v2 }
0x137f   : > { %11582 = vrot.lane.b32.xlu1 %v20369_v22, %s17566_s8 }
0x1383   : > { %12092 = vrot.lane.b32.xlu1 %v20285_v51, %s17567_s12 }
0x1387   : > { %12094 = vrot.lane.b32.xlu1 %v19904_v42, %s17567_s12 }
0x13f7   : > { %v11565_v39 = vpop.xlane.xlu1 %11564 }
0x13f8   : > { %v11567_v11 = vsub.f32 %v11559_v37, %v11565_v39 }
0x13f9   : > { %v11562_v16 = vpop.xlane.xlu0 %11561 }
0x13fa   : > { %v11566_v63 = vsub.f32 %v11558_v28, %v11562_v16  ;;  %v11570_v62 = vmul.f32 1.442695, %v11567_v11 }
0x13fb   : > { %v11583_v12 = vpop.permute.xlu1 %11582 }
0x13fc   : > { %v11568_v30 = vmul.f32 1.442695, %v11566_v63  ;;  %v11622_v36 = vand.u32 4294901760, %v11583_v12 }
0x13fe   : > { %17187 = vpow2.f32 %v11568_v30  ;;  %v20464_v38 = vsub.f32 %v11583_v12, %v11622_v36  ;;  %16709 = vmatprep.subr.mxu0 %v11622_v36 }
0x13ff   : > { %16710 = vmatpush3.msra.mxu0 %v11622_v36  ;;  %17189 = vpow2.f32 %v11570_v62  ;;  %v12093_v41 = vpop.permute.xlu1 %12092 }
0x1400   : > { %16719 = vmatprep.subr.mxu0 %v20464_v38  ;;  %v20468_v32 = vand.u32 4294901760, %v20464_v38  ;;  %v12098_v54 = vsel %vm2587_vm2, %v12093_v41, 0 }
0x1401   : > { %v12170_v23 = vand.u32 4294901760, %v12098_v54 }
0x1402   : > { %v11711_v48 = vsub.f32 %v20464_v38, %v20468_v32 }
0x1403   : > { %v12095_v40 = vpop.permute.xlu1 %12094  ;;  %v12171_v44 = vsub.f32 %v12098_v54, %v12170_v23 }
0x1404   : > { %v11712_v13 = vand.u32 4294901760, %v11711_v48  ;;  %v12100_v29 = vsel %vm2587_vm2, %v12095_v40, 0 }
0x1405   : > { %v12180_v34 = vand.u32 4294901760, %v12100_v29  ;;  %v12172_v52 = vand.u32 4294901760, %v12171_v44 }
0x1406   : > { %16714 = vmatprep.subr.mxu1 %v11712_v13 }
0x1407   : > { %16715 = vmatpush3.msra.mxu1 %v11712_v13  ;;  %v12181_v14 = vsub.f32 %v12100_v29, %v12180_v34  ;;  %v12173_v10 = vsub.f32 %v12171_v44, %v12172_v52 }
0x1408   : > { %16724 = vmatprep.subr.mxu1 %v11622_v36 }
0x1409   : > { %v12182_v8 = vand.u32 4294901760, %v12181_v14  ;;  %v12174_v18 = vand.u32 4294901760, %v12173_v10 }
0x140b   : > { %v17188_v56 = vpop.eup %17187  ;;  %v12183_v25 = vsub.f32 %v12181_v14, %v12182_v8 }
0x140c   : > { %v11572_v57 = vsel %vm9499_vm7, %v17188_v56, 0.0  ;;  %v17190_v19 = vpop.eup %17189 }
0x140d   : > { %11573 = vadd.xlane.f32.xlu0 %v11572_v57  ;;  %v11575_v58 = vsel %vm9499_vm7, %v17190_v19, 0.0  ;;  %v12184_v59 = vand.u32 4294901760, %v12183_v25 }
0x1411   : > { %11576 = vadd.xlane.f32.xlu0 %v11575_v58 }
0x1427   : > { %12096 = vrot.lane.b32.xlu0 %v20359_v3, %s17567_s12 }
0x1496   : > { %v11574_v50 = vpop.xlane.xlu0 %11573 }
0x1497   : > { %17191 = vrcp.f32 %v11574_v50 }
0x149a   : > { %v11577_v33 = vpop.xlane.xlu0 %11576 }
0x149b   : > { %17193 = vrcp.f32 %v11577_v33 }
0x149e   : > { %v12097_v20 = vpop.permute.xlu0 %12096 }
0x149f   : > { %v12102_v4 = vsel %vm2587_vm2, %v12097_v20, 0 }
0x14a0   : > { %v12135_v1 = vand.u32 4294901760, %v12102_v4 }
0x14a2   : > { %v20477_v5 = vsub.f32 %v12102_v4, %v12135_v1 }
0x14a4   : > { %v17192_v17 = vpop.eup %17191  ;;  %v12223_v53 = vand.u32 4294901760, %v20477_v5 }
0x14a5   : > { %v11579_v6 = vmul.f32 %v17192_v17, %v17188_v56 }
0x14a6   : > { %v12224_v9 = vsub.f32 %v20477_v5, %v12223_v53 }
0x14a7   : > { %v11586_v49 = vsel %vm9499_vm7, %v11579_v6, 0 }
0x14a8   : > { %v17194_v35 = vpop.eup %17193  ;;  %v11657_v15 = vand.u32 4294901760, %v11586_v49  ;;  %v12225_v24 = vand.u32 4294901760, %v12224_v9 }
0x14a9   : > { %v11581_v0 = vmul.f32 %v17194_v35, %v17190_v19 }
0x14aa   : > { %16716 = vmatprep.mubr.f32.mxu1 %v11657_v15  ;;  %v11658_v3 = vsub.f32 %v11586_v49, %v11657_v15 }
0x14ab   : > { %v11589_v27 = vsel %vm9499_vm7, %v11581_v0, 0 }
0x14ac   : > { %v11667_v7 = vand.u32 4294901760, %v11589_v27  ;;  %v11659_v21 = vand.u32 4294901760, %v11658_v3 }
0x14ae   : > { %v11668_v46 = vsub.f32 %v11589_v27, %v11667_v7  ;;  %16717 = vmatmul.mubr.f32.vlgmr.msra.gmra.mxu1 %v11667_v7  ;;  %v11660_v31 = vsub.f32 %v11658_v3, %v11659_v21 }
0x14af   : > { %16725 = vmatpush3.msra.mxu1 %v11622_v36  ;;  %16726 = vmatprep.mubr.f32.mxu1 %v11659_v21 }
0x14b0   : > { %16734 = vmatprep.subr.mxu1 %v11622_v36  ;;  %v11661_v26 = vand.u32 4294901760, %v11660_v31  ;;  %v11669_v45 = vand.u32 4294901760, %v11668_v46 }
0x14b2   : > { %16711 = vmatprep.mubr.f32.mxu0 %v11661_v26  ;;  %16727 = vmatmul.mubr.f32.vlgmr.msra.gmra.mxu1 %v11669_v45  ;;  %v11670_v43 = vsub.f32 %v11668_v46, %v11669_v45 }
0x14b3   : > { %16735 = vmatpush3.msra.mxu1 %v11622_v36  ;;  %16736 = vmatprep.mubr.f32.mxu1 %v11657_v15 }
0x14b4   : > { %16744 = vmatprep.subr.mxu1 %v12225_v24  ;;  %v11671_v61 = vand.u32 4294901760, %v11670_v43 }
0x14b6   : > { %16712 = vmatmul.mubr.f32.vlgmr.msra.gmra.mxu0 %v11671_v61  ;;  %16737 = vmatmul.mubr.f32.vlgmr.msra.gmra.mxu1 %v11667_v7 }
0x14b7   : > { %16720 = vmatpush3.msra.mxu0 %v20464_v38  ;;  %16745 = vmatpush3.xpose.msra.mxu1 %v12225_v24 }
0x14b8   : > { %16721 = vmatprep.mubr.f32.mxu0 %v11658_v3  ;;  %16729 = vmatprep.subr.mxu0 %v20468_v32 }
0x14b9   : > { %16746 = vmatprep.mubr.f32.mxu1 %v12170_v23  ;;  %16754 = vmatprep.subr.mxu1 %v12135_v1 }
0x14ba   : > { %16722 = vmatmul.mubr.f32.vlgmr.msra.gmra.mxu0 %v11668_v46  ;;  %16747 = vmatmul.mubr.f32.vlgmr.msra.gmra.mxu1 %v12180_v34 }
0x14bb   : > { %16730 = vmatpush3.msra.mxu0 %v20468_v32  ;;  %16755 = vmatpush3.xpose.msra.mxu1 %v12135_v1 }
0x14bc   : > { %16731 = vmatprep.mubr.f32.mxu0 %v11657_v15  ;;  %16739 = vmatprep.subr.mxu0 %v12135_v1 }
0x14bd   : > { %16756 = vmatprep.mubr.f32.mxu1 %v12172_v52  ;;  %16764 = vmatprep.subr.mxu1 %v12135_v1 }
0x14be   : > { %16732 = vmatmul.mubr.f32.vlgmr.msra.gmra.mxu0 %v11667_v7  ;;  %16757 = vmatmul.mubr.f32.vlgmr.msra.gmra.mxu1 %v12182_v8 }
0x14bf   : > { %16740 = vmatpush3.xpose.msra.mxu0 %v12135_v1  ;;  %16765 = vmatpush3.xpose.msra.mxu1 %v12135_v1 }
0x14c0   : > { %16741 = vmatprep.mubr.f32.mxu0 %v12174_v18  ;;  %16749 = vmatprep.subr.mxu0 %v20477_v5 }
0x14c1   : > { %16766 = vmatprep.mubr.f32.mxu1 %v12170_v23 }
0x14c2   : > { %16742 = vmatmul.mubr.f32.vlgmr.msra.gmra.mxu0 %v12184_v59  ;;  %16767 = vmatmul.mubr.f32.vlgmr.msra.gmra.mxu1 %v12180_v34 }
0x14c3   : > { %16750 = vmatpush3.xpose.msra.mxu0 %v20477_v5  ;;  %16751 = vmatprep.mubr.f32.mxu0 %v12171_v44 }
0x14c4   : > { %16759 = vmatprep.subr.mxu0 %v12223_v53 }
0x14c6   : > { %16752 = vmatmul.mubr.f32.vlgmr.msra.gmra.mxu0 %v12181_v14 }
0x14c7   : > { %16760 = vmatpush3.xpose.msra.mxu0 %v12223_v53  ;;  %16761 = vmatprep.mubr.f32.mxu0 %v12170_v23 }
0x14ca   : > { %16762 = vmatmul.mubr.f32.vlgmr.msra.gmra.mxu0 %v12180_v34 }
0x156e   : > { %v16718_v37 = vpop.f32.mrf.mxu1 }
0x1570   : > { %v11749_v47 = vpop.f32.mrf.mxu1 }
0x1572   : > { %v16728_v28 = vpop.f32.mrf.mxu1 }
0x1574   : > { %v11910_v2 = vpop.f32.mrf.mxu1 }
0x1576   : > { %v16713_v39 = vpop.f32.mrf.mxu0  ;;  %v16738_v11 = vpop.f32.mrf.mxu1 }
0x1577   : > { %v11756_v16 = vadd.f32 %v16718_v37, %v16713_v39 }
0x1578   : > { %v11663_v63 = vpop.f32.mrf.mxu0  ;;  %v12070_v12 = vpop.f32.mrf.mxu1 }
0x1579   : > { %v11750_v31 = vadd.f32 %v11749_v47, %v11663_v63 }
0x157a   : > { %v16723_v62 = vpop.f32.mrf.mxu0  ;;  %v16748_v30 = vpop.f32.mrf.mxu1 }
0x157b   : > { %v11837_v36 = vadd.f32 %v16723_v62, %v11756_v16 }
0x157c   : > { %v11829_v38 = vpop.f32.mrf.mxu0  ;;  %v12262_v48 = vpop.f32.mrf.mxu1 }
0x157d   : > { %v11919_v32 = vadd.f32 %v16728_v28, %v11837_v36  ;;  %v11830_v9 = vadd.f32 %v11829_v38, %v11750_v31 }
0x157e   : > { %v16733_v13 = vpop.f32.mrf.mxu0  ;;  %v16758_v58 = vpop.f32.mrf.mxu1 }
0x157f   : > { %v11999_v56 = vadd.f32 %v16733_v13, %v11919_v32  ;;  %v11911_v34 = vadd.f32 %v11910_v2, %v11830_v9 }
0x1580   : > { %v11992_v57 = vpop.f32.mrf.mxu0  ;;  %v12423_v4 = vpop.f32.mrf.mxu1 }
0x1581   : > { %v20490_v19 = vadd.f32 %v16738_v11, %v11999_v56  ;;  %v11993_v26 = vadd.f32 %v11992_v57, %v11911_v34 }
0x1582   : > { %v16743_v50 = vpop.f32.mrf.mxu0  ;;  %v16768_v35 = vpop.f32.mrf.mxu1 }
0x1583   : > { %v12269_v20 = vadd.f32 %v16748_v30, %v16743_v50  ;;  %v12071_v45 = vadd.f32 %v12070_v12, %v11993_v26 }
0x1584   : > { %v12176_v33 = vpop.f32.mrf.mxu0  ;;  %v12583_v27 = vpop.f32.mrf.mxu1 }
0x1585   : > { %v12263_v17 = vadd.f32 %v12262_v48, %v12176_v33 }
0x1586   : > { %v16753_v1 = vpop.f32.mrf.mxu0 }
0x1587   : > { %v12350_v41 = vadd.f32 %v16753_v1, %v12269_v20 }
0x1588   : > { %v12342_v6 = vpop.f32.mrf.mxu0 }
0x1589   : > { %v12343_v5 = vadd.f32 %v12342_v6, %v12263_v17  ;;  %v12432_v49 = vadd.f32 %v16758_v58, %v12350_v41 }
0x158a   : > { %v16763_v15 = vpop.f32.mrf.mxu0 }
0x158b   : > { %v12512_v0 = vadd.f32 %v16763_v15, %v12432_v49  ;;  %v12424_v40 = vadd.f32 %v12423_v4, %v12343_v5  ;;  %v13144_v5 = vld [vmem:[#allocation19 + $0x78] sm:$0xff]  ;;  %v13143_v49 = vld [vmem:[#allocation19 + $0x70] sm:$0xff] }
0x158c   : > { %v12505_v3 = vpop.f32.mrf.mxu0  ;;  %v20515_v15 = vand.u32 4294901760, %v13144_v5 }
0x158d   : > { %v12590_v53 = vadd.f32 %v16768_v35, %v12512_v0  ;;  %v12506_v54 = vadd.f32 %v12505_v3, %v12424_v40  ;;  %v13142_v35 = vld [vmem:[#allocation19 + $0x68] sm:$0xff]  ;;  %v20517_v0 = vand.u32 4294901760, %v13143_v49  ;;  %v13141_v3 = vld [vmem:[#allocation19 + $0x60] sm:$0xff] }
0x158e   : > { %v20519_v40 = vand.u32 4294901760, %v13142_v35 }
0x158f   : > { %v12584_v7 = vadd.f32 %v12583_v27, %v12506_v54  ;;  %v12594_v21 = vmul.f32 0.088388346, %v12590_v53  ;;  %v13140_v53 = vld [vmem:[#allocation19 + $0x58] sm:$0xff]  ;;  %v13139_v54 = vld [vmem:[#allocation19 + $0x50] sm:$0xff]  ;;  %v20521_v27 = vand.u32 4294901760, %v13141_v3  ;;  %v20531_v31 = vsub.f32 %v13143_v49, %v20517_v0 }
0x1590   : > { %v20534_v9 = vsub.f32 %v13142_v35, %v20519_v40 }
0x1591   : > { %v12598_v29 = vsel %vm9499_vm7, %v12594_v21, -inf  ;;  %v12593_v23 = vmul.f32 0.088388346, %v12584_v7  ;;  %v20523_v7 = vand.u32 4294901760, %v13140_v53  ;;  %v20540_v26 = vsub.f32 %v13141_v3, %v20521_v27 }
0x1592   : > { %12599 = vmax.xlane.f32.xlu1 %v12598_v29  ;;  %v13138_v29 = vld [vmem:[#allocation19 + $0x48] sm:$0xff] }
0x1593   : > { %v12595_v46 = vsel %vm9499_vm7, %v12593_v23, -inf  ;;  %v20537_v34 = vand.u32 4294901760, %v13138_v29 }
0x1594   : > { %12596 = vmax.xlane.f32.xlu0 %v12595_v46  ;;  %v20528_v46 = vsub.f32 %v13144_v5, %v20515_v15 }
0x15a3   : > { %12617 = vrot.lane.b32.xlu1 %v20369_v22, %s17567_s12 }
0x15a7   : > { %11049 = vrot.lane.b32.xlu1 %v20452_v60, %s17567_s12 }
0x15ab   : > { %12082 = vrot.lane.b32.xlu1 %v12071_v45, %s17566_s8  ;;  %v20543_v45 = vsub.f32 %v13140_v53, %v20523_v7 }
0x161b   : > { %v12600_v44 = vpop.xlane.xlu1 %12599 }
0x161c   : > { %v12602_v24 = vsub.f32 %v12594_v21, %v12600_v44  ;;  %v20525_v21 = vand.u32 4294901760, %v13139_v54 }
0x161d   : > { %v12597_v43 = vpop.xlane.xlu0 %12596 }
0x161e   : > { %v12601_v14 = vsub.f32 %v12593_v23, %v12597_v43  ;;  %v12605_v52 = vmul.f32 1.442695, %v12602_v24  ;;  %v13137_v23 = vld [vmem:[#allocation19 + $0x40] sm:$0xff]  ;;  %v20547_v44 = vsub.f32 %v13139_v54, %v20525_v21  ;;  %v20550_v24 = vand.u32 4294901760, %v20528_v46  ;;  %v13132_v54 = vld [vmem:[#allocation19 + $0x18] sm:$0xff] }
0x161f   : > { %v12618_v61 = vpop.permute.xlu1 %12617  ;;  %v20553_v43 = vand.u32 4294901760, %v20531_v31 }
0x1620   : > { %v12603_v8 = vmul.f32 1.442695, %v12601_v14  ;;  %v12657_v10 = vand.u32 4294901760, %v12618_v61  ;;  %v20556_v14 = vand.u32 4294901760, %v20534_v9 }
0x1622   : > { %17195 = vpow2.f32 %v12603_v8  ;;  %v12744_v25 = vsub.f32 %v12618_v61, %v12657_v10  ;;  %16769 = vmatprep.subr.mxu0 %v12657_v10  ;;  %v20559_v61 = vand.u32 4294901760, %v13137_v23  ;;  %v20566_v8 = vsub.f32 %v13138_v29, %v20537_v34 }
0x1623   : > { %16770 = vmatpush3.msra.mxu0 %v12657_v10  ;;  %v11050_v22 = vpop.permute.xlu1 %11049  ;;  %17197 = vpow2.f32 %v12605_v52  ;;  %v20562_v52 = vand.u32 4294901760, %v20540_v26 }
0x1624   : > { %v11054_v18 = vadd.f32 %v11050_v22, %v19904_v42  ;;  %16779 = vmatprep.subr.mxu0 %v12744_v25  ;;  %v12745_v60 = vand.u32 4294901760, %v12744_v25  ;;  %v13271_v22 = vsub.f32 %v20534_v9, %v20556_v14 }
0x1626   : > { %11056 = vst.msk [vmem:[#allocation3 + $0x8] sm:$0xff] %vm4491_vm4, %v11054_v18  ;;  %v12746_v59 = vsub.f32 %v12744_v25, %v12745_v60  ;;  %v20575_v18 = vand.u32 4294901760, %v20543_v45 }
0x1627   : > { %v12083_v63 = vpop.permute.xlu1 %12082 }
0x1628   : > { %v12747_v37 = vand.u32 4294901760, %v12746_v59  ;;  %v12088_v30 = vadd.f32 %v12083_v63, %v20285_v51  ;;  %v13136_v59 = vld [vmem:[#allocation19 + $0x38] sm:$0xff] }
0x1629   : > { %v20595_v63 = vand.u32 4294901760, %v13136_v59 }
0x162a   : > { %16774 = vmatprep.subr.mxu1 %v12747_v37 }
0x162b   : > { %16775 = vmatpush3.msra.mxu1 %v12747_v37 }
0x162c   : > { %16784 = vmatprep.subr.mxu1 %v12657_v10 }
0x162f   : > { %v17196_v47 = vpop.eup %17195 }
0x1630   : > { %v12607_v28 = vsel %vm9499_vm7, %v17196_v47, 0.0  ;;  %v17198_v2 = vpop.eup %17197 }
0x1631   : > { %12608 = vadd.xlane.f32.xlu0 %v12607_v28  ;;  %v12610_v39 = vsel %vm9499_vm7, %v17198_v2, 0.0  ;;  %v13278_v28 = vsub.f32 %v20540_v26, %v20562_v52 }
0x1635   : > { %12611 = vadd.xlane.f32.xlu0 %v12610_v39  ;;  %v13272_v39 = vand.u32 4294901760, %v13271_v22  ;;  %v20651_v22 = vand.u32 4294901760, %v13132_v54 }
0x164b   : > { %11047 = vrot.lane.b32.xlu0 %v20454_v55, %s17567_s12 }
0x164f   : > { %12084 = vrot.lane.b32.xlu0 %v20490_v19, %s17566_s8  ;;  %s722_s8 = scalar_lea.vmem [#allocation21], %s14031_s24  ;;  %s13843_s24 = scalar_lea.sflag [#allocation6], %s17883_s16 }
0x1650   : > { %s13856_s12 = sshll.u32 %s722_s8, 4  ;;  %s20877_s12 = int_to_ptr.vmem [resolvable:$true] %s13856_s12 }
0x1651   : > { %s17465_s10 = scalar_lea.vmem %s20877_s12, 256  ;;  %p17472_p4 = scmp.lt.s32.totalorder %s20877_s12, %s17470_s20 }
0x1652   : > { %p17466_p8 = scmp.ne.s32.totalorder %s20877_s12, %s17465_s10  ;;  %p17473_p0 = scmp.lt.s32.totalorder %s17471_s26, %s17465_s10 }
0x1654   : > { %p17467_p1 = pnand %p17466_p8, %p21029_p9  ;;  %p17474_p6 = por %p17473_p0, %p17472_p4 }
0x1656   : > { %p17468_p3 = pneg %p17467_p1 }
0x1658   : > { %p17475_p5 = pnand %p17474_p6, %p17468_p3 }
0x16ba   : > { %v12609_v11 = vpop.xlane.xlu0 %12608 }
0x16bb   : > { %17199 = vrcp.f32 %v12609_v11  ;;  %v13285_v11 = vsub.f32 %v20543_v45, %v20575_v18 }
0x16be   : > { %v12612_v16 = vpop.xlane.xlu0 %12611 }
0x16bf   : > { %17201 = vrcp.f32 %v12612_v16  ;;  %v20592_v16 = vand.u32 4294901760, %v20566_v8 }
0x16c2   : > { %v11048_v12 = vpop.permute.xlu0 %11047 }
0x16c3   : > { %v11053_v62 = vadd.f32 %v11048_v12, %v20285_v51  ;;  %v13279_v12 = vand.u32 4294901760, %v13278_v28 }
0x16c5   : > { %11055 = vst.msk [vmem:[#allocation3] sm:$0xff] %vm4491_vm4, %v11053_v62 }
0x16c6   : > { %12090 = vst.msk [vmem:[#allocation3] sm:$0xff] %vm5449_vm5, %v12088_v30  ;;  %v12085_v36 = vpop.permute.xlu0 %12084 }
0x16c7   : > { %v12089_v55 = vadd.f32 %v12085_v36, %v19904_v42  ;;  %v20604_v36 = vsub.f32 %v13136_v59, %v20595_v63  ;;  %v13131_v59 = vld [vmem:[#allocation19 + $0x10] sm:$0xff] }
0x16c8   : > { %v17200_v38 = vpop.eup %17199 }
0x16c9   : > { %12091 = vst.msk [vmem:[#allocation3 + $0x8] sm:$0xff] %vm5449_vm5, %v12089_v55  ;;  %v12614_v32 = vmul.f32 %v17200_v38, %v17196_v47  ;;  %v13286_v55 = vand.u32 4294901760, %v13285_v11  ;;  %v13299_v38 = vsub.f32 %v20566_v8, %v20592_v16 }
0x16cb   : > { %v12621_v48 = vsel %vm9499_vm7, %v12614_v32, 0  ;;  %v20611_v32 = vand.u32 4294901760, %v20604_v36 }
0x16cc   : > { %v17202_v13 = vpop.eup %17201  ;;  %v12692_v56 = vand.u32 4294901760, %v12621_v48 }
0x16cd   : > { %v12616_v57 = vmul.f32 %v17202_v13, %v17198_v2  ;;  %v20586_v2 = vsub.f32 %v13137_v23, %v20559_v61 }
0x16ce   : > { %16776 = vmatprep.mubr.f32.mxu1 %v12692_v56  ;;  %v12693_v19 = vsub.f32 %v12621_v48, %v12692_v56 }
0x16cf   : > { %v12624_v58 = vsel %vm9499_vm7, %v12616_v57, 0  ;;  %v20601_v30 = vand.u32 4294901760, %v20586_v2  ;;  %v13313_v57 = vsub.f32 %v20604_v36, %v20611_v32 }
0x16d0   : > { %v12702_v50 = vand.u32 4294901760, %v12624_v58  ;;  %v12694_v33 = vand.u32 4294901760, %v12693_v19 }
0x16d1   : > { %v13306_v13 = vsub.f32 %v20586_v2, %v20601_v30 }
0x16d2   : > { %v12703_v20 = vsub.f32 %v12624_v58, %v12702_v50  ;;  %16777 = vmatmul.mubr.f32.vlgmr.msra.gmra.mxu1 %v12702_v50  ;;  %v12695_v4 = vsub.f32 %v12693_v19, %v12694_v33  ;;  %v13314_v58 = vand.u32 4294901760, %v13313_v57 }
0x16d3   : > { %16785 = vmatpush3.msra.mxu1 %v12657_v10  ;;  %16786 = vmatprep.mubr.f32.mxu1 %v12694_v33  ;;  %v13135_v33 = vld [vmem:[#allocation19 + $0x30] sm:$0xff] }
0x16d4   : > { %16794 = vmatprep.subr.mxu1 %v12657_v10  ;;  %v12696_v1 = vand.u32 4294901760, %v12695_v4  ;;  %v12704_v17 = vand.u32 4294901760, %v12703_v20 }
0x16d6   : > { %16771 = vmatprep.mubr.f32.mxu0 %v12696_v1  ;;  %16787 = vmatmul.mubr.f32.vlgmr.msra.gmra.mxu1 %v12704_v17  ;;  %v12705_v41 = vsub.f32 %v12703_v20, %v12704_v17  ;;  %v13134_v1 = vld [vmem:[#allocation19 + $0x28] sm:$0xff] }
0x16d7   : > { %16795 = vmatpush3.msra.mxu1 %v12657_v10  ;;  %16796 = vmatprep.mubr.f32.mxu1 %v12692_v56  ;;  %v13257_v10 = vsub.f32 %v20528_v46, %v20550_v24 }
0x16d8   : > { %v12706_v6 = vand.u32 4294901760, %v12705_v41  ;;  %v20628_v41 = vand.u32 4294901760, %v13134_v1 }
0x16d9   : > { %v13258_v37 = vand.u32 4294901760, %v13257_v10 }
0x16da   : > { %16772 = vmatmul.mubr.f32.vlgmr.msra.gmra.mxu0 %v12706_v6  ;;  %16797 = vmatmul.mubr.f32.vlgmr.msra.gmra.mxu1 %v12702_v50  ;;  %v13133_v6 = vld [vmem:[#allocation19 + $0x20] sm:$0xff]  ;;  %v20636_v49 = vsub.f32 %v13134_v1, %v20628_v41 }
0x16db   : > { %16780 = vmatpush3.msra.mxu0 %v12744_v25  ;;  %16781 = vmatprep.mubr.f32.mxu0 %v12693_v19  ;;  %v13264_v25 = vsub.f32 %v20531_v31, %v20553_v43  ;;  %v13307_v19 = vand.u32 4294901760, %v13306_v13  ;;  %v20638_v35 = vand.u32 4294901760, %v13133_v6  ;;  %v13129_v13 = vld [vmem:[#allocation19] sm:$0xff] }
0x16dc   : > { %16789 = vmatprep.subr.mxu0 %v12745_v60  ;;  %16834 = vmatprep.subr.mxu1 %v13258_v37  ;;  %v20645_v23 = vand.u32 4294901760, %v20636_v49  ;;  %v20676_v1 = vand.u32 4294901760, %v13129_v13 }
0x16dd   : > { %v13265_v47 = vand.u32 4294901760, %v13264_v25  ;;  %16835 = vmatpush3.msra.mxu1 %v13258_v37  ;;  %v20648_v10 = vsub.f32 %v13133_v6, %v20638_v35 }
0x16de   : > { %16782 = vmatmul.mubr.f32.vlgmr.msra.gmra.mxu0 %v12703_v20  ;;  %v20623_v20 = vand.u32 4294901760, %v13135_v33  ;;  %v13327_v28 = vsub.f32 %v20636_v49, %v20645_v23 }
0x16df   : > { %16790 = vmatpush3.msra.mxu0 %v12745_v60  ;;  %16791 = vmatprep.mubr.f32.mxu0 %v12692_v56  ;;  %v20579_v60 = vand.u32 4294901760, %v20547_v44  ;;  %v13300_v56 = vand.u32 4294901760, %v13299_v38  ;;  %v20662_v38 = vand.u32 4294901760, %v13131_v59 }
0x16e0   : > { %16799 = vmatprep.subr.mxu0 %v20515_v15  ;;  %16836 = vmatprep.subr.mxu1 %v13265_v47  ;;  %v20626_v17 = vsub.f32 %v13135_v33, %v20623_v20  ;;  %v13328_v57 = vand.u32 4294901760, %v13327_v28  ;;  %v20689_v28 = vsub.f32 %v13129_v13, %v20676_v1 }
0x16e1   : > { %v13292_v62 = vsub.f32 %v20547_v44, %v20579_v60  ;;  %16837 = vmatpush3.msra.mxu1 %v13265_v47 }
0x16e2   : > { %16792 = vmatmul.mubr.f32.vlgmr.msra.gmra.mxu0 %v12702_v50  ;;  %16838 = vmatprep.subr.mxu1 %v13272_v39  ;;  %v20633_v5 = vand.u32 4294901760, %v20626_v17 }
0x16e3   : > { %16800 = vmatpush3.msra.mxu0 %v20515_v15  ;;  %16839 = vmatpush3.msra.mxu1 %v13272_v39  ;;  %v13293_v48 = vand.u32 4294901760, %v13292_v62  ;;  %v20657_v39 = vand.u32 4294901760, %v20648_v10 }
0x16e4   : > { %16801 = vmatprep.subr.mxu0 %v20517_v0  ;;  %16840 = vmatprep.subr.mxu1 %v13279_v12  ;;  %v13320_v29 = vsub.f32 %v20626_v17, %v20633_v5 }
0x16e5   : > { %16802 = vmatpush3.msra.mxu0 %v20517_v0  ;;  %16841 = vmatpush3.msra.mxu1 %v13279_v12 }
0x16e6   : > { %16803 = vmatprep.subr.mxu0 %v20519_v40  ;;  %16842 = vmatprep.subr.mxu1 %v13286_v55  ;;  %v13321_v47 = vand.u32 4294901760, %v13320_v29 }
0x16e7   : > { %16804 = vmatpush3.msra.mxu0 %v20519_v40  ;;  %16843 = vmatpush3.msra.mxu1 %v13286_v55  ;;  %v20660_v55 = vsub.f32 %v13132_v54, %v20651_v22 }
0x16e8   : > { %16805 = vmatprep.subr.mxu0 %v20521_v27  ;;  %16844 = vmatprep.subr.mxu1 %v13293_v48 }
0x16e9   : > { %16806 = vmatpush3.msra.mxu0 %v20521_v27  ;;  %16845 = vmatpush3.msra.mxu1 %v13293_v48  ;;  %v13130_v48 = vld [vmem:[#allocation19 + $0x8] sm:$0xff]  ;;  %v20671_v33 = vand.u32 4294901760, %v20660_v55 }
0x16ea   : > { %16807 = vmatprep.subr.mxu0 %v20523_v7  ;;  %16846 = vmatprep.subr.mxu1 %v13300_v56 }
0x16eb   : > { %16808 = vmatpush3.msra.mxu0 %v20523_v7  ;;  %16847 = vmatpush3.msra.mxu1 %v13300_v56 }
0x16ec   : > { %16809 = vmatprep.subr.mxu0 %v20525_v21  ;;  %16848 = vmatprep.subr.mxu1 %v13307_v19 }
0x16ed   : > { %16810 = vmatpush3.msra.mxu0 %v20525_v21  ;;  %16849 = vmatpush3.msra.mxu1 %v13307_v19  ;;  %v13334_v19 = vsub.f32 %v20648_v10, %v20657_v39 }
0x16ee   : > { %16811 = vmatprep.subr.mxu0 %v20537_v34  ;;  %16850 = vmatprep.subr.mxu1 %v13314_v58 }
0x16ef   : > { %16812 = vmatpush3.msra.mxu0 %v20537_v34  ;;  %16851 = vmatpush3.msra.mxu1 %v13314_v58  ;;  %v20667_v58 = vand.u32 4294901760, %v13130_v48  ;;  %v13335_v54 = vand.u32 4294901760, %v13334_v19  ;;  %v20699_v19 = vand.u32 4294901760, %v20689_v28 }
0x16f0   : > { %16813 = vmatprep.subr.mxu0 %v20559_v61  ;;  %16852 = vmatprep.subr.mxu1 %v13321_v47 }
0x16f1   : > { %16814 = vmatpush3.msra.mxu0 %v20559_v61  ;;  %16853 = vmatpush3.msra.mxu1 %v13321_v47  ;;  %v20680_v29 = vsub.f32 %v13130_v48, %v20667_v58 }
0x16f2   : > { %16815 = vmatprep.subr.mxu0 %v20595_v63  ;;  %16854 = vmatprep.subr.mxu1 %v13328_v57 }
0x16f3   : > { %16816 = vmatpush3.msra.mxu0 %v20595_v63  ;;  %16855 = vmatpush3.msra.mxu1 %v13328_v57 }
0x16f4   : > { %16817 = vmatprep.subr.mxu0 %v20623_v20  ;;  %16856 = vmatprep.subr.mxu1 %v13335_v54 }
0x16f5   : > { %16818 = vmatpush3.msra.mxu0 %v20623_v20  ;;  %16857 = vmatpush3.msra.mxu1 %v13335_v54  ;;  %v13362_v54 = vsub.f32 %v20689_v28, %v20699_v19 }
0x16f6   : > { %16819 = vmatprep.subr.mxu0 %v20628_v41 }
0x16f7   : > { %16820 = vmatpush3.msra.mxu0 %v20628_v41 }
0x16f8   : > { %16821 = vmatprep.subr.mxu0 %v20638_v35 }
0x16f9   : > { %16822 = vmatpush3.msra.mxu0 %v20638_v35 }
0x16fa   : > { %16823 = vmatprep.subr.mxu0 %v20651_v22 }
0x16fb   : > { %16824 = vmatpush3.msra.mxu0 %v20651_v22 }
0x16fc   : > { %16825 = vmatprep.subr.mxu0 %v20662_v38 }
0x16fd   : > { %16826 = vmatpush3.msra.mxu0 %v20662_v38 }
0x16fe   : > { %16827 = vmatprep.subr.mxu0 %v20667_v58 }
0x16ff   : > { %16828 = vmatpush3.msra.mxu0 %v20667_v58 }
0x1700   : > { %16829 = vmatprep.subr.mxu0 %v20676_v1 }
0x1701   : > { %16830 = vmatpush3.msra.mxu0 %v20676_v1 }
0x1702   : > { %16869 = vmatprep.subr.mxu0 %v20528_v46 }
0x1792   : > { %v16778_v50 = vpop.f32.mrf.mxu1 }
0x1794   : > { %v12784_v4 = vpop.f32.mrf.mxu1 }
0x1796   : > { %v16788_v3 = vpop.f32.mrf.mxu1 }
0x1798   : > { %v12945_v11 = vpop.f32.mrf.mxu1 }
0x179a   : > { %v16773_v53 = vpop.f32.mrf.mxu0 }
0x179b   : > { %v12791_v37 = vadd.f32 %v16778_v50, %v16773_v53 }
0x179c   : > { %v12698_v25 = vpop.f32.mrf.mxu0 }
0x179d   : > { %v12785_v12 = vadd.f32 %v12784_v4, %v12698_v25  ;;  %v20674_v4 = vsub.f32 %v13131_v59, %v20662_v38  ;;  %v16798_v25 = vpop.f32.mrf.mxu1  ;;  %v13341_v59 = vsub.f32 %v20660_v55, %v20671_v33 }
0x179e   : > { %v16783_v62 = vpop.f32.mrf.mxu0 }
0x179f   : > { %v12872_v56 = vadd.f32 %v16783_v62, %v12791_v37  ;;  %v20686_v47 = vand.u32 4294901760, %v20674_v4  ;;  %v20693_v62 = vand.u32 4294901760, %v20680_v29 }
0x17a0   : > { %v12864_v50 = vpop.f32.mrf.mxu0 }
0x17a1   : > { %v12865_v6 = vadd.f32 %v12864_v50, %v12785_v12  ;;  %v12954_v53 = vadd.f32 %v16788_v3, %v12872_v56  ;;  %v13342_v56 = vand.u32 4294901760, %v13341_v59  ;;  %v13348_v57 = vsub.f32 %v20674_v4, %v20686_v47 }
0x17a2   : > { %v16793_v37 = vpop.f32.mrf.mxu0 }
0x17a3   : > { %v13034_v3 = vadd.f32 %v16793_v37, %v12954_v53  ;;  %v12946_v12 = vadd.f32 %v12945_v11, %v12865_v6  ;;  %v13355_v11 = vsub.f32 %v20680_v29, %v20693_v62  ;;  %v13105_v6 = vpop.f32.mrf.mxu1  ;;  %16858 = vmatprep.subr.mxu1 %v13342_v56  ;;  %v13349_v53 = vand.u32 4294901760, %v13348_v57 }
0x17a4   : > { %v13027_v48 = vpop.f32.mrf.mxu0  ;;  %16859 = vmatpush3.msra.mxu1 %v13342_v56 }
0x17a5   : > { %v13112_v13 = vadd.f32 %v16798_v25, %v13034_v3  ;;  %v13028_v50 = vadd.f32 %v13027_v48, %v12946_v12  ;;  %v13356_v59 = vand.u32 4294901760, %v13355_v11  ;;  %16860 = vmatprep.subr.mxu1 %v13349_v53  ;;  %v13363_v25 = vand.u32 4294901760, %v13362_v54 }
0x17a6   : > { %16861 = vmatpush3.msra.mxu1 %v13349_v53 }
0x17a7   : > { %v13106_v37 = vadd.f32 %v13105_v6, %v13028_v50  ;;  %13119 = vrot.lane.b32.xlu0 %v13112_v13, %s17565_s17  ;;  %16862 = vmatprep.subr.mxu1 %v13356_v59 }
0x17a8   : > { %16863 = vmatpush3.msra.mxu1 %v13356_v59 }
0x17a9   : > { %13117 = vrot.lane.b32.xlu1 %v13106_v37, %s17565_s17  ;;  %16864 = vmatprep.subr.mxu1 %v13363_v25 }
0x17aa   : > { %16865 = vmatpush3.msra.mxu1 %v13363_v25 }
0x17ab   : > { %16904 = vmatprep.subr.mxu1 %v20515_v15 }
0x1819   : > { %v13120_v3 = vpop.permute.xlu0 %13119 }
0x181a   : > { %v13124_v12 = vadd.f32 %v13120_v3, %v19904_v42 }
0x181b   : > { %v13118_v48 = vpop.permute.xlu1 %13117 }
0x181c   : > { %13126 = vst.msk [vmem:[#allocation3 + $0x8] sm:$0xff] %vm6407_vm6, %v13124_v12  ;;  %v13123_v56 = vadd.f32 %v13118_v48, %v20285_v51 }
0x181e   : > { %13125 = vst.msk [vmem:[#allocation3] sm:$0xff] %vm6407_vm6, %v13123_v56 }
0x1823   : > { %v20715_v57 = vld [vmem:[#allocation3 + $0x8] sm:$0xff] }
0x1824   : > { %v20718_v13 = vand.u32 4294901760, %v20715_v57 }
0x1825   : > { %v20720_v50 = vld [vmem:[#allocation3] sm:$0xff] }
0x1826   : > { %v20723_v11 = vand.u32 4294901760, %v20720_v50  ;;  %v20727_v42 = vsub.f32 %v20715_v57, %v20718_v13 }
0x1828   : > { %16866 = vmatprep.mubr.f32.mxu1 %v20723_v11  ;;  %v13234_v51 = vsub.f32 %v20720_v50, %v20723_v11  ;;  %v13245_v6 = vand.u32 4294901760, %v20727_v42 }
0x1829   : > { %16867 = vmatmul.mubr.f32.vlgmr.msra.gmra.mxu1 %v20718_v13 }
0x182a   : > { %16905 = vmatpush3.msra.mxu1 %v20515_v15  ;;  %v13235_v53 = vand.u32 4294901760, %v13234_v51  ;;  %v13246_v54 = vsub.f32 %v20727_v42, %v13245_v6 }
0x182b   : > { %16906 = vmatprep.subr.mxu1 %v20517_v0 }
0x182c   : > { %16907 = vmatpush3.msra.mxu1 %v20517_v0  ;;  %16936 = vmatprep.mubr.f32.mxu1 %v13235_v53  ;;  %v13236_v37 = vsub.f32 %v13234_v51, %v13235_v53  ;;  %v13247_v25 = vand.u32 4294901760, %v13246_v54 }
0x182d   : > { %16908 = vmatprep.subr.mxu1 %v20519_v40 }
0x182e   : > { %16909 = vmatpush3.msra.mxu1 %v20519_v40  ;;  %v13237_v59 = vand.u32 4294901760, %v13236_v37 }
0x182f   : > { %16910 = vmatprep.subr.mxu1 %v20521_v27 }
0x1830   : > { %16911 = vmatpush3.msra.mxu1 %v20521_v27  ;;  %16831 = vmatprep.mubr.f32.mxu0 %v13237_v59 }
0x1831   : > { %16912 = vmatprep.subr.mxu1 %v20523_v7  ;;  %16832 = vmatmul.mubr.f32.vlgmr.msra.gmra.mxu0 %v13247_v25 }
0x1832   : > { %16870 = vmatpush3.msra.mxu0 %v20528_v46  ;;  %16913 = vmatpush3.msra.mxu1 %v20523_v7 }
0x1833   : > { %16871 = vmatprep.subr.mxu0 %v20531_v31  ;;  %16901 = vmatprep.mubr.f32.mxu0 %v13234_v51 }
0x1834   : > { %16914 = vmatprep.subr.mxu1 %v20525_v21  ;;  %16872 = vmatpush3.msra.mxu0 %v20531_v31 }
0x1835   : > { %16915 = vmatpush3.msra.mxu1 %v20525_v21  ;;  %16873 = vmatprep.subr.mxu0 %v20534_v9 }
0x1836   : > { %16916 = vmatprep.subr.mxu1 %v20537_v34  ;;  %16874 = vmatpush3.msra.mxu0 %v20534_v9 }
0x1837   : > { %16917 = vmatpush3.msra.mxu1 %v20537_v34  ;;  %16875 = vmatprep.subr.mxu0 %v20540_v26 }
0x1838   : > { %16918 = vmatprep.subr.mxu1 %v20559_v61  ;;  %16876 = vmatpush3.msra.mxu0 %v20540_v26 }
0x1839   : > { %16919 = vmatpush3.msra.mxu1 %v20559_v61  ;;  %16877 = vmatprep.subr.mxu0 %v20543_v45 }
0x183a   : > { %16920 = vmatprep.subr.mxu1 %v20595_v63  ;;  %16878 = vmatpush3.msra.mxu0 %v20543_v45 }
0x183b   : > { %16921 = vmatpush3.msra.mxu1 %v20595_v63  ;;  %16879 = vmatprep.subr.mxu0 %v20547_v44 }
0x183c   : > { %16922 = vmatprep.subr.mxu1 %v20623_v20  ;;  %16880 = vmatpush3.msra.mxu0 %v20547_v44 }
0x183d   : > { %16923 = vmatpush3.msra.mxu1 %v20623_v20  ;;  %16881 = vmatprep.subr.mxu0 %v20566_v8 }
0x183e   : > { %16924 = vmatprep.subr.mxu1 %v20628_v41  ;;  %16882 = vmatpush3.msra.mxu0 %v20566_v8 }
0x183f   : > { %16925 = vmatpush3.msra.mxu1 %v20628_v41  ;;  %16883 = vmatprep.subr.mxu0 %v20586_v2 }
0x1840   : > { %16926 = vmatprep.subr.mxu1 %v20638_v35  ;;  %16884 = vmatpush3.msra.mxu0 %v20586_v2 }
0x1841   : > { %16927 = vmatpush3.msra.mxu1 %v20638_v35  ;;  %16885 = vmatprep.subr.mxu0 %v20604_v36 }
0x1842   : > { %16928 = vmatprep.subr.mxu1 %v20651_v22  ;;  %16886 = vmatpush3.msra.mxu0 %v20604_v36 }
0x1843   : > { %16929 = vmatpush3.msra.mxu1 %v20651_v22  ;;  %16887 = vmatprep.subr.mxu0 %v20626_v17 }
0x1844   : > { %16930 = vmatprep.subr.mxu1 %v20662_v38  ;;  %16888 = vmatpush3.msra.mxu0 %v20626_v17 }
0x1845   : > { %16931 = vmatpush3.msra.mxu1 %v20662_v38  ;;  %16889 = vmatprep.subr.mxu0 %v20636_v49 }
0x1846   : > { %16932 = vmatprep.subr.mxu1 %v20667_v58  ;;  %16890 = vmatpush3.msra.mxu0 %v20636_v49 }
0x1847   : > { %16933 = vmatpush3.msra.mxu1 %v20667_v58  ;;  %16891 = vmatprep.subr.mxu0 %v20648_v10 }
0x1848   : > { %16934 = vmatprep.subr.mxu1 %v20676_v1  ;;  %16892 = vmatpush3.msra.mxu0 %v20648_v10 }
0x1849   : > { %16935 = vmatpush3.msra.mxu1 %v20676_v1  ;;  %16893 = vmatprep.subr.mxu0 %v20660_v55 }
0x184a   : > { %16937 = vmatmul.mubr.f32.vlgmr.msra.gmra.mxu1 %v13245_v6  ;;  %16974 = vmatprep.subr.mxu1 %v20515_v15 }
0x184b   : > { %16894 = vmatpush3.msra.mxu0 %v20660_v55  ;;  %16975 = vmatpush3.msra.mxu1 %v20515_v15 }
0x184c   : > { %17006 = vmatprep.mubr.f32.mxu1 %v20723_v11  ;;  %16895 = vmatprep.subr.mxu0 %v20674_v4 }
0x184d   : > { %16976 = vmatprep.subr.mxu1 %v20517_v0  ;;  %16896 = vmatpush3.msra.mxu0 %v20674_v4 }
0x184e   : > { %16977 = vmatpush3.msra.mxu1 %v20517_v0  ;;  %16897 = vmatprep.subr.mxu0 %v20680_v29  ;;  %v14049_v0 = vld [vmem:[%s21027_s18] ss:$0 sm:$0xff] }
0x184f   : > { %16978 = vmatprep.subr.mxu1 %v20519_v40  ;;  %16898 = vmatpush3.msra.mxu0 %v20680_v29 }
0x1850   : > { %16979 = vmatpush3.msra.mxu1 %v20519_v40  ;;  %16899 = vmatprep.subr.mxu0 %v20689_v28 }
0x1851   : > { %16980 = vmatprep.subr.mxu1 %v20521_v27  ;;  %16900 = vmatpush3.msra.mxu0 %v20689_v28 }
0x1852   : > { %16981 = vmatpush3.msra.mxu1 %v20521_v27  ;;  %16902 = vmatmul.mubr.f32.vlgmr.msra.gmra.mxu0 %v20727_v42 }
0x1853   : > { %16939 = vmatprep.subr.mxu0 %v20550_v24  ;;  %16982 = vmatprep.subr.mxu1 %v20523_v7 }
0x1854   : > { %16940 = vmatpush3.msra.mxu0 %v20550_v24  ;;  %16971 = vmatprep.mubr.f32.mxu0 %v20723_v11 }
0x1855   : > { %16983 = vmatpush3.msra.mxu1 %v20523_v7  ;;  %16941 = vmatprep.subr.mxu0 %v20553_v43 }
0x1856   : > { %16984 = vmatprep.subr.mxu1 %v20525_v21  ;;  %16942 = vmatpush3.msra.mxu0 %v20553_v43 }
0x1857   : > { %16985 = vmatpush3.msra.mxu1 %v20525_v21  ;;  %16943 = vmatprep.subr.mxu0 %v20556_v14 }
0x1858   : > { %16986 = vmatprep.subr.mxu1 %v20537_v34  ;;  %16944 = vmatpush3.msra.mxu0 %v20556_v14 }
0x1859   : > { %16987 = vmatpush3.msra.mxu1 %v20537_v34  ;;  %16945 = vmatprep.subr.mxu0 %v20562_v52 }
0x185a   : > { %16988 = vmatprep.subr.mxu1 %v20559_v61  ;;  %16946 = vmatpush3.msra.mxu0 %v20562_v52 }
0x185b   : > { %16989 = vmatpush3.msra.mxu1 %v20559_v61  ;;  %16947 = vmatprep.subr.mxu0 %v20575_v18 }
0x185c   : > { %16990 = vmatprep.subr.mxu1 %v20595_v63  ;;  %16948 = vmatpush3.msra.mxu0 %v20575_v18 }
0x185d   : > { %16991 = vmatpush3.msra.mxu1 %v20595_v63  ;;  %16949 = vmatprep.subr.mxu0 %v20579_v60 }
0x185e   : > { %16992 = vmatprep.subr.mxu1 %v20623_v20  ;;  %16950 = vmatpush3.msra.mxu0 %v20579_v60 }
0x185f   : > { %16993 = vmatpush3.msra.mxu1 %v20623_v20  ;;  %16951 = vmatprep.subr.mxu0 %v20592_v16 }
0x1860   : > { %16994 = vmatprep.subr.mxu1 %v20628_v41  ;;  %16952 = vmatpush3.msra.mxu0 %v20592_v16 }
0x1861   : > { %16995 = vmatpush3.msra.mxu1 %v20628_v41  ;;  %16953 = vmatprep.subr.mxu0 %v20601_v30 }
0x1862   : > { %16996 = vmatprep.subr.mxu1 %v20638_v35  ;;  %16954 = vmatpush3.msra.mxu0 %v20601_v30 }
0x1863   : > { %16997 = vmatpush3.msra.mxu1 %v20638_v35  ;;  %16955 = vmatprep.subr.mxu0 %v20611_v32 }
0x1864   : > { %16998 = vmatprep.subr.mxu1 %v20651_v22  ;;  %16956 = vmatpush3.msra.mxu0 %v20611_v32 }
0x1865   : > { %16999 = vmatpush3.msra.mxu1 %v20651_v22  ;;  %16957 = vmatprep.subr.mxu0 %v20633_v5 }
0x1866   : > { %17000 = vmatprep.subr.mxu1 %v20662_v38  ;;  %16958 = vmatpush3.msra.mxu0 %v20633_v5 }
0x1867   : > { %17001 = vmatpush3.msra.mxu1 %v20662_v38  ;;  %16959 = vmatprep.subr.mxu0 %v20645_v23 }
0x1868   : > { %17002 = vmatprep.subr.mxu1 %v20667_v58  ;;  %16960 = vmatpush3.msra.mxu0 %v20645_v23 }
0x1869   : > { %17003 = vmatpush3.msra.mxu1 %v20667_v58  ;;  %16961 = vmatprep.subr.mxu0 %v20657_v39 }
0x186a   : > { %17004 = vmatprep.subr.mxu1 %v20676_v1  ;;  %16962 = vmatpush3.msra.mxu0 %v20657_v39 }
0x186b   : > { %17005 = vmatpush3.msra.mxu1 %v20676_v1  ;;  %16963 = vmatprep.subr.mxu0 %v20671_v33 }
0x186c   : > { %17007 = vmatmul.mubr.f32.vlgmr.msra.gmra.mxu1 %v20718_v13  ;;  %16964 = vmatpush3.msra.mxu0 %v20671_v33 }
0x186d   : > { %16965 = vmatprep.subr.mxu0 %v20686_v47 }
0x186e   : > { %16966 = vmatpush3.msra.mxu0 %v20686_v47 }
0x186f   : > { %16967 = vmatprep.subr.mxu0 %v20693_v62 }
0x1870   : > { %16968 = vmatpush3.msra.mxu0 %v20693_v62 }
0x1871   : > { %16969 = vmatprep.subr.mxu0 %v20699_v19 }
0x1872   : > { %16970 = vmatpush3.msra.mxu0 %v20699_v19 }
0x1873   : > { %16972 = vmatmul.mubr.f32.vlgmr.msra.gmra.mxu0 %v20718_v13 }
0x18e9   : > { %v16868_v40 = vpop.f32.mrf.mxu1 }
0x18eb   : > { %v13400_v31 = vpop.f32.mrf.mxu1 }
0x18f1   : > { %v16833_v15 = vpop.f32.mrf.mxu0 }
0x18f2   : > { %v13250_v7 = vadd.f32 %v16833_v15, %v14049_v0 }
0x18f3   : > { %v13239_v27 = vpop.f32.mrf.mxu0 }
0x18f4   : > { %v13240_v46 = vadd.f32 %v14049_v0, %v13239_v27  ;;  %v13407_v9 = vadd.f32 %v16868_v40, %v13250_v7 }
0x18f6   : > { %v13401_v44 = vadd.f32 %v13400_v31, %v13240_v46 }
0x190a   : > { %v16938_v34 = vpop.f32.mrf.mxu1 }
0x190c   : > { %v13606_v43 = vpop.f32.mrf.mxu1 }
0x1912   : > { %v16903_v21 = vpop.f32.mrf.mxu0 }
0x1913   : > { %v13518_v45 = vadd.f32 %v16903_v21, %v13407_v9 }
0x1914   : > { %v13510_v26 = vpop.f32.mrf.mxu0 }
0x1915   : > { %v13511_v24 = vadd.f32 %v13510_v26, %v13401_v44  ;;  %v13615_v14 = vadd.f32 %v16938_v34, %v13518_v45 }
0x1917   : > { %v13607_v18 = vadd.f32 %v13606_v43, %v13511_v24 }
0x192c   : > { %v17008_v61 = vpop.f32.mrf.mxu1 }
0x192e   : > { %v13826_v63 = vpop.f32.mrf.mxu1 }
0x1933   : > { %v16973_v52 = vpop.f32.mrf.mxu0 }
0x1934   : > { %v13740_v8 = vadd.f32 %v16973_v52, %v13615_v14 }
0x1935   : > { %v13733_v60 = vpop.f32.mrf.mxu0 }
0x1936   : > { %v13833_v2 = vadd.f32 %v17008_v61, %v13740_v8  ;;  %v13734_v16 = vadd.f32 %v13733_v60, %v13607_v18 }
0x1938   : > { %v13837_v30 = vmax.f32 %v13833_v2, 0.0  ;;  %v13827_v36 = vadd.f32 %v13826_v63, %v13734_v16 }
0x193a   : > { %v13839_v32 = vadd.f32 %v13837_v30, %v20715_v57  ;;  %v13836_v20 = vmax.f32 %v13827_v36, 0.0 }
0x193c   : > { %13841 = vst [vmem:[%s722_s8 + $0x8] sm:$0xff] %v13839_v32  ;;  %v13838_v17 = vadd.f32 %v13836_v20, %v20720_v50 }
0x193e   : > { %13840 = vst [vmem:[%s722_s8] sm:$0xff] %v13838_v17 }
0x193f   : > { %17478 = shalt.err (!%p17475_p5)
}
0x1940   : > { %s17479_s17 = scalar_lea.hbm %s20882_s6, 256  ;;  %s17483_s8 = scalar_lea.hbm %s21028_s2, 512 }
0x1941   : > { %p17480_p7 = scmp.ne.s32.totalorder %s20882_s6, %s17479_s17  ;;  %p17484_p12 = scmp.lt.s32.totalorder %s20882_s6, %s21028_s2 }
0x1942   : > { %p17485_p2 = scmp.lt.s32.totalorder %s17483_s8, %s17479_s17 }
0x1943   : > { %p17481_p11 = pnand %p17480_p7, %p21029_p9 }
0x1944   : > { %p17486_p13 = por %p17485_p2, %p17484_p12 }
0x1945   : > { %p17482_p10 = pneg %p17481_p11 }
0x1947   : > { %p17487_p8 = pnand %p17486_p13, %p17482_p10 }
0x1949   : > { %17490 = shalt.err (!%p17487_p8)
}
0x194a   : > { %s17569_s19 = smov 128   ;;  %s17570_s10 = smov 8  }
0x194b   : > { %17047 = dma.vmem_to_hbm [thread:$0]  (%p21029_p9), %s20877_s12, 256, %s20882_s6, %s13843_s24, %s17569_s19, %s17569_s19, %s17570_s10  }
0x194c PF: > { %s13871_s1 = sand.u32 1, %s17537_s27   ;;  %p21030_p1 = scmp.ne.s32.totalorder %s20995_s4, 0 }
0x194d   : > { %p21031_p3 = scmp.ge.s32.totalorder %s17549_s30, 2  ;;  %s13872_s20 = scalar_lea.sflag [#allocation6], %s13871_s1 }
0x194f   : > { %p17082_p4 = pnand %p21031_p3, %p21030_p1 }
0x1951   : > { %p17083_p0 = pneg %p17082_p4 }
0x1953   : > { %17532 = dma.done.wait (%p17083_p0), %s13872_s20, 256  }
0x1954   : > { %17534 = vsyncadd (%p17083_p0), %s13872_s20, 4294967040  ;;  %s21032_s26 = sld [smem:[#allocation29_spill]]  ;;  %p36_p6 = scmp.ge.s32.totalorder %s17814_s25, 4  }
0x1955   : > { %s21033_s27 = smov %s17541_s28  ;;  %s21034_s28 = smov %s17545_s29 }
0x1956   : > { %s21036_s30 = smov %s17814_s25  ;;  %38 = sbr.rel (!%p36_p6) target bundleno = 23 (0x17), region = 173 }
0x195a   : > { %s21035_s29 = smov %s21032_s26 }
0x195b   :  { %13877 = vsyncpa [#allocation5], 1 }
0x195c   :  { %13879 = vsyncpa [#allocation5 + $0x1], 1 }
0x195d   :  { %13880 = vsyncpa [#allocation8], 1 }
0x195e   :  { %13881 = vsyncpa [#allocation11], 1 }
0x195f   :  { %13882 = vsyncpa [#allocation14], 1 }
0x1960   :  { %13883 = vsyncpa [#allocation17], 1 }
0x1961   :  { %13884 = vsyncpa [#allocation20], 1 }
0x1962   :  { %13885 = vsyncpa [#allocation6], 1 }
0x1963   :  { %13887 = vsyncpa [#allocation6 + $0x1], 1 }

</bundles_post_ra>
